<compile_context>
chip_gen: v5e
topology: v5e:2x2
jax: 0.10.0
libtpu: 0.0.40
codegen_flags: <defaults>
</compile_context>

<pallas_src>
import math
import functools

import jax
import jax.numpy as jnp
from jax.experimental import pallas as pl
from jax.experimental.pallas import tpu as pltpu

# ----- constants matching PixelClassificationCriterion.__init__ --------------
OHEM_THRESH = float(-math.log(0.7))   # -log(ohem_thresh)
N_MIN_DIVISOR = 16
IGNORE_INDEX = 255
AUX_WEIGHT = 0.4
SCALE = 8


# --------------------------- bilinear interp matrices ------------------------
def _bilinear_matrix(in_size, out_size, scale):
    """Row-stochastic matrix reproducing PyTorch bilinear (align_corners=False)."""
    o = jnp.arange(out_size, dtype=jnp.float32)
    src = (o + 0.5) / scale - 0.5
    src = jnp.maximum(src, 0.0)                       # PyTorch clamps below 0
    i0 = jnp.floor(src).astype(jnp.int32)
    i0 = jnp.minimum(i0, in_size - 1)
    i1 = jnp.where(i0 < in_size - 1, i0 + 1, i0)
    l1 = src - i0.astype(jnp.float32)
    l0 = 1.0 - l1
    mat = (l0[:, None] * jax.nn.one_hot(i0, in_size, dtype=jnp.float32)
           + l1[:, None] * jax.nn.one_hot(i1, in_size, dtype=jnp.float32))
    return mat                                        # (out_size, in_size)


# ------------------------------- tiling helpers -------------------------------
def _pick_row_block(h_out, cap=128):
    """Largest row block <= cap that tiles h_out (multiple of 8), else h_out."""
    if h_out <= cap:
        return h_out
    for t in range(cap, 7, -1):
        if h_out % t == 0 and t % 8 == 0:
            return t
    return h_out


def _pick_rch(t_rows):
    """Row-chunk used inside the kernel (bounds vreg pressure of the CE)."""
    for r in (16, 8):
        if t_rows % r == 0:
            return r
    return t_rows


# ------------------- shared in-kernel chunked CE + OHEM stats -----------------
def _ce_rows(load_logits, t_ref, loss_ref, stats_ref, *, C, THo, Wo, rch):
    """Chunked per-pixel CE over a (THo, Wo) row block.

    load_logits(rs) must return a (C, rch, Wo) f32 slab of logits for the
    output rows [rs, rs+rch).  Writes loss_ref[0, rs:rs+rch, :] and accumulates
    lane-wise {sum(hard loss), #hard, #valid} into stats_ref[0, 0:3, :].
    """
    nch = THo // rch
    zero = jnp.zeros((1, Wo), jnp.float32)

    def body(i, carry):
        s_hard, n_hard, n_valid = carry
        rs = pl.multiple_of(i * rch, rch)
        lg = load_logits(rs).astype(jnp.float32)              # (C, rch, Wo)
        tc = t_ref[0, pl.ds(rs, rch), :]                      # (rch, Wo) i32

        m = jnp.max(lg, axis=0)                               # (rch, Wo)
        lse = m + jnp.log(jnp.sum(jnp.exp(lg - m[None, :, :]), axis=0))
        cls = jax.lax.broadcasted_iota(jnp.int32, (C, rch, Wo), 0)
        tgt = jnp.sum(jnp.where(cls == tc[None, :, :], lg, 0.0), axis=0)

        valid = tc != IGNORE_INDEX
        loss = jnp.where(valid, lse - tgt, 0.0)               # ignored -> 0
        loss_ref[0, pl.ds(rs, rch), :] = loss

        hard = loss > OHEM_THRESH
        s_hard = s_hard + jnp.sum(jnp.where(hard, loss, 0.0), axis=0, keepdims=True)
        n_hard = n_hard + jnp.sum(hard.astype(jnp.float32), axis=0, keepdims=True)
        n_valid = n_valid + jnp.sum(valid.astype(jnp.float32), axis=0, keepdims=True)
        return (s_hard, n_hard, n_valid)

    s_hard, n_hard, n_valid = jax.lax.fori_loop(
        0, nch, body, (zero, zero, zero), unroll=True)

    stats_ref[0, 0:1, :] += s_hard
    stats_ref[0, 1:2, :] += n_hard
    stats_ref[0, 2:3, :] += n_valid


# -------------------- fused upsample-x8 + CE kernel (main branch) -------------
def _fused_up_ce_kernel(x_ref, a_ref, bt_ref, t_ref, loss_ref, stats_ref,
                        up_ref, *, C, H, rch):
    # x_ref:    (1, C*H, W)    low-res logits for batch n (all channels)
    # a_ref:    (THo, H)       rows of the vertical interp matrix for this block
    # bt_ref:   (W, Wo)        horizontal interp matrix (transposed)
    # t_ref:    (1, THo, Wo)   target block
    # loss_ref: (1, THo, Wo)   per-pixel loss output block
    # stats_ref:(1, 3, Wo)     per-batch lane-wise stats accumulator
    # up_ref:   VMEM scratch (C, THo, Wo) for the upsampled logits
    @pl.when(pl.program_id(1) == 0)
    def _():
        stats_ref[...] = jnp.zeros_like(stats_ref)

    THo, Wo = up_ref.shape[1], up_ref.shape[2]

    a = a_ref[...]                                            # (THo, H)
    bt = bt_ref[...]                                          # (W, Wo)
    x2d = x_ref[0]                                            # (C*H, W)

    # Horizontal interp for all channels at once (lane-dense intermediate).
    tmp = jnp.dot(x2d, bt, preferred_element_type=jnp.float32)  # (C*H, Wo)
    # Vertical interp per channel into VMEM scratch (M=THo, K=H, N=Wo).
    for c in range(C):
        up_ref[c] = jnp.dot(a, tmp[c * H:(c + 1) * H, :],
                            preferred_element_type=jnp.float32)  # (THo, Wo)

    _ce_rows(lambda rs: up_ref[:, pl.ds(rs, rch), :],
             t_ref, loss_ref, stats_ref, C=C, THo=THo, Wo=Wo, rch=rch)


def _fused_upsample_ce(pred_main, target):
    """pred_main: (N, C, H, W); target: (N, 8H, 8W) int.

    Returns (loss (N, Ho, Wo) f32, stats (N, 3, Wo) f32)."""
    N, C, H, W = pred_main.shape
    Ho, Wo = H * SCALE, W * SCALE
    THo = _pick_row_block(Ho)
    rch = _pick_rch(THo)

    A = _bilinear_matrix(H, Ho, SCALE)                 # (Ho, H)
    BT = _bilinear_matrix(W, Wo, SCALE).T              # (W, Wo)
    x = pred_main.astype(jnp.float32).reshape(N, C * H, W)   # free, contiguous
    t = target.astype(jnp.int32)

    loss, stats = pl.pallas_call(
        functools.partial(_fused_up_ce_kernel, C=C, H=H, rch=rch),
        out_shape=(jax.ShapeDtypeStruct((N, Ho, Wo), jnp.float32),
                   jax.ShapeDtypeStruct((N, 3, Wo), jnp.float32)),
        grid=(N, Ho // THo),
        in_specs=[
            pl.BlockSpec((1, C * H, W), lambda n, r: (n, 0, 0)),
            pl.BlockSpec((THo, H), lambda n, r: (r, 0)),
            pl.BlockSpec((W, Wo), lambda n, r: (0, 0)),
            pl.BlockSpec((1, THo, Wo), lambda n, r: (n, r, 0)),
        ],
        out_specs=(pl.BlockSpec((1, THo, Wo), lambda n, r: (n, r, 0)),
                   pl.BlockSpec((1, 3, Wo), lambda n, r: (n, 0, 0))),
        scratch_shapes=[pltpu.VMEM((C, THo, Wo), jnp.float32)],
        compiler_params=pltpu.CompilerParams(
            dimension_semantics=("parallel", "arbitrary")),
    )(x, A, BT, t)
    return loss, stats


# ----------------------- CE kernel on NCHW logits (aux branch) ----------------
def _aux_ce_kernel(x_ref, t_ref, loss_ref, stats_ref, *, C, rch):
    # x_ref: (1, C, THo, Wo); t_ref/loss_ref: (1, THo, Wo); stats_ref: (1, 3, Wo)
    @pl.when(pl.program_id(1) == 0)
    def _():
        stats_ref[...] = jnp.zeros_like(stats_ref)

    THo, Wo = t_ref.shape[1], t_ref.shape[2]
    _ce_rows(lambda rs: x_ref[0, :, pl.ds(rs, rch), :],
             t_ref, loss_ref, stats_ref, C=C, THo=THo, Wo=Wo, rch=rch)


def _ce_nchw(logits, target):
    """logits: (N, C, Ho, Wo); target: (N, Ho, Wo) int.  No wrapper transpose."""
    N, C, Ho, Wo = logits.shape
    THo = _pick_row_block(Ho)
    rch = _pick_rch(THo)
    x = logits.astype(jnp.float32)
    t = target.astype(jnp.int32)

    loss, stats = pl.pallas_call(
        functools.partial(_aux_ce_kernel, C=C, rch=rch),
        out_shape=(jax.ShapeDtypeStruct((N, Ho, Wo), jnp.float32),
                   jax.ShapeDtypeStruct((N, 3, Wo), jnp.float32)),
        grid=(N, Ho // THo),
        in_specs=[
            pl.BlockSpec((1, C, THo, Wo), lambda n, r: (n, 0, r, 0)),
            pl.BlockSpec((1, THo, Wo), lambda n, r: (n, r, 0)),
        ],
        out_specs=(pl.BlockSpec((1, THo, Wo), lambda n, r: (n, r, 0)),
                   pl.BlockSpec((1, 3, Wo), lambda n, r: (n, 0, 0))),
        compiler_params=pltpu.CompilerParams(
            dimension_semantics=("parallel", "arbitrary")),
    )(x, t)
    return loss, stats


# ------------------------------ OHEM reduction --------------------------------
def _ohem_from_loss_stats(loss, stats):
    sum_hard = jnp.sum(stats[:, 0, :])
    cnt_hard = jnp.sum(stats[:, 1, :])
    cnt_valid = jnp.sum(stats[:, 2, :])
    n_min = cnt_valid.astype(jnp.int32) // N_MIN_DIVISOR
    mean_hard = sum_hard / cnt_hard                    # mean of losses > thresh

    # Fallback (mean of top-n_min losses) only evaluated when actually needed.
    # TODO(synk): dynamic-k top-k has no clean Pallas equivalent; done in JAX
    # via sort + cumsum, guarded behind lax.cond so it is skipped at runtime.
    def _topk_mean(_):
        s = jnp.sort(loss.reshape(-1))[::-1]
        csum = jnp.cumsum(s)
        idx = jnp.maximum(n_min - 1, 0)
        return csum[idx] / n_min.astype(jnp.float32)

    def _hard_mean(_):
        return mean_hard

    return jax.lax.cond(cnt_hard.astype(jnp.int32) < n_min,
                        _topk_mean, _hard_mean, operand=None)


def pixel_classification_criterion(pred_main, pred_aux, target):
    """pred_main: (N,C,H,W); pred_aux: (N,C,8H,8W); target: (N,8H,8W) int."""
    loss_main, stats_main = _fused_upsample_ce(pred_main, target)
    loss_aux, stats_aux = _ce_nchw(pred_aux, target)
    return (_ohem_from_loss_stats(loss_main, stats_main)
            + AUX_WEIGHT * _ohem_from_loss_stats(loss_aux, stats_aux))


# ------------------------------ pure-JAX reference ---------------------------
def _ref_ohem(logits, target):
    N, C, H, W = logits.shape
    x = jnp.transpose(logits, (0, 2, 3, 1)).reshape(-1, C)
    t = target.reshape(-1)
    lse = jax.scipy.special.logsumexp(x, axis=-1)
    tgt = jnp.take_along_axis(x, jnp.clip(t, 0, C - 1)[:, None], axis=-1)[:, 0]
    valid = t != IGNORE_INDEX
    loss = jnp.where(valid, lse - tgt, 0.0)
    n_min = jnp.sum(valid).astype(jnp.int32) // N_MIN_DIVISOR
    hard = loss > OHEM_THRESH
    cnt_hard = jnp.sum(hard).astype(jnp.int32)
    mean_hard = jnp.sum(jnp.where(hard, loss, 0.0)) / jnp.sum(hard.astype(jnp.float32))
    s = jnp.sort(loss)[::-1]
    csum = jnp.cumsum(s)
    topk_mean = csum[jnp.maximum(n_min - 1, 0)] / n_min.astype(jnp.float32)
    return jnp.where(cnt_hard < n_min, topk_mean, mean_hard)


def _ref_forward(pred_main, pred_aux, target):
    N, C, H, W = pred_main.shape
    A = _bilinear_matrix(H, H * SCALE, SCALE)
    B = _bilinear_matrix(W, W * SCALE, SCALE)
    up = jnp.einsum("oh,nchw,pw->ncop", A, pred_main, B,
                    precision=jax.lax.Precision.HIGHEST)
    return _ref_ohem(up, target) + AUX_WEIGHT * _ref_ohem(pred_aux, target)


# ------------------------------------ main -----------------------------------
if __name__ == "__main__":
    key = jax.random.PRNGKey(0)
    k1, k2, k3, k4 = jax.random.split(key, 4)

    N, C, H, W = 2, 4, 16, 16
    Ho, Wo = H * SCALE, W * SCALE

    pred_main = jax.random.normal(k1, (N, C, H, W), dtype=jnp.float32)
    pred_aux = jax.random.normal(k2, (N, C, Ho, Wo), dtype=jnp.float32)
    target = jax.random.randint(k3, (N, Ho, Wo), 0, C, dtype=jnp.int32)
    ignore_mask = jax.random.uniform(k4, (N, Ho, Wo)) < 0.1
    target = jnp.where(ignore_mask, IGNORE_INDEX, target)

    loss = jax.jit(pixel_classification_criterion)(pred_main, pred_aux, target)
    loss = jax.block_until_ready(loss)

    ref = _ref_forward(pred_main, pred_aux, target)
    assert bool(jnp.isfinite(loss)), float(loss)
    assert abs(float(loss) - float(ref)) < 5e-2, (float(loss), float(ref))
    print("KERNEL_OK")
</pallas_src>

<mosaic_0001>
module attributes {stable_mosaic.version = 11 : i64} {
  func.func @_aux_ce_kernel(%arg0: i32, %arg1: i32, %arg2: memref<1x4x128x128xf32, #tpu.memory_space<vmem>>, %arg3: memref<1x128x128xi32, #tpu.memory_space<vmem>>, %arg4: memref<1x128x128xf32, #tpu.memory_space<vmem>>, %arg5: memref<1x3x128xf32, #tpu.memory_space<vmem>>) attributes {dimension_semantics = [#tpu.dimension_semantics<parallel>, #tpu.dimension_semantics<arbitrary>], iteration_bounds = array<i64: 2, 1>, scalar_prefetch = 0 : i64, scratch_operands = 0 : i64, tpu.core_type = #tpu.core_type<tc>, window_params = [{transform_indices = @transform_0, window_bounds = array<i64: 1, 4, 128, 128>}, {transform_indices = @transform_1, window_bounds = array<i64: 1, 128, 128>}, {transform_indices = @transform_2, window_bounds = array<i64: 1, 128, 128>}, {transform_indices = @transform_3, window_bounds = array<i64: 1, 3, 128>}]} {
    %c0_i32 = arith.constant 0 : i32
    %0 = arith.cmpi eq, %arg1, %c0_i32 : i32
    %1 = arith.extui %0 : i1 to i32
    %c0_i32_0 = arith.constant 0 : i32
    %2 = arith.cmpi ne, %1, %c0_i32_0 : i32
    scf.if %2 {
      %cst_167 = arith.constant 0.000000e+00 : f32
      %414 = vector.broadcast %cst_167 : f32 to vector<1x3x128xf32>
      %c0_168 = arith.constant 0 : index
      %c0_169 = arith.constant 0 : index
      %c0_170 = arith.constant 0 : index
      %415 = vector.load %arg5[%c0_168, %c0_169, %c0_170] : memref<1x3x128xf32, #tpu.memory_space<vmem>>, vector<1x3x128xf32>
      tpu.vector_store %arg5[%c0_168, %c0_169, %c0_170], %414 {strides = array<i32>} : memref<1x3x128xf32, #tpu.memory_space<vmem>>, vector<1x3x128xf32>,
    } else {
    }
    %cst = arith.constant 0.000000e+00 : f32
    %3 = vector.broadcast %cst : f32 to vector<1x128xf32>
    %c0_i32_1 = arith.constant 0 : i32
    %c16_i32 = arith.constant 16 : i32
    %4 = arith.muli %c0_i32_1, %c16_i32 : i32
    %5 = tpu.assume_multiple %4, 16 : i32
    %c0 = arith.constant 0 : index
    %c0_2 = arith.constant 0 : index
    %6 = arith.index_cast %5 : i32 to index
    %c0_3 = arith.constant 0 : index
    %7 = vector.load %arg2[%c0, %c0_2, %6, %c0_3] : memref<1x4x128x128xf32, #tpu.memory_space<vmem>>, vector<1x4x16x128xf32>
    %8 = vector.shape_cast %7 : vector<1x4x16x128xf32> to vector<4x16x128xf32>
    %c0_4 = arith.constant 0 : index
    %9 = arith.index_cast %5 : i32 to index
    %c0_5 = arith.constant 0 : index
    %10 = vector.load %arg3[%c0_4, %9, %c0_5] : memref<1x128x128xi32, #tpu.memory_space<vmem>>, vector<1x16x128xi32>
    %11 = vector.shape_cast %10 : vector<1x16x128xi32> to vector<16x128xi32>
    %cst_6 = arith.constant dense<0xFF800000> : vector<16x128xf32>
    %12 = vector.multi_reduction <maximumf>, %8, %cst_6 [0] : vector<4x16x128xf32> to vector<16x128xf32>
    %13 = vector.shape_cast %12 : vector<16x128xf32> to vector<1x16x128xf32>
    %14 = vector.broadcast %13 : vector<1x16x128xf32> to vector<4x16x128xf32>
    %15 = arith.subf %8, %14 : vector<4x16x128xf32>
    %16 = math.exp %15 : vector<4x16x128xf32>
    %cst_7 = arith.constant dense<0.000000e+00> : vector<16x128xf32>
    %17 = vector.multi_reduction <add>, %16, %cst_7 [0] : vector<4x16x128xf32> to vector<16x128xf32>
    %18 = math.log %17 : vector<16x128xf32>
    %19 = arith.addf %12, %18 : vector<16x128xf32>
    %20 = tpu.iota {dimensions = array<i32: 0>} : vector<4x16x128xi32>
    %21 = vector.shape_cast %11 : vector<16x128xi32> to vector<1x16x128xi32>
    %22 = vector.broadcast %21 : vector<1x16x128xi32> to vector<4x16x128xi32>
    %23 = arith.cmpi eq, %20, %22 : vector<4x16x128xi32>
    %cst_8 = arith.constant 0.000000e+00 : f32
    %24 = vector.broadcast %cst_8 : f32 to vector<4x16x128xf32>
    %25 = arith.select %23, %8, %24 : vector<4x16x128xi1>, vector<4x16x128xf32>
    %cst_9 = arith.constant dense<0.000000e+00> : vector<16x128xf32>
    %26 = vector.multi_reduction <add>, %25, %cst_9 [0] : vector<4x16x128xf32> to vector<16x128xf32>
    %c255_i32 = arith.constant 255 : i32
    %27 = vector.broadcast %c255_i32 : i32 to vector<16x128xi32>
    %28 = arith.cmpi ne, %11, %27 : vector<16x128xi32>
    %29 = arith.subf %19, %26 : vector<16x128xf32>
    %cst_10 = arith.constant 0.000000e+00 : f32
    %30 = vector.broadcast %cst_10 : f32 to vector<16x128xf32>
    %31 = arith.select %28, %29, %30 : vector<16x128xi1>, vector<16x128xf32>
    %c0_11 = arith.constant 0 : index
    %32 = arith.index_cast %5 : i32 to index
    %c0_12 = arith.constant 0 : index
    %33 = vector.load %arg4[%c0_11, %32, %c0_12] : memref<1x128x128xf32, #tpu.memory_space<vmem>>, vector<1x16x128xf32>
    %34 = vector.shape_cast %33 : vector<1x16x128xf32> to vector<16x128xf32>
    %35 = vector.shape_cast %31 : vector<16x128xf32> to vector<1x16x128xf32>
    tpu.vector_store %arg4[%c0_11, %32, %c0_12], %35 {strides = array<i32>} : memref<1x128x128xf32, #tpu.memory_space<vmem>>, vector<1x16x128xf32>,
    %cst_13 = arith.constant 0.356674939 : f32
    %36 = vector.broadcast %cst_13 : f32 to vector<16x128xf32>
    %37 = arith.cmpf ogt, %31, %36 : vector<16x128xf32>
    %cst_14 = arith.constant 0.000000e+00 : f32
    %38 = vector.broadcast %cst_14 : f32 to vector<16x128xf32>
    %39 = arith.select %37, %31, %38 : vector<16x128xi1>, vector<16x128xf32>
    %cst_15 = arith.constant dense<0.000000e+00> : vector<128xf32>
    %40 = vector.multi_reduction <add>, %39, %cst_15 [0] : vector<16x128xf32> to vector<128xf32>
    %41 = vector.shape_cast %40 : vector<128xf32> to vector<1x128xf32>
    %42 = arith.addf %3, %41 : vector<1x128xf32>
    %43 = arith.extui %37 : vector<16x128xi1> to vector<16x128xi32>
    %44 = arith.sitofp %43 : vector<16x128xi32> to vector<16x128xf32>
    %cst_16 = arith.constant dense<0.000000e+00> : vector<128xf32>
    %45 = vector.multi_reduction <add>, %44, %cst_16 [0] : vector<16x128xf32> to vector<128xf32>
    %46 = vector.shape_cast %45 : vector<128xf32> to vector<1x128xf32>
    %47 = arith.addf %3, %46 : vector<1x128xf32>
    %48 = arith.extui %28 : vector<16x128xi1> to vector<16x128xi32>
    %49 = arith.sitofp %48 : vector<16x128xi32> to vector<16x128xf32>
    %cst_17 = arith.constant dense<0.000000e+00> : vector<128xf32>
    %50 = vector.multi_reduction <add>, %49, %cst_17 [0] : vector<16x128xf32> to vector<128xf32>
    %51 = vector.shape_cast %50 : vector<128xf32> to vector<1x128xf32>
    %52 = arith.addf %3, %51 : vector<1x128xf32>
    %c1_i32 = arith.constant 1 : i32
    %c16_i32_18 = arith.constant 16 : i32
    %53 = arith.muli %c1_i32, %c16_i32_18 : i32
    %54 = tpu.assume_multiple %53, 16 : i32
    %c0_19 = arith.constant 0 : index
    %c0_20 = arith.constant 0 : index
    %55 = arith.index_cast %54 : i32 to index
    %c0_21 = arith.constant 0 : index
    %56 = vector.load %arg2[%c0_19, %c0_20, %55, %c0_21] : memref<1x4x128x128xf32, #tpu.memory_space<vmem>>, vector<1x4x16x128xf32>
    %57 = vector.shape_cast %56 : vector<1x4x16x128xf32> to vector<4x16x128xf32>
    %c0_22 = arith.constant 0 : index
    %58 = arith.index_cast %54 : i32 to index
    %c0_23 = arith.constant 0 : index
    %59 = vector.load %arg3[%c0_22, %58, %c0_23] : memref<1x128x128xi32, #tpu.memory_space<vmem>>, vector<1x16x128xi32>
    %60 = vector.shape_cast %59 : vector<1x16x128xi32> to vector<16x128xi32>
    %cst_24 = arith.constant dense<0xFF800000> : vector<16x128xf32>
    %61 = vector.multi_reduction <maximumf>, %57, %cst_24 [0] : vector<4x16x128xf32> to vector<16x128xf32>
    %62 = vector.shape_cast %61 : vector<16x128xf32> to vector<1x16x128xf32>
    %63 = vector.broadcast %62 : vector<1x16x128xf32> to vector<4x16x128xf32>
    %64 = arith.subf %57, %63 : vector<4x16x128xf32>
    %65 = math.exp %64 : vector<4x16x128xf32>
    %cst_25 = arith.constant dense<0.000000e+00> : vector<16x128xf32>
    %66 = vector.multi_reduction <add>, %65, %cst_25 [0] : vector<4x16x128xf32> to vector<16x128xf32>
    %67 = math.log %66 : vector<16x128xf32>
    %68 = arith.addf %61, %67 : vector<16x128xf32>
    %69 = tpu.iota {dimensions = array<i32: 0>} : vector<4x16x128xi32>
    %70 = vector.shape_cast %60 : vector<16x128xi32> to vector<1x16x128xi32>
    %71 = vector.broadcast %70 : vector<1x16x128xi32> to vector<4x16x128xi32>
    %72 = arith.cmpi eq, %69, %71 : vector<4x16x128xi32>
    %cst_26 = arith.constant 0.000000e+00 : f32
    %73 = vector.broadcast %cst_26 : f32 to vector<4x16x128xf32>
    %74 = arith.select %72, %57, %73 : vector<4x16x128xi1>, vector<4x16x128xf32>
    %cst_27 = arith.constant dense<0.000000e+00> : vector<16x128xf32>
    %75 = vector.multi_reduction <add>, %74, %cst_27 [0] : vector<4x16x128xf32> to vector<16x128xf32>
    %c255_i32_28 = arith.constant 255 : i32
    %76 = vector.broadcast %c255_i32_28 : i32 to vector<16x128xi32>
    %77 = arith.cmpi ne, %60, %76 : vector<16x128xi32>
    %78 = arith.subf %68, %75 : vector<16x128xf32>
    %cst_29 = arith.constant 0.000000e+00 : f32
    %79 = vector.broadcast %cst_29 : f32 to vector<16x128xf32>
    %80 = arith.select %77, %78, %79 : vector<16x128xi1>, vector<16x128xf32>
    %c0_30 = arith.constant 0 : index
    %81 = arith.index_cast %54 : i32 to index
    %c0_31 = arith.constant 0 : index
    %82 = vector.load %arg4[%c0_30, %81, %c0_31] : memref<1x128x128xf32, #tpu.memory_space<vmem>>, vector<1x16x128xf32>
    %83 = vector.shape_cast %82 : vector<1x16x128xf32> to vector<16x128xf32>
    %84 = vector.shape_cast %80 : vector<16x128xf32> to vector<1x16x128xf32>
    tpu.vector_store %arg4[%c0_30, %81, %c0_31], %84 {strides = array<i32>} : memref<1x128x128xf32, #tpu.memory_space<vmem>>, vector<1x16x128xf32>,
    %cst_32 = arith.constant 0.356674939 : f32
    %85 = vector.broadcast %cst_32 : f32 to vector<16x128xf32>
    %86 = arith.cmpf ogt, %80, %85 : vector<16x128xf32>
    %cst_33 = arith.constant 0.000000e+00 : f32
    %87 = vector.broadcast %cst_33 : f32 to vector<16x128xf32>
    %88 = arith.select %86, %80, %87 : vector<16x128xi1>, vector<16x128xf32>
    %cst_34 = arith.constant dense<0.000000e+00> : vector<128xf32>
    %89 = vector.multi_reduction <add>, %88, %cst_34 [0] : vector<16x128xf32> to vector<128xf32>
    %90 = vector.shape_cast %89 : vector<128xf32> to vector<1x128xf32>
    %91 = arith.addf %42, %90 : vector<1x128xf32>
    %92 = arith.extui %86 : vector<16x128xi1> to vector<16x128xi32>
    %93 = arith.sitofp %92 : vector<16x128xi32> to vector<16x128xf32>
    %cst_35 = arith.constant dense<0.000000e+00> : vector<128xf32>
    %94 = vector.multi_reduction <add>, %93, %cst_35 [0] : vector<16x128xf32> to vector<128xf32>
    %95 = vector.shape_cast %94 : vector<128xf32> to vector<1x128xf32>
    %96 = arith.addf %47, %95 : vector<1x128xf32>
    %97 = arith.extui %77 : vector<16x128xi1> to vector<16x128xi32>
    %98 = arith.sitofp %97 : vector<16x128xi32> to vector<16x128xf32>
    %cst_36 = arith.constant dense<0.000000e+00> : vector<128xf32>
    %99 = vector.multi_reduction <add>, %98, %cst_36 [0] : vector<16x128xf32> to vector<128xf32>
    %100 = vector.shape_cast %99 : vector<128xf32> to vector<1x128xf32>
    %101 = arith.addf %52, %100 : vector<1x128xf32>
    %c2_i32 = arith.constant 2 : i32
    %c16_i32_37 = arith.constant 16 : i32
    %102 = arith.muli %c2_i32, %c16_i32_37 : i32
    %103 = tpu.assume_multiple %102, 16 : i32
    %c0_38 = arith.constant 0 : index
    %c0_39 = arith.constant 0 : index
    %104 = arith.index_cast %103 : i32 to index
    %c0_40 = arith.constant 0 : index
    %105 = vector.load %arg2[%c0_38, %c0_39, %104, %c0_40] : memref<1x4x128x128xf32, #tpu.memory_space<vmem>>, vector<1x4x16x128xf32>
    %106 = vector.shape_cast %105 : vector<1x4x16x128xf32> to vector<4x16x128xf32>
    %c0_41 = arith.constant 0 : index
    %107 = arith.index_cast %103 : i32 to index
    %c0_42 = arith.constant 0 : index
    %108 = vector.load %arg3[%c0_41, %107, %c0_42] : memref<1x128x128xi32, #tpu.memory_space<vmem>>, vector<1x16x128xi32>
    %109 = vector.shape_cast %108 : vector<1x16x128xi32> to vector<16x128xi32>
    %cst_43 = arith.constant dense<0xFF800000> : vector<16x128xf32>
    %110 = vector.multi_reduction <maximumf>, %106, %cst_43 [0] : vector<4x16x128xf32> to vector<16x128xf32>
    %111 = vector.shape_cast %110 : vector<16x128xf32> to vector<1x16x128xf32>
    %112 = vector.broadcast %111 : vector<1x16x128xf32> to vector<4x16x128xf32>
    %113 = arith.subf %106, %112 : vector<4x16x128xf32>
    %114 = math.exp %113 : vector<4x16x128xf32>
    %cst_44 = arith.constant dense<0.000000e+00> : vector<16x128xf32>
    %115 = vector.multi_reduction <add>, %114, %cst_44 [0] : vector<4x16x128xf32> to vector<16x128xf32>
    %116 = math.log %115 : vector<16x128xf32>
    %117 = arith.addf %110, %116 : vector<16x128xf32>
    %118 = tpu.iota {dimensions = array<i32: 0>} : vector<4x16x128xi32>
    %119 = vector.shape_cast %109 : vector<16x128xi32> to vector<1x16x128xi32>
    %120 = vector.broadcast %119 : vector<1x16x128xi32> to vector<4x16x128xi32>
    %121 = arith.cmpi eq, %118, %120 : vector<4x16x128xi32>
    %cst_45 = arith.constant 0.000000e+00 : f32
    %122 = vector.broadcast %cst_45 : f32 to vector<4x16x128xf32>
    %123 = arith.select %121, %106, %122 : vector<4x16x128xi1>, vector<4x16x128xf32>
    %cst_46 = arith.constant dense<0.000000e+00> : vector<16x128xf32>
    %124 = vector.multi_reduction <add>, %123, %cst_46 [0] : vector<4x16x128xf32> to vector<16x128xf32>
    %c255_i32_47 = arith.constant 255 : i32
    %125 = vector.broadcast %c255_i32_47 : i32 to vector<16x128xi32>
    %126 = arith.cmpi ne, %109, %125 : vector<16x128xi32>
    %127 = arith.subf %117, %124 : vector<16x128xf32>
    %cst_48 = arith.constant 0.000000e+00 : f32
    %128 = vector.broadcast %cst_48 : f32 to vector<16x128xf32>
    %129 = arith.select %126, %127, %128 : vector<16x128xi1>, vector<16x128xf32>
    %c0_49 = arith.constant 0 : index
    %130 = arith.index_cast %103 : i32 to index
    %c0_50 = arith.constant 0 : index
    %131 = vector.load %arg4[%c0_49, %130, %c0_50] : memref<1x128x128xf32, #tpu.memory_space<vmem>>, vector<1x16x128xf32>
    %132 = vector.shape_cast %131 : vector<1x16x128xf32> to vector<16x128xf32>
    %133 = vector.shape_cast %129 : vector<16x128xf32> to vector<1x16x128xf32>
    tpu.vector_store %arg4[%c0_49, %130, %c0_50], %133 {strides = array<i32>} : memref<1x128x128xf32, #tpu.memory_space<vmem>>, vector<1x16x128xf32>,
    %cst_51 = arith.constant 0.356674939 : f32
    %134 = vector.broadcast %cst_51 : f32 to vector<16x128xf32>
    %135 = arith.cmpf ogt, %129, %134 : vector<16x128xf32>
    %cst_52 = arith.constant 0.000000e+00 : f32
    %136 = vector.broadcast %cst_52 : f32 to vector<16x128xf32>
    %137 = arith.select %135, %129, %136 : vector<16x128xi1>, vector<16x128xf32>
    %cst_53 = arith.constant dense<0.000000e+00> : vector<128xf32>
    %138 = vector.multi_reduction <add>, %137, %cst_53 [0] : vector<16x128xf32> to vector<128xf32>
    %139 = vector.shape_cast %138 : vector<128xf32> to vector<1x128xf32>
    %140 = arith.addf %91, %139 : vector<1x128xf32>
    %141 = arith.extui %135 : vector<16x128xi1> to vector<16x128xi32>
    %142 = arith.sitofp %141 : vector<16x128xi32> to vector<16x128xf32>
    %cst_54 = arith.constant dense<0.000000e+00> : vector<128xf32>
    %143 = vector.multi_reduction <add>, %142, %cst_54 [0] : vector<16x128xf32> to vector<128xf32>
    %144 = vector.shape_cast %143 : vector<128xf32> to vector<1x128xf32>
    %145 = arith.addf %96, %144 : vector<1x128xf32>
    %146 = arith.extui %126 : vector<16x128xi1> to vector<16x128xi32>
    %147 = arith.sitofp %146 : vector<16x128xi32> to vector<16x128xf32>
    %cst_55 = arith.constant dense<0.000000e+00> : vector<128xf32>
    %148 = vector.multi_reduction <add>, %147, %cst_55 [0] : vector<16x128xf32> to vector<128xf32>
    %149 = vector.shape_cast %148 : vector<128xf32> to vector<1x128xf32>
    %150 = arith.addf %101, %149 : vector<1x128xf32>
    %c3_i32 = arith.constant 3 : i32
    %c16_i32_56 = arith.constant 16 : i32
    %151 = arith.muli %c3_i32, %c16_i32_56 : i32
    %152 = tpu.assume_multiple %151, 16 : i32
    %c0_57 = arith.constant 0 : index
    %c0_58 = arith.constant 0 : index
    %153 = arith.index_cast %152 : i32 to index
    %c0_59 = arith.constant 0 : index
    %154 = vector.load %arg2[%c0_57, %c0_58, %153, %c0_59] : memref<1x4x128x128xf32, #tpu.memory_space<vmem>>, vector<1x4x16x128xf32>
    %155 = vector.shape_cast %154 : vector<1x4x16x128xf32> to vector<4x16x128xf32>
    %c0_60 = arith.constant 0 : index
    %156 = arith.index_cast %152 : i32 to index
    %c0_61 = arith.constant 0 : index
    %157 = vector.load %arg3[%c0_60, %156, %c0_61] : memref<1x128x128xi32, #tpu.memory_space<vmem>>, vector<1x16x128xi32>
    %158 = vector.shape_cast %157 : vector<1x16x128xi32> to vector<16x128xi32>
    %cst_62 = arith.constant dense<0xFF800000> : vector<16x128xf32>
    %159 = vector.multi_reduction <maximumf>, %155, %cst_62 [0] : vector<4x16x128xf32> to vector<16x128xf32>
    %160 = vector.shape_cast %159 : vector<16x128xf32> to vector<1x16x128xf32>
    %161 = vector.broadcast %160 : vector<1x16x128xf32> to vector<4x16x128xf32>
    %162 = arith.subf %155, %161 : vector<4x16x128xf32>
    %163 = math.exp %162 : vector<4x16x128xf32>
    %cst_63 = arith.constant dense<0.000000e+00> : vector<16x128xf32>
    %164 = vector.multi_reduction <add>, %163, %cst_63 [0] : vector<4x16x128xf32> to vector<16x128xf32>
    %165 = math.log %164 : vector<16x128xf32>
    %166 = arith.addf %159, %165 : vector<16x128xf32>
    %167 = tpu.iota {dimensions = array<i32: 0>} : vector<4x16x128xi32>
    %168 = vector.shape_cast %158 : vector<16x128xi32> to vector<1x16x128xi32>
    %169 = vector.broadcast %168 : vector<1x16x128xi32> to vector<4x16x128xi32>
    %170 = arith.cmpi eq, %167, %169 : vector<4x16x128xi32>
    %cst_64 = arith.constant 0.000000e+00 : f32
    %171 = vector.broadcast %cst_64 : f32 to vector<4x16x128xf32>
    %172 = arith.select %170, %155, %171 : vector<4x16x128xi1>, vector<4x16x128xf32>
    %cst_65 = arith.constant dense<0.000000e+00> : vector<16x128xf32>
    %173 = vector.multi_reduction <add>, %172, %cst_65 [0] : vector<4x16x128xf32> to vector<16x128xf32>
    %c255_i32_66 = arith.constant 255 : i32
    %174 = vector.broadcast %c255_i32_66 : i32 to vector<16x128xi32>
    %175 = arith.cmpi ne, %158, %174 : vector<16x128xi32>
    %176 = arith.subf %166, %173 : vector<16x128xf32>
    %cst_67 = arith.constant 0.000000e+00 : f32
    %177 = vector.broadcast %cst_67 : f32 to vector<16x128xf32>
    %178 = arith.select %175, %176, %177 : vector<16x128xi1>, vector<16x128xf32>
    %c0_68 = arith.constant 0 : index
    %179 = arith.index_cast %152 : i32 to index
    %c0_69 = arith.constant 0 : index
    %180 = vector.load %arg4[%c0_68, %179, %c0_69] : memref<1x128x128xf32, #tpu.memory_space<vmem>>, vector<1x16x128xf32>
    %181 = vector.shape_cast %180 : vector<1x16x128xf32> to vector<16x128xf32>
    %182 = vector.shape_cast %178 : vector<16x128xf32> to vector<1x16x128xf32>
    tpu.vector_store %arg4[%c0_68, %179, %c0_69], %182 {strides = array<i32>} : memref<1x128x128xf32, #tpu.memory_space<vmem>>, vector<1x16x128xf32>,
    %cst_70 = arith.constant 0.356674939 : f32
    %183 = vector.broadcast %cst_70 : f32 to vector<16x128xf32>
    %184 = arith.cmpf ogt, %178, %183 : vector<16x128xf32>
    %cst_71 = arith.constant 0.000000e+00 : f32
    %185 = vector.broadcast %cst_71 : f32 to vector<16x128xf32>
    %186 = arith.select %184, %178, %185 : vector<16x128xi1>, vector<16x128xf32>
    %cst_72 = arith.constant dense<0.000000e+00> : vector<128xf32>
    %187 = vector.multi_reduction <add>, %186, %cst_72 [0] : vector<16x128xf32> to vector<128xf32>
    %188 = vector.shape_cast %187 : vector<128xf32> to vector<1x128xf32>
    %189 = arith.addf %140, %188 : vector<1x128xf32>
    %190 = arith.extui %184 : vector<16x128xi1> to vector<16x128xi32>
    %191 = arith.sitofp %190 : vector<16x128xi32> to vector<16x128xf32>
    %cst_73 = arith.constant dense<0.000000e+00> : vector<128xf32>
    %192 = vector.multi_reduction <add>, %191, %cst_73 [0] : vector<16x128xf32> to vector<128xf32>
    %193 = vector.shape_cast %192 : vector<128xf32> to vector<1x128xf32>
    %194 = arith.addf %145, %193 : vector<1x128xf32>
    %195 = arith.extui %175 : vector<16x128xi1> to vector<16x128xi32>
    %196 = arith.sitofp %195 : vector<16x128xi32> to vector<16x128xf32>
    %cst_74 = arith.constant dense<0.000000e+00> : vector<128xf32>
    %197 = vector.multi_reduction <add>, %196, %cst_74 [0] : vector<16x128xf32> to vector<128xf32>
    %198 = vector.shape_cast %197 : vector<128xf32> to vector<1x128xf32>
    %199 = arith.addf %150, %198 : vector<1x128xf32>
    %c4_i32 = arith.constant 4 : i32
    %c16_i32_75 = arith.constant 16 : i32
    %200 = arith.muli %c4_i32, %c16_i32_75 : i32
    %201 = tpu.assume_multiple %200, 16 : i32
    %c0_76 = arith.constant 0 : index
    %c0_77 = arith.constant 0 : index
    %202 = arith.index_cast %201 : i32 to index
    %c0_78 = arith.constant 0 : index
    %203 = vector.load %arg2[%c0_76, %c0_77, %202, %c0_78] : memref<1x4x128x128xf32, #tpu.memory_space<vmem>>, vector<1x4x16x128xf32>
    %204 = vector.shape_cast %203 : vector<1x4x16x128xf32> to vector<4x16x128xf32>
    %c0_79 = arith.constant 0 : index
    %205 = arith.index_cast %201 : i32 to index
    %c0_80 = arith.constant 0 : index
    %206 = vector.load %arg3[%c0_79, %205, %c0_80] : memref<1x128x128xi32, #tpu.memory_space<vmem>>, vector<1x16x128xi32>
    %207 = vector.shape_cast %206 : vector<1x16x128xi32> to vector<16x128xi32>
    %cst_81 = arith.constant dense<0xFF800000> : vector<16x128xf32>
    %208 = vector.multi_reduction <maximumf>, %204, %cst_81 [0] : vector<4x16x128xf32> to vector<16x128xf32>
    %209 = vector.shape_cast %208 : vector<16x128xf32> to vector<1x16x128xf32>
    %210 = vector.broadcast %209 : vector<1x16x128xf32> to vector<4x16x128xf32>
    %211 = arith.subf %204, %210 : vector<4x16x128xf32>
    %212 = math.exp %211 : vector<4x16x128xf32>
    %cst_82 = arith.constant dense<0.000000e+00> : vector<16x128xf32>
    %213 = vector.multi_reduction <add>, %212, %cst_82 [0] : vector<4x16x128xf32> to vector<16x128xf32>
    %214 = math.log %213 : vector<16x128xf32>
    %215 = arith.addf %208, %214 : vector<16x128xf32>
    %216 = tpu.iota {dimensions = array<i32: 0>} : vector<4x16x128xi32>
    %217 = vector.shape_cast %207 : vector<16x128xi32> to vector<1x16x128xi32>
    %218 = vector.broadcast %217 : vector<1x16x128xi32> to vector<4x16x128xi32>
    %219 = arith.cmpi eq, %216, %218 : vector<4x16x128xi32>
    %cst_83 = arith.constant 0.000000e+00 : f32
    %220 = vector.broadcast %cst_83 : f32 to vector<4x16x128xf32>
    %221 = arith.select %219, %204, %220 : vector<4x16x128xi1>, vector<4x16x128xf32>
    %cst_84 = arith.constant dense<0.000000e+00> : vector<16x128xf32>
    %222 = vector.multi_reduction <add>, %221, %cst_84 [0] : vector<4x16x128xf32> to vector<16x128xf32>
    %c255_i32_85 = arith.constant 255 : i32
    %223 = vector.broadcast %c255_i32_85 : i32 to vector<16x128xi32>
    %224 = arith.cmpi ne, %207, %223 : vector<16x128xi32>
    %225 = arith.subf %215, %222 : vector<16x128xf32>
    %cst_86 = arith.constant 0.000000e+00 : f32
    %226 = vector.broadcast %cst_86 : f32 to vector<16x128xf32>
    %227 = arith.select %224, %225, %226 : vector<16x128xi1>, vector<16x128xf32>
    %c0_87 = arith.constant 0 : index
    %228 = arith.index_cast %201 : i32 to index
    %c0_88 = arith.constant 0 : index
    %229 = vector.load %arg4[%c0_87, %228, %c0_88] : memref<1x128x128xf32, #tpu.memory_space<vmem>>, vector<1x16x128xf32>
    %230 = vector.shape_cast %229 : vector<1x16x128xf32> to vector<16x128xf32>
    %231 = vector.shape_cast %227 : vector<16x128xf32> to vector<1x16x128xf32>
    tpu.vector_store %arg4[%c0_87, %228, %c0_88], %231 {strides = array<i32>} : memref<1x128x128xf32, #tpu.memory_space<vmem>>, vector<1x16x128xf32>,
    %cst_89 = arith.constant 0.356674939 : f32
    %232 = vector.broadcast %cst_89 : f32 to vector<16x128xf32>
    %233 = arith.cmpf ogt, %227, %232 : vector<16x128xf32>
    %cst_90 = arith.constant 0.000000e+00 : f32
    %234 = vector.broadcast %cst_90 : f32 to vector<16x128xf32>
    %235 = arith.select %233, %227, %234 : vector<16x128xi1>, vector<16x128xf32>
    %cst_91 = arith.constant dense<0.000000e+00> : vector<128xf32>
    %236 = vector.multi_reduction <add>, %235, %cst_91 [0] : vector<16x128xf32> to vector<128xf32>
    %237 = vector.shape_cast %236 : vector<128xf32> to vector<1x128xf32>
    %238 = arith.addf %189, %237 : vector<1x128xf32>
    %239 = arith.extui %233 : vector<16x128xi1> to vector<16x128xi32>
    %240 = arith.sitofp %239 : vector<16x128xi32> to vector<16x128xf32>
    %cst_92 = arith.constant dense<0.000000e+00> : vector<128xf32>
    %241 = vector.multi_reduction <add>, %240, %cst_92 [0] : vector<16x128xf32> to vector<128xf32>
    %242 = vector.shape_cast %241 : vector<128xf32> to vector<1x128xf32>
    %243 = arith.addf %194, %242 : vector<1x128xf32>
    %244 = arith.extui %224 : vector<16x128xi1> to vector<16x128xi32>
    %245 = arith.sitofp %244 : vector<16x128xi32> to vector<16x128xf32>
    %cst_93 = arith.constant dense<0.000000e+00> : vector<128xf32>
    %246 = vector.multi_reduction <add>, %245, %cst_93 [0] : vector<16x128xf32> to vector<128xf32>
    %247 = vector.shape_cast %246 : vector<128xf32> to vector<1x128xf32>
    %248 = arith.addf %199, %247 : vector<1x128xf32>
    %c5_i32 = arith.constant 5 : i32
    %c16_i32_94 = arith.constant 16 : i32
    %249 = arith.muli %c5_i32, %c16_i32_94 : i32
    %250 = tpu.assume_multiple %249, 16 : i32
    %c0_95 = arith.constant 0 : index
    %c0_96 = arith.constant 0 : index
    %251 = arith.index_cast %250 : i32 to index
    %c0_97 = arith.constant 0 : index
    %252 = vector.load %arg2[%c0_95, %c0_96, %251, %c0_97] : memref<1x4x128x128xf32, #tpu.memory_space<vmem>>, vector<1x4x16x128xf32>
    %253 = vector.shape_cast %252 : vector<1x4x16x128xf32> to vector<4x16x128xf32>
    %c0_98 = arith.constant 0 : index
    %254 = arith.index_cast %250 : i32 to index
    %c0_99 = arith.constant 0 : index
    %255 = vector.load %arg3[%c0_98, %254, %c0_99] : memref<1x128x128xi32, #tpu.memory_space<vmem>>, vector<1x16x128xi32>
    %256 = vector.shape_cast %255 : vector<1x16x128xi32> to vector<16x128xi32>
    %cst_100 = arith.constant dense<0xFF800000> : vector<16x128xf32>
    %257 = vector.multi_reduction <maximumf>, %253, %cst_100 [0] : vector<4x16x128xf32> to vector<16x128xf32>
    %258 = vector.shape_cast %257 : vector<16x128xf32> to vector<1x16x128xf32>
    %259 = vector.broadcast %258 : vector<1x16x128xf32> to vector<4x16x128xf32>
    %260 = arith.subf %253, %259 : vector<4x16x128xf32>
    %261 = math.exp %260 : vector<4x16x128xf32>
    %cst_101 = arith.constant dense<0.000000e+00> : vector<16x128xf32>
    %262 = vector.multi_reduction <add>, %261, %cst_101 [0] : vector<4x16x128xf32> to vector<16x128xf32>
    %263 = math.log %262 : vector<16x128xf32>
    %264 = arith.addf %257, %263 : vector<16x128xf32>
    %265 = tpu.iota {dimensions = array<i32: 0>} : vector<4x16x128xi32>
    %266 = vector.shape_cast %256 : vector<16x128xi32> to vector<1x16x128xi32>
    %267 = vector.broadcast %266 : vector<1x16x128xi32> to vector<4x16x128xi32>
    %268 = arith.cmpi eq, %265, %267 : vector<4x16x128xi32>
    %cst_102 = arith.constant 0.000000e+00 : f32
    %269 = vector.broadcast %cst_102 : f32 to vector<4x16x128xf32>
    %270 = arith.select %268, %253, %269 : vector<4x16x128xi1>, vector<4x16x128xf32>
    %cst_103 = arith.constant dense<0.000000e+00> : vector<16x128xf32>
    %271 = vector.multi_reduction <add>, %270, %cst_103 [0] : vector<4x16x128xf32> to vector<16x128xf32>
    %c255_i32_104 = arith.constant 255 : i32
    %272 = vector.broadcast %c255_i32_104 : i32 to vector<16x128xi32>
    %273 = arith.cmpi ne, %256, %272 : vector<16x128xi32>
    %274 = arith.subf %264, %271 : vector<16x128xf32>
    %cst_105 = arith.constant 0.000000e+00 : f32
    %275 = vector.broadcast %cst_105 : f32 to vector<16x128xf32>
    %276 = arith.select %273, %274, %275 : vector<16x128xi1>, vector<16x128xf32>
    %c0_106 = arith.constant 0 : index
    %277 = arith.index_cast %250 : i32 to index
    %c0_107 = arith.constant 0 : index
    %278 = vector.load %arg4[%c0_106, %277, %c0_107] : memref<1x128x128xf32, #tpu.memory_space<vmem>>, vector<1x16x128xf32>
    %279 = vector.shape_cast %278 : vector<1x16x128xf32> to vector<16x128xf32>
    %280 = vector.shape_cast %276 : vector<16x128xf32> to vector<1x16x128xf32>
    tpu.vector_store %arg4[%c0_106, %277, %c0_107], %280 {strides = array<i32>} : memref<1x128x128xf32, #tpu.memory_space<vmem>>, vector<1x16x128xf32>,
    %cst_108 = arith.constant 0.356674939 : f32
    %281 = vector.broadcast %cst_108 : f32 to vector<16x128xf32>
    %282 = arith.cmpf ogt, %276, %281 : vector<16x128xf32>
    %cst_109 = arith.constant 0.000000e+00 : f32
    %283 = vector.broadcast %cst_109 : f32 to vector<16x128xf32>
    %284 = arith.select %282, %276, %283 : vector<16x128xi1>, vector<16x128xf32>
    %cst_110 = arith.constant dense<0.000000e+00> : vector<128xf32>
    %285 = vector.multi_reduction <add>, %284, %cst_110 [0] : vector<16x128xf32> to vector<128xf32>
    %286 = vector.shape_cast %285 : vector<128xf32> to vector<1x128xf32>
    %287 = arith.addf %238, %286 : vector<1x128xf32>
    %288 = arith.extui %282 : vector<16x128xi1> to vector<16x128xi32>
    %289 = arith.sitofp %288 : vector<16x128xi32> to vector<16x128xf32>
    %cst_111 = arith.constant dense<0.000000e+00> : vector<128xf32>
    %290 = vector.multi_reduction <add>, %289, %cst_111 [0] : vector<16x128xf32> to vector<128xf32>
    %291 = vector.shape_cast %290 : vector<128xf32> to vector<1x128xf32>
    %292 = arith.addf %243, %291 : vector<1x128xf32>
    %293 = arith.extui %273 : vector<16x128xi1> to vector<16x128xi32>
    %294 = arith.sitofp %293 : vector<16x128xi32> to vector<16x128xf32>
    %cst_112 = arith.constant dense<0.000000e+00> : vector<128xf32>
    %295 = vector.multi_reduction <add>, %294, %cst_112 [0] : vector<16x128xf32> to vector<128xf32>
    %296 = vector.shape_cast %295 : vector<128xf32> to vector<1x128xf32>
    %297 = arith.addf %248, %296 : vector<1x128xf32>
    %c6_i32 = arith.constant 6 : i32
    %c16_i32_113 = arith.constant 16 : i32
    %298 = arith.muli %c6_i32, %c16_i32_113 : i32
    %299 = tpu.assume_multiple %298, 16 : i32
    %c0_114 = arith.constant 0 : index
    %c0_115 = arith.constant 0 : index
    %300 = arith.index_cast %299 : i32 to index
    %c0_116 = arith.constant 0 : index
    %301 = vector.load %arg2[%c0_114, %c0_115, %300, %c0_116] : memref<1x4x128x128xf32, #tpu.memory_space<vmem>>, vector<1x4x16x128xf32>
    %302 = vector.shape_cast %301 : vector<1x4x16x128xf32> to vector<4x16x128xf32>
    %c0_117 = arith.constant 0 : index
    %303 = arith.index_cast %299 : i32 to index
    %c0_118 = arith.constant 0 : index
    %304 = vector.load %arg3[%c0_117, %303, %c0_118] : memref<1x128x128xi32, #tpu.memory_space<vmem>>, vector<1x16x128xi32>
    %305 = vector.shape_cast %304 : vector<1x16x128xi32> to vector<16x128xi32>
    %cst_119 = arith.constant dense<0xFF800000> : vector<16x128xf32>
    %306 = vector.multi_reduction <maximumf>, %302, %cst_119 [0] : vector<4x16x128xf32> to vector<16x128xf32>
    %307 = vector.shape_cast %306 : vector<16x128xf32> to vector<1x16x128xf32>
    %308 = vector.broadcast %307 : vector<1x16x128xf32> to vector<4x16x128xf32>
    %309 = arith.subf %302, %308 : vector<4x16x128xf32>
    %310 = math.exp %309 : vector<4x16x128xf32>
    %cst_120 = arith.constant dense<0.000000e+00> : vector<16x128xf32>
    %311 = vector.multi_reduction <add>, %310, %cst_120 [0] : vector<4x16x128xf32> to vector<16x128xf32>
    %312 = math.log %311 : vector<16x128xf32>
    %313 = arith.addf %306, %312 : vector<16x128xf32>
    %314 = tpu.iota {dimensions = array<i32: 0>} : vector<4x16x128xi32>
    %315 = vector.shape_cast %305 : vector<16x128xi32> to vector<1x16x128xi32>
    %316 = vector.broadcast %315 : vector<1x16x128xi32> to vector<4x16x128xi32>
    %317 = arith.cmpi eq, %314, %316 : vector<4x16x128xi32>
    %cst_121 = arith.constant 0.000000e+00 : f32
    %318 = vector.broadcast %cst_121 : f32 to vector<4x16x128xf32>
    %319 = arith.select %317, %302, %318 : vector<4x16x128xi1>, vector<4x16x128xf32>
    %cst_122 = arith.constant dense<0.000000e+00> : vector<16x128xf32>
    %320 = vector.multi_reduction <add>, %319, %cst_122 [0] : vector<4x16x128xf32> to vector<16x128xf32>
    %c255_i32_123 = arith.constant 255 : i32
    %321 = vector.broadcast %c255_i32_123 : i32 to vector<16x128xi32>
    %322 = arith.cmpi ne, %305, %321 : vector<16x128xi32>
    %323 = arith.subf %313, %320 : vector<16x128xf32>
    %cst_124 = arith.constant 0.000000e+00 : f32
    %324 = vector.broadcast %cst_124 : f32 to vector<16x128xf32>
    %325 = arith.select %322, %323, %324 : vector<16x128xi1>, vector<16x128xf32>
    %c0_125 = arith.constant 0 : index
    %326 = arith.index_cast %299 : i32 to index
    %c0_126 = arith.constant 0 : index
    %327 = vector.load %arg4[%c0_125, %326, %c0_126] : memref<1x128x128xf32, #tpu.memory_space<vmem>>, vector<1x16x128xf32>
    %328 = vector.shape_cast %327 : vector<1x16x128xf32> to vector<16x128xf32>
    %329 = vector.shape_cast %325 : vector<16x128xf32> to vector<1x16x128xf32>
    tpu.vector_store %arg4[%c0_125, %326, %c0_126], %329 {strides = array<i32>} : memref<1x128x128xf32, #tpu.memory_space<vmem>>, vector<1x16x128xf32>,
    %cst_127 = arith.constant 0.356674939 : f32
    %330 = vector.broadcast %cst_127 : f32 to vector<16x128xf32>
    %331 = arith.cmpf ogt, %325, %330 : vector<16x128xf32>
    %cst_128 = arith.constant 0.000000e+00 : f32
    %332 = vector.broadcast %cst_128 : f32 to vector<16x128xf32>
    %333 = arith.select %331, %325, %332 : vector<16x128xi1>, vector<16x128xf32>
    %cst_129 = arith.constant dense<0.000000e+00> : vector<128xf32>
    %334 = vector.multi_reduction <add>, %333, %cst_129 [0] : vector<16x128xf32> to vector<128xf32>
    %335 = vector.shape_cast %334 : vector<128xf32> to vector<1x128xf32>
    %336 = arith.addf %287, %335 : vector<1x128xf32>
    %337 = arith.extui %331 : vector<16x128xi1> to vector<16x128xi32>
    %338 = arith.sitofp %337 : vector<16x128xi32> to vector<16x128xf32>
    %cst_130 = arith.constant dense<0.000000e+00> : vector<128xf32>
    %339 = vector.multi_reduction <add>, %338, %cst_130 [0] : vector<16x128xf32> to vector<128xf32>
    %340 = vector.shape_cast %339 : vector<128xf32> to vector<1x128xf32>
    %341 = arith.addf %292, %340 : vector<1x128xf32>
    %342 = arith.extui %322 : vector<16x128xi1> to vector<16x128xi32>
    %343 = arith.sitofp %342 : vector<16x128xi32> to vector<16x128xf32>
    %cst_131 = arith.constant dense<0.000000e+00> : vector<128xf32>
    %344 = vector.multi_reduction <add>, %343, %cst_131 [0] : vector<16x128xf32> to vector<128xf32>
    %345 = vector.shape_cast %344 : vector<128xf32> to vector<1x128xf32>
    %346 = arith.addf %297, %345 : vector<1x128xf32>
    %c7_i32 = arith.constant 7 : i32
    %c16_i32_132 = arith.constant 16 : i32
    %347 = arith.muli %c7_i32, %c16_i32_132 : i32
    %348 = tpu.assume_multiple %347, 16 : i32
    %c0_133 = arith.constant 0 : index
    %c0_134 = arith.constant 0 : index
    %349 = arith.index_cast %348 : i32 to index
    %c0_135 = arith.constant 0 : index
    %350 = vector.load %arg2[%c0_133, %c0_134, %349, %c0_135] : memref<1x4x128x128xf32, #tpu.memory_space<vmem>>, vector<1x4x16x128xf32>
    %351 = vector.shape_cast %350 : vector<1x4x16x128xf32> to vector<4x16x128xf32>
    %c0_136 = arith.constant 0 : index
    %352 = arith.index_cast %348 : i32 to index
    %c0_137 = arith.constant 0 : index
    %353 = vector.load %arg3[%c0_136, %352, %c0_137] : memref<1x128x128xi32, #tpu.memory_space<vmem>>, vector<1x16x128xi32>
    %354 = vector.shape_cast %353 : vector<1x16x128xi32> to vector<16x128xi32>
    %cst_138 = arith.constant dense<0xFF800000> : vector<16x128xf32>
    %355 = vector.multi_reduction <maximumf>, %351, %cst_138 [0] : vector<4x16x128xf32> to vector<16x128xf32>
    %356 = vector.shape_cast %355 : vector<16x128xf32> to vector<1x16x128xf32>
    %357 = vector.broadcast %356 : vector<1x16x128xf32> to vector<4x16x128xf32>
    %358 = arith.subf %351, %357 : vector<4x16x128xf32>
    %359 = math.exp %358 : vector<4x16x128xf32>
    %cst_139 = arith.constant dense<0.000000e+00> : vector<16x128xf32>
    %360 = vector.multi_reduction <add>, %359, %cst_139 [0] : vector<4x16x128xf32> to vector<16x128xf32>
    %361 = math.log %360 : vector<16x128xf32>
    %362 = arith.addf %355, %361 : vector<16x128xf32>
    %363 = tpu.iota {dimensions = array<i32: 0>} : vector<4x16x128xi32>
    %364 = vector.shape_cast %354 : vector<16x128xi32> to vector<1x16x128xi32>
    %365 = vector.broadcast %364 : vector<1x16x128xi32> to vector<4x16x128xi32>
    %366 = arith.cmpi eq, %363, %365 : vector<4x16x128xi32>
    %cst_140 = arith.constant 0.000000e+00 : f32
    %367 = vector.broadcast %cst_140 : f32 to vector<4x16x128xf32>
    %368 = arith.select %366, %351, %367 : vector<4x16x128xi1>, vector<4x16x128xf32>
    %cst_141 = arith.constant dense<0.000000e+00> : vector<16x128xf32>
    %369 = vector.multi_reduction <add>, %368, %cst_141 [0] : vector<4x16x128xf32> to vector<16x128xf32>
    %c255_i32_142 = arith.constant 255 : i32
    %370 = vector.broadcast %c255_i32_142 : i32 to vector<16x128xi32>
    %371 = arith.cmpi ne, %354, %370 : vector<16x128xi32>
    %372 = arith.subf %362, %369 : vector<16x128xf32>
    %cst_143 = arith.constant 0.000000e+00 : f32
    %373 = vector.broadcast %cst_143 : f32 to vector<16x128xf32>
    %374 = arith.select %371, %372, %373 : vector<16x128xi1>, vector<16x128xf32>
    %c0_144 = arith.constant 0 : index
    %375 = arith.index_cast %348 : i32 to index
    %c0_145 = arith.constant 0 : index
    %376 = vector.load %arg4[%c0_144, %375, %c0_145] : memref<1x128x128xf32, #tpu.memory_space<vmem>>, vector<1x16x128xf32>
    %377 = vector.shape_cast %376 : vector<1x16x128xf32> to vector<16x128xf32>
    %378 = vector.shape_cast %374 : vector<16x128xf32> to vector<1x16x128xf32>
    tpu.vector_store %arg4[%c0_144, %375, %c0_145], %378 {strides = array<i32>} : memref<1x128x128xf32, #tpu.memory_space<vmem>>, vector<1x16x128xf32>,
    %cst_146 = arith.constant 0.356674939 : f32
    %379 = vector.broadcast %cst_146 : f32 to vector<16x128xf32>
    %380 = arith.cmpf ogt, %374, %379 : vector<16x128xf32>
    %cst_147 = arith.constant 0.000000e+00 : f32
    %381 = vector.broadcast %cst_147 : f32 to vector<16x128xf32>
    %382 = arith.select %380, %374, %381 : vector<16x128xi1>, vector<16x128xf32>
    %cst_148 = arith.constant dense<0.000000e+00> : vector<128xf32>
    %383 = vector.multi_reduction <add>, %382, %cst_148 [0] : vector<16x128xf32> to vector<128xf32>
    %384 = vector.shape_cast %383 : vector<128xf32> to vector<1x128xf32>
    %385 = arith.addf %336, %384 : vector<1x128xf32>
    %386 = arith.extui %380 : vector<16x128xi1> to vector<16x128xi32>
    %387 = arith.sitofp %386 : vector<16x128xi32> to vector<16x128xf32>
    %cst_149 = arith.constant dense<0.000000e+00> : vector<128xf32>
    %388 = vector.multi_reduction <add>, %387, %cst_149 [0] : vector<16x128xf32> to vector<128xf32>
    %389 = vector.shape_cast %388 : vector<128xf32> to vector<1x128xf32>
    %390 = arith.addf %341, %389 : vector<1x128xf32>
    %391 = arith.extui %371 : vector<16x128xi1> to vector<16x128xi32>
    %392 = arith.sitofp %391 : vector<16x128xi32> to vector<16x128xf32>
    %cst_150 = arith.constant dense<0.000000e+00> : vector<128xf32>
    %393 = vector.multi_reduction <add>, %392, %cst_150 [0] : vector<16x128xf32> to vector<128xf32>
    %394 = vector.shape_cast %393 : vector<128xf32> to vector<1x128xf32>
    %395 = arith.addf %346, %394 : vector<1x128xf32>
    %c8_i32 = arith.constant 8 : i32
    %c0_151 = arith.constant 0 : index
    %c0_152 = arith.constant 0 : index
    %c0_153 = arith.constant 0 : index
    %396 = vector.load %arg5[%c0_151, %c0_152, %c0_153] : memref<1x3x128xf32, #tpu.memory_space<vmem>>, vector<1x1x128xf32>
    %397 = vector.shape_cast %396 : vector<1x1x128xf32> to vector<1x128xf32>
    %398 = arith.addf %397, %385 : vector<1x128xf32>
    %c0_154 = arith.constant 0 : index
    %c0_155 = arith.constant 0 : index
    %c0_156 = arith.constant 0 : index
    %399 = vector.load %arg5[%c0_154, %c0_155, %c0_156] : memref<1x3x128xf32, #tpu.memory_space<vmem>>, vector<1x1x128xf32>
    %400 = vector.shape_cast %399 : vector<1x1x128xf32> to vector<1x128xf32>
    %401 = vector.shape_cast %398 : vector<1x128xf32> to vector<1x1x128xf32>
    tpu.vector_store %arg5[%c0_154, %c0_155, %c0_156], %401 {strides = array<i32>} : memref<1x3x128xf32, #tpu.memory_space<vmem>>, vector<1x1x128xf32>,
    %c0_157 = arith.constant 0 : index
    %c1 = arith.constant 1 : index
    %c0_158 = arith.constant 0 : index
    %402 = vector.load %arg5[%c0_157, %c1, %c0_158] : memref<1x3x128xf32, #tpu.memory_space<vmem>>, vector<1x1x128xf32>
    %403 = vector.shape_cast %402 : vector<1x1x128xf32> to vector<1x128xf32>
    %404 = arith.addf %403, %390 : vector<1x128xf32>
    %c0_159 = arith.constant 0 : index
    %c1_160 = arith.constant 1 : index
    %c0_161 = arith.constant 0 : index
    %405 = vector.load %arg5[%c0_159, %c1_160, %c0_161] : memref<1x3x128xf32, #tpu.memory_space<vmem>>, vector<1x1x128xf32>
    %406 = vector.shape_cast %405 : vector<1x1x128xf32> to vector<1x128xf32>
    %407 = vector.shape_cast %404 : vector<1x128xf32> to vector<1x1x128xf32>
    tpu.vector_store %arg5[%c0_159, %c1_160, %c0_161], %407 {strides = array<i32>} : memref<1x3x128xf32, #tpu.memory_space<vmem>>, vector<1x1x128xf32>,
    %c0_162 = arith.constant 0 : index
    %c2 = arith.constant 2 : index
    %c0_163 = arith.constant 0 : index
    %408 = vector.load %arg5[%c0_162, %c2, %c0_163] : memref<1x3x128xf32, #tpu.memory_space<vmem>>, vector<1x1x128xf32>
    %409 = vector.shape_cast %408 : vector<1x1x128xf32> to vector<1x128xf32>
    %410 = arith.addf %409, %395 : vector<1x128xf32>
    %c0_164 = arith.constant 0 : index
    %c2_165 = arith.constant 2 : index
    %c0_166 = arith.constant 0 : index
    %411 = vector.load %arg5[%c0_164, %c2_165, %c0_166] : memref<1x3x128xf32, #tpu.memory_space<vmem>>, vector<1x1x128xf32>
    %412 = vector.shape_cast %411 : vector<1x1x128xf32> to vector<1x128xf32>
    %413 = vector.shape_cast %410 : vector<1x128xf32> to vector<1x1x128xf32>
    tpu.vector_store %arg5[%c0_164, %c2_165, %c0_166], %413 {strides = array<i32>} : memref<1x3x128xf32, #tpu.memory_space<vmem>>, vector<1x1x128xf32>,
    return
  }
  func.func @transform_0(%arg0: i32, %arg1: i32) -> (i32, i32, i32, i32) {
    %c0_i32 = arith.constant 0 : i32
    %c0_i32_0 = arith.constant 0 : i32
    %c0_i32_1 = arith.constant 0 : i32
    return %arg0, %c0_i32, %arg1, %c0_i32_0 : i32, i32, i32, i32
  }
  func.func @transform_1(%arg0: i32, %arg1: i32) -> (i32, i32, i32) {
    %c0_i32 = arith.constant 0 : i32
    %c0_i32_0 = arith.constant 0 : i32
    return %arg0, %arg1, %c0_i32 : i32, i32, i32
  }
  func.func @transform_2(%arg0: i32, %arg1: i32) -> (i32, i32, i32) {
    %c0_i32 = arith.constant 0 : i32
    %c0_i32_0 = arith.constant 0 : i32
    return %arg0, %arg1, %c0_i32 : i32, i32, i32
  }
  func.func @transform_3(%arg0: i32, %arg1: i32) -> (i32, i32, i32) {
    %c0_i32 = arith.constant 0 : i32
    %c0_i32_0 = arith.constant 0 : i32
    %c0_i32_1 = arith.constant 0 : i32
    return %arg0, %c0_i32, %c0_i32_0 : i32, i32, i32
  }
}

module attributes {stable_mosaic.version = 11 : i64} {
  func.func @_fused_up_ce_kernel(%arg0: i32, %arg1: i32, %arg2: memref<1x64x16xf32, #tpu.memory_space<vmem>>, %arg3: memref<128x16xf32, #tpu.memory_space<vmem>>, %arg4: memref<16x128xf32, #tpu.memory_space<vmem>>, %arg5: memref<1x128x128xi32, #tpu.memory_space<vmem>>, %arg6: memref<1x128x128xf32, #tpu.memory_space<vmem>>, %arg7: memref<1x3x128xf32, #tpu.memory_space<vmem>>, %arg8: memref<4x128x128xf32, #tpu.memory_space<vmem>>) attributes {dimension_semantics = [#tpu.dimension_semantics<parallel>, #tpu.dimension_semantics<arbitrary>], iteration_bounds = array<i64: 2, 1>, scalar_prefetch = 0 : i64, scratch_operands = 1 : i64, tpu.core_type = #tpu.core_type<tc>, window_params = [{transform_indices = @transform_0, window_bounds = array<i64: 1, 64, 16>}, {transform_indices = @transform_1, window_bounds = array<i64: 128, 16>}, {pipeline_mode = #tpu.pipeline_mode<synchronous>, transform_indices = @transform_2, window_bounds = array<i64: 16, 128>}, {transform_indices = @transform_3, window_bounds = array<i64: 1, 128, 128>}, {transform_indices = @transform_4, window_bounds = array<i64: 1, 128, 128>}, {transform_indices = @transform_5, window_bounds = array<i64: 1, 3, 128>}]} {
    %c0_i32 = arith.constant 0 : i32
    %0 = arith.cmpi eq, %arg1, %c0_i32 : i32
    %1 = arith.extui %0 : i1 to i32
    %c0_i32_0 = arith.constant 0 : i32
    %2 = arith.cmpi ne, %1, %c0_i32_0 : i32
    scf.if %2 {
      %cst_182 = arith.constant 0.000000e+00 : f32
      %431 = vector.broadcast %cst_182 : f32 to vector<1x3x128xf32>
      %c0_183 = arith.constant 0 : index
      %c0_184 = arith.constant 0 : index
      %c0_185 = arith.constant 0 : index
      %432 = vector.load %arg7[%c0_183, %c0_184, %c0_185] : memref<1x3x128xf32, #tpu.memory_space<vmem>>, vector<1x3x128xf32>
      tpu.vector_store %arg7[%c0_183, %c0_184, %c0_185], %431 {strides = array<i32>} : memref<1x3x128xf32, #tpu.memory_space<vmem>>, vector<1x3x128xf32>,
    } else {
    }
    %c0 = arith.constant 0 : index
    %c0_1 = arith.constant 0 : index
    %3 = vector.load %arg3[%c0, %c0_1] : memref<128x16xf32, #tpu.memory_space<vmem>>, vector<128x16xf32>
    %c0_2 = arith.constant 0 : index
    %c0_3 = arith.constant 0 : index
    %4 = vector.load %arg4[%c0_2, %c0_3] : memref<16x128xf32, #tpu.memory_space<vmem>>, vector<16x128xf32>
    %c0_4 = arith.constant 0 : index
    %c0_5 = arith.constant 0 : index
    %c0_6 = arith.constant 0 : index
    %5 = vector.load %arg2[%c0_4, %c0_5, %c0_6] : memref<1x64x16xf32, #tpu.memory_space<vmem>>, vector<1x64x16xf32>
    %6 = vector.shape_cast %5 : vector<1x64x16xf32> to vector<64x16xf32>
    %cst = arith.constant dense<0.000000e+00> : vector<64x128xf32>
    %7 = tpu.matmul %6, %4, %cst {dimension_numbers = #tpu.dot_dimension_numbers<[1], [0], [0], [1], [0, 0, 1, 1], [], []>} : vector<64x16xf32>, vector<16x128xf32>, vector<64x128xf32> -> vector<64x128xf32>
    %8 = vector.extract_strided_slice %7 {offsets = [0, 0], sizes = [16, 128], strides = [1, 1]} : vector<64x128xf32> to vector<16x128xf32>
    %cst_7 = arith.constant dense<0.000000e+00> : vector<128x128xf32>
    %9 = tpu.matmul %3, %8, %cst_7 {dimension_numbers = #tpu.dot_dimension_numbers<[1], [0], [0], [1], [0, 0, 1, 1], [], []>} : vector<128x16xf32>, vector<16x128xf32>, vector<128x128xf32> -> vector<128x128xf32>
    %c0_8 = arith.constant 0 : index
    %c0_9 = arith.constant 0 : index
    %c0_10 = arith.constant 0 : index
    %10 = vector.load %arg8[%c0_8, %c0_9, %c0_10] : memref<4x128x128xf32, #tpu.memory_space<vmem>>, vector<1x128x128xf32>
    %11 = vector.shape_cast %10 : vector<1x128x128xf32> to vector<128x128xf32>
    %12 = vector.shape_cast %9 : vector<128x128xf32> to vector<1x128x128xf32>
    tpu.vector_store %arg8[%c0_8, %c0_9, %c0_10], %12 {strides = array<i32>} : memref<4x128x128xf32, #tpu.memory_space<vmem>>, vector<1x128x128xf32>,
    %13 = vector.extract_strided_slice %7 {offsets = [16, 0], sizes = [16, 128], strides = [1, 1]} : vector<64x128xf32> to vector<16x128xf32>
    %cst_11 = arith.constant dense<0.000000e+00> : vector<128x128xf32>
    %14 = tpu.matmul %3, %13, %cst_11 {dimension_numbers = #tpu.dot_dimension_numbers<[1], [0], [0], [1], [0, 0, 1, 1], [], []>} : vector<128x16xf32>, vector<16x128xf32>, vector<128x128xf32> -> vector<128x128xf32>
    %c1 = arith.constant 1 : index
    %c0_12 = arith.constant 0 : index
    %c0_13 = arith.constant 0 : index
    %15 = vector.load %arg8[%c1, %c0_12, %c0_13] : memref<4x128x128xf32, #tpu.memory_space<vmem>>, vector<1x128x128xf32>
    %16 = vector.shape_cast %15 : vector<1x128x128xf32> to vector<128x128xf32>
    %17 = vector.shape_cast %14 : vector<128x128xf32> to vector<1x128x128xf32>
    tpu.vector_store %arg8[%c1, %c0_12, %c0_13], %17 {strides = array<i32>} : memref<4x128x128xf32, #tpu.memory_space<vmem>>, vector<1x128x128xf32>,
    %18 = vector.extract_strided_slice %7 {offsets = [32, 0], sizes = [16, 128], strides = [1, 1]} : vector<64x128xf32> to vector<16x128xf32>
    %cst_14 = arith.constant dense<0.000000e+00> : vector<128x128xf32>
    %19 = tpu.matmul %3, %18, %cst_14 {dimension_numbers = #tpu.dot_dimension_numbers<[1], [0], [0], [1], [0, 0, 1, 1], [], []>} : vector<128x16xf32>, vector<16x128xf32>, vector<128x128xf32> -> vector<128x128xf32>
    %c2 = arith.constant 2 : index
    %c0_15 = arith.constant 0 : index
    %c0_16 = arith.constant 0 : index
    %20 = vector.load %arg8[%c2, %c0_15, %c0_16] : memref<4x128x128xf32, #tpu.memory_space<vmem>>, vector<1x128x128xf32>
    %21 = vector.shape_cast %20 : vector<1x128x128xf32> to vector<128x128xf32>
    %22 = vector.shape_cast %19 : vector<128x128xf32> to vector<1x128x128xf32>
    tpu.vector_store %arg8[%c2, %c0_15, %c0_16], %22 {strides = array<i32>} : memref<4x128x128xf32, #tpu.memory_space<vmem>>, vector<1x128x128xf32>,
    %23 = vector.extract_strided_slice %7 {offsets = [48, 0], sizes = [16, 128], strides = [1, 1]} : vector<64x128xf32> to vector<16x128xf32>
    %cst_17 = arith.constant dense<0.000000e+00> : vector<128x128xf32>
    %24 = tpu.matmul %3, %23, %cst_17 {dimension_numbers = #tpu.dot_dimension_numbers<[1], [0], [0], [1], [0, 0, 1, 1], [], []>} : vector<128x16xf32>, vector<16x128xf32>, vector<128x128xf32> -> vector<128x128xf32>
    %c3 = arith.constant 3 : index
    %c0_18 = arith.constant 0 : index
    %c0_19 = arith.constant 0 : index
    %25 = vector.load %arg8[%c3, %c0_18, %c0_19] : memref<4x128x128xf32, #tpu.memory_space<vmem>>, vector<1x128x128xf32>
    %26 = vector.shape_cast %25 : vector<1x128x128xf32> to vector<128x128xf32>
    %27 = vector.shape_cast %24 : vector<128x128xf32> to vector<1x128x128xf32>
    tpu.vector_store %arg8[%c3, %c0_18, %c0_19], %27 {strides = array<i32>} : memref<4x128x128xf32, #tpu.memory_space<vmem>>, vector<1x128x128xf32>,
    %cst_20 = arith.constant 0.000000e+00 : f32
    %28 = vector.broadcast %cst_20 : f32 to vector<1x128xf32>
    %c0_i32_21 = arith.constant 0 : i32
    %c16_i32 = arith.constant 16 : i32
    %29 = arith.muli %c0_i32_21, %c16_i32 : i32
    %30 = tpu.assume_multiple %29, 16 : i32
    %c0_22 = arith.constant 0 : index
    %31 = arith.index_cast %30 : i32 to index
    %c0_23 = arith.constant 0 : index
    %32 = vector.load %arg8[%c0_22, %31, %c0_23] : memref<4x128x128xf32, #tpu.memory_space<vmem>>, vector<4x16x128xf32>
    %c0_24 = arith.constant 0 : index
    %33 = arith.index_cast %30 : i32 to index
    %c0_25 = arith.constant 0 : index
    %34 = vector.load %arg5[%c0_24, %33, %c0_25] : memref<1x128x128xi32, #tpu.memory_space<vmem>>, vector<1x16x128xi32>
    %35 = vector.shape_cast %34 : vector<1x16x128xi32> to vector<16x128xi32>
    %cst_26 = arith.constant dense<0xFF800000> : vector<16x128xf32>
    %36 = vector.multi_reduction <maximumf>, %32, %cst_26 [0] : vector<4x16x128xf32> to vector<16x128xf32>
    %37 = vector.shape_cast %36 : vector<16x128xf32> to vector<1x16x128xf32>
    %38 = vector.broadcast %37 : vector<1x16x128xf32> to vector<4x16x128xf32>
    %39 = arith.subf %32, %38 : vector<4x16x128xf32>
    %40 = math.exp %39 : vector<4x16x128xf32>
    %cst_27 = arith.constant dense<0.000000e+00> : vector<16x128xf32>
    %41 = vector.multi_reduction <add>, %40, %cst_27 [0] : vector<4x16x128xf32> to vector<16x128xf32>
    %42 = math.log %41 : vector<16x128xf32>
    %43 = arith.addf %36, %42 : vector<16x128xf32>
    %44 = tpu.iota {dimensions = array<i32: 0>} : vector<4x16x128xi32>
    %45 = vector.shape_cast %35 : vector<16x128xi32> to vector<1x16x128xi32>
    %46 = vector.broadcast %45 : vector<1x16x128xi32> to vector<4x16x128xi32>
    %47 = arith.cmpi eq, %44, %46 : vector<4x16x128xi32>
    %cst_28 = arith.constant 0.000000e+00 : f32
    %48 = vector.broadcast %cst_28 : f32 to vector<4x16x128xf32>
    %49 = arith.select %47, %32, %48 : vector<4x16x128xi1>, vector<4x16x128xf32>
    %cst_29 = arith.constant dense<0.000000e+00> : vector<16x128xf32>
    %50 = vector.multi_reduction <add>, %49, %cst_29 [0] : vector<4x16x128xf32> to vector<16x128xf32>
    %c255_i32 = arith.constant 255 : i32
    %51 = vector.broadcast %c255_i32 : i32 to vector<16x128xi32>
    %52 = arith.cmpi ne, %35, %51 : vector<16x128xi32>
    %53 = arith.subf %43, %50 : vector<16x128xf32>
    %cst_30 = arith.constant 0.000000e+00 : f32
    %54 = vector.broadcast %cst_30 : f32 to vector<16x128xf32>
    %55 = arith.select %52, %53, %54 : vector<16x128xi1>, vector<16x128xf32>
    %c0_31 = arith.constant 0 : index
    %56 = arith.index_cast %30 : i32 to index
    %c0_32 = arith.constant 0 : index
    %57 = vector.load %arg6[%c0_31, %56, %c0_32] : memref<1x128x128xf32, #tpu.memory_space<vmem>>, vector<1x16x128xf32>
    %58 = vector.shape_cast %57 : vector<1x16x128xf32> to vector<16x128xf32>
    %59 = vector.shape_cast %55 : vector<16x128xf32> to vector<1x16x128xf32>
    tpu.vector_store %arg6[%c0_31, %56, %c0_32], %59 {strides = array<i32>} : memref<1x128x128xf32, #tpu.memory_space<vmem>>, vector<1x16x128xf32>,
    %cst_33 = arith.constant 0.356674939 : f32
    %60 = vector.broadcast %cst_33 : f32 to vector<16x128xf32>
    %61 = arith.cmpf ogt, %55, %60 : vector<16x128xf32>
    %cst_34 = arith.constant 0.000000e+00 : f32
    %62 = vector.broadcast %cst_34 : f32 to vector<16x128xf32>
    %63 = arith.select %61, %55, %62 : vector<16x128xi1>, vector<16x128xf32>
    %cst_35 = arith.constant dense<0.000000e+00> : vector<128xf32>
    %64 = vector.multi_reduction <add>, %63, %cst_35 [0] : vector<16x128xf32> to vector<128xf32>
    %65 = vector.shape_cast %64 : vector<128xf32> to vector<1x128xf32>
    %66 = arith.addf %28, %65 : vector<1x128xf32>
    %67 = arith.extui %61 : vector<16x128xi1> to vector<16x128xi32>
    %68 = arith.sitofp %67 : vector<16x128xi32> to vector<16x128xf32>
    %cst_36 = arith.constant dense<0.000000e+00> : vector<128xf32>
    %69 = vector.multi_reduction <add>, %68, %cst_36 [0] : vector<16x128xf32> to vector<128xf32>
    %70 = vector.shape_cast %69 : vector<128xf32> to vector<1x128xf32>
    %71 = arith.addf %28, %70 : vector<1x128xf32>
    %72 = arith.extui %52 : vector<16x128xi1> to vector<16x128xi32>
    %73 = arith.sitofp %72 : vector<16x128xi32> to vector<16x128xf32>
    %cst_37 = arith.constant dense<0.000000e+00> : vector<128xf32>
    %74 = vector.multi_reduction <add>, %73, %cst_37 [0] : vector<16x128xf32> to vector<128xf32>
    %75 = vector.shape_cast %74 : vector<128xf32> to vector<1x128xf32>
    %76 = arith.addf %28, %75 : vector<1x128xf32>
    %c1_i32 = arith.constant 1 : i32
    %c16_i32_38 = arith.constant 16 : i32
    %77 = arith.muli %c1_i32, %c16_i32_38 : i32
    %78 = tpu.assume_multiple %77, 16 : i32
    %c0_39 = arith.constant 0 : index
    %79 = arith.index_cast %78 : i32 to index
    %c0_40 = arith.constant 0 : index
    %80 = vector.load %arg8[%c0_39, %79, %c0_40] : memref<4x128x128xf32, #tpu.memory_space<vmem>>, vector<4x16x128xf32>
    %c0_41 = arith.constant 0 : index
    %81 = arith.index_cast %78 : i32 to index
    %c0_42 = arith.constant 0 : index
    %82 = vector.load %arg5[%c0_41, %81, %c0_42] : memref<1x128x128xi32, #tpu.memory_space<vmem>>, vector<1x16x128xi32>
    %83 = vector.shape_cast %82 : vector<1x16x128xi32> to vector<16x128xi32>
    %cst_43 = arith.constant dense<0xFF800000> : vector<16x128xf32>
    %84 = vector.multi_reduction <maximumf>, %80, %cst_43 [0] : vector<4x16x128xf32> to vector<16x128xf32>
    %85 = vector.shape_cast %84 : vector<16x128xf32> to vector<1x16x128xf32>
    %86 = vector.broadcast %85 : vector<1x16x128xf32> to vector<4x16x128xf32>
    %87 = arith.subf %80, %86 : vector<4x16x128xf32>
    %88 = math.exp %87 : vector<4x16x128xf32>
    %cst_44 = arith.constant dense<0.000000e+00> : vector<16x128xf32>
    %89 = vector.multi_reduction <add>, %88, %cst_44 [0] : vector<4x16x128xf32> to vector<16x128xf32>
    %90 = math.log %89 : vector<16x128xf32>
    %91 = arith.addf %84, %90 : vector<16x128xf32>
    %92 = tpu.iota {dimensions = array<i32: 0>} : vector<4x16x128xi32>
    %93 = vector.shape_cast %83 : vector<16x128xi32> to vector<1x16x128xi32>
    %94 = vector.broadcast %93 : vector<1x16x128xi32> to vector<4x16x128xi32>
    %95 = arith.cmpi eq, %92, %94 : vector<4x16x128xi32>
    %cst_45 = arith.constant 0.000000e+00 : f32
    %96 = vector.broadcast %cst_45 : f32 to vector<4x16x128xf32>
    %97 = arith.select %95, %80, %96 : vector<4x16x128xi1>, vector<4x16x128xf32>
    %cst_46 = arith.constant dense<0.000000e+00> : vector<16x128xf32>
    %98 = vector.multi_reduction <add>, %97, %cst_46 [0] : vector<4x16x128xf32> to vector<16x128xf32>
    %c255_i32_47 = arith.constant 255 : i32
    %99 = vector.broadcast %c255_i32_47 : i32 to vector<16x128xi32>
    %100 = arith.cmpi ne, %83, %99 : vector<16x128xi32>
    %101 = arith.subf %91, %98 : vector<16x128xf32>
    %cst_48 = arith.constant 0.000000e+00 : f32
    %102 = vector.broadcast %cst_48 : f32 to vector<16x128xf32>
    %103 = arith.select %100, %101, %102 : vector<16x128xi1>, vector<16x128xf32>
    %c0_49 = arith.constant 0 : index
    %104 = arith.index_cast %78 : i32 to index
    %c0_50 = arith.constant 0 : index
    %105 = vector.load %arg6[%c0_49, %104, %c0_50] : memref<1x128x128xf32, #tpu.memory_space<vmem>>, vector<1x16x128xf32>
    %106 = vector.shape_cast %105 : vector<1x16x128xf32> to vector<16x128xf32>
    %107 = vector.shape_cast %103 : vector<16x128xf32> to vector<1x16x128xf32>
    tpu.vector_store %arg6[%c0_49, %104, %c0_50], %107 {strides = array<i32>} : memref<1x128x128xf32, #tpu.memory_space<vmem>>, vector<1x16x128xf32>,
    %cst_51 = arith.constant 0.356674939 : f32
    %108 = vector.broadcast %cst_51 : f32 to vector<16x128xf32>
    %109 = arith.cmpf ogt, %103, %108 : vector<16x128xf32>
    %cst_52 = arith.constant 0.000000e+00 : f32
    %110 = vector.broadcast %cst_52 : f32 to vector<16x128xf32>
    %111 = arith.select %109, %103, %110 : vector<16x128xi1>, vector<16x128xf32>
    %cst_53 = arith.constant dense<0.000000e+00> : vector<128xf32>
    %112 = vector.multi_reduction <add>, %111, %cst_53 [0] : vector<16x128xf32> to vector<128xf32>
    %113 = vector.shape_cast %112 : vector<128xf32> to vector<1x128xf32>
    %114 = arith.addf %66, %113 : vector<1x128xf32>
    %115 = arith.extui %109 : vector<16x128xi1> to vector<16x128xi32>
    %116 = arith.sitofp %115 : vector<16x128xi32> to vector<16x128xf32>
    %cst_54 = arith.constant dense<0.000000e+00> : vector<128xf32>
    %117 = vector.multi_reduction <add>, %116, %cst_54 [0] : vector<16x128xf32> to vector<128xf32>
    %118 = vector.shape_cast %117 : vector<128xf32> to vector<1x128xf32>
    %119 = arith.addf %71, %118 : vector<1x128xf32>
    %120 = arith.extui %100 : vector<16x128xi1> to vector<16x128xi32>
    %121 = arith.sitofp %120 : vector<16x128xi32> to vector<16x128xf32>
    %cst_55 = arith.constant dense<0.000000e+00> : vector<128xf32>
    %122 = vector.multi_reduction <add>, %121, %cst_55 [0] : vector<16x128xf32> to vector<128xf32>
    %123 = vector.shape_cast %122 : vector<128xf32> to vector<1x128xf32>
    %124 = arith.addf %76, %123 : vector<1x128xf32>
    %c2_i32 = arith.constant 2 : i32
    %c16_i32_56 = arith.constant 16 : i32
    %125 = arith.muli %c2_i32, %c16_i32_56 : i32
    %126 = tpu.assume_multiple %125, 16 : i32
    %c0_57 = arith.constant 0 : index
    %127 = arith.index_cast %126 : i32 to index
    %c0_58 = arith.constant 0 : index
    %128 = vector.load %arg8[%c0_57, %127, %c0_58] : memref<4x128x128xf32, #tpu.memory_space<vmem>>, vector<4x16x128xf32>
    %c0_59 = arith.constant 0 : index
    %129 = arith.index_cast %126 : i32 to index
    %c0_60 = arith.constant 0 : index
    %130 = vector.load %arg5[%c0_59, %129, %c0_60] : memref<1x128x128xi32, #tpu.memory_space<vmem>>, vector<1x16x128xi32>
    %131 = vector.shape_cast %130 : vector<1x16x128xi32> to vector<16x128xi32>
    %cst_61 = arith.constant dense<0xFF800000> : vector<16x128xf32>
    %132 = vector.multi_reduction <maximumf>, %128, %cst_61 [0] : vector<4x16x128xf32> to vector<16x128xf32>
    %133 = vector.shape_cast %132 : vector<16x128xf32> to vector<1x16x128xf32>
    %134 = vector.broadcast %133 : vector<1x16x128xf32> to vector<4x16x128xf32>
    %135 = arith.subf %128, %134 : vector<4x16x128xf32>
    %136 = math.exp %135 : vector<4x16x128xf32>
    %cst_62 = arith.constant dense<0.000000e+00> : vector<16x128xf32>
    %137 = vector.multi_reduction <add>, %136, %cst_62 [0] : vector<4x16x128xf32> to vector<16x128xf32>
    %138 = math.log %137 : vector<16x128xf32>
    %139 = arith.addf %132, %138 : vector<16x128xf32>
    %140 = tpu.iota {dimensions = array<i32: 0>} : vector<4x16x128xi32>
    %141 = vector.shape_cast %131 : vector<16x128xi32> to vector<1x16x128xi32>
    %142 = vector.broadcast %141 : vector<1x16x128xi32> to vector<4x16x128xi32>
    %143 = arith.cmpi eq, %140, %142 : vector<4x16x128xi32>
    %cst_63 = arith.constant 0.000000e+00 : f32
    %144 = vector.broadcast %cst_63 : f32 to vector<4x16x128xf32>
    %145 = arith.select %143, %128, %144 : vector<4x16x128xi1>, vector<4x16x128xf32>
    %cst_64 = arith.constant dense<0.000000e+00> : vector<16x128xf32>
    %146 = vector.multi_reduction <add>, %145, %cst_64 [0] : vector<4x16x128xf32> to vector<16x128xf32>
    %c255_i32_65 = arith.constant 255 : i32
    %147 = vector.broadcast %c255_i32_65 : i32 to vector<16x128xi32>
    %148 = arith.cmpi ne, %131, %147 : vector<16x128xi32>
    %149 = arith.subf %139, %146 : vector<16x128xf32>
    %cst_66 = arith.constant 0.000000e+00 : f32
    %150 = vector.broadcast %cst_66 : f32 to vector<16x128xf32>
    %151 = arith.select %148, %149, %150 : vector<16x128xi1>, vector<16x128xf32>
    %c0_67 = arith.constant 0 : index
    %152 = arith.index_cast %126 : i32 to index
    %c0_68 = arith.constant 0 : index
    %153 = vector.load %arg6[%c0_67, %152, %c0_68] : memref<1x128x128xf32, #tpu.memory_space<vmem>>, vector<1x16x128xf32>
    %154 = vector.shape_cast %153 : vector<1x16x128xf32> to vector<16x128xf32>
    %155 = vector.shape_cast %151 : vector<16x128xf32> to vector<1x16x128xf32>
    tpu.vector_store %arg6[%c0_67, %152, %c0_68], %155 {strides = array<i32>} : memref<1x128x128xf32, #tpu.memory_space<vmem>>, vector<1x16x128xf32>,
    %cst_69 = arith.constant 0.356674939 : f32
    %156 = vector.broadcast %cst_69 : f32 to vector<16x128xf32>
    %157 = arith.cmpf ogt, %151, %156 : vector<16x128xf32>
    %cst_70 = arith.constant 0.000000e+00 : f32
    %158 = vector.broadcast %cst_70 : f32 to vector<16x128xf32>
    %159 = arith.select %157, %151, %158 : vector<16x128xi1>, vector<16x128xf32>
    %cst_71 = arith.constant dense<0.000000e+00> : vector<128xf32>
    %160 = vector.multi_reduction <add>, %159, %cst_71 [0] : vector<16x128xf32> to vector<128xf32>
    %161 = vector.shape_cast %160 : vector<128xf32> to vector<1x128xf32>
    %162 = arith.addf %114, %161 : vector<1x128xf32>
    %163 = arith.extui %157 : vector<16x128xi1> to vector<16x128xi32>
    %164 = arith.sitofp %163 : vector<16x128xi32> to vector<16x128xf32>
    %cst_72 = arith.constant dense<0.000000e+00> : vector<128xf32>
    %165 = vector.multi_reduction <add>, %164, %cst_72 [0] : vector<16x128xf32> to vector<128xf32>
    %166 = vector.shape_cast %165 : vector<128xf32> to vector<1x128xf32>
    %167 = arith.addf %119, %166 : vector<1x128xf32>
    %168 = arith.extui %148 : vector<16x128xi1> to vector<16x128xi32>
    %169 = arith.sitofp %168 : vector<16x128xi32> to vector<16x128xf32>
    %cst_73 = arith.constant dense<0.000000e+00> : vector<128xf32>
    %170 = vector.multi_reduction <add>, %169, %cst_73 [0] : vector<16x128xf32> to vector<128xf32>
    %171 = vector.shape_cast %170 : vector<128xf32> to vector<1x128xf32>
    %172 = arith.addf %124, %171 : vector<1x128xf32>
    %c3_i32 = arith.constant 3 : i32
    %c16_i32_74 = arith.constant 16 : i32
    %173 = arith.muli %c3_i32, %c16_i32_74 : i32
    %174 = tpu.assume_multiple %173, 16 : i32
    %c0_75 = arith.constant 0 : index
    %175 = arith.index_cast %174 : i32 to index
    %c0_76 = arith.constant 0 : index
    %176 = vector.load %arg8[%c0_75, %175, %c0_76] : memref<4x128x128xf32, #tpu.memory_space<vmem>>, vector<4x16x128xf32>
    %c0_77 = arith.constant 0 : index
    %177 = arith.index_cast %174 : i32 to index
    %c0_78 = arith.constant 0 : index
    %178 = vector.load %arg5[%c0_77, %177, %c0_78] : memref<1x128x128xi32, #tpu.memory_space<vmem>>, vector<1x16x128xi32>
    %179 = vector.shape_cast %178 : vector<1x16x128xi32> to vector<16x128xi32>
    %cst_79 = arith.constant dense<0xFF800000> : vector<16x128xf32>
    %180 = vector.multi_reduction <maximumf>, %176, %cst_79 [0] : vector<4x16x128xf32> to vector<16x128xf32>
    %181 = vector.shape_cast %180 : vector<16x128xf32> to vector<1x16x128xf32>
    %182 = vector.broadcast %181 : vector<1x16x128xf32> to vector<4x16x128xf32>
    %183 = arith.subf %176, %182 : vector<4x16x128xf32>
    %184 = math.exp %183 : vector<4x16x128xf32>
    %cst_80 = arith.constant dense<0.000000e+00> : vector<16x128xf32>
    %185 = vector.multi_reduction <add>, %184, %cst_80 [0] : vector<4x16x128xf32> to vector<16x128xf32>
    %186 = math.log %185 : vector<16x128xf32>
    %187 = arith.addf %180, %186 : vector<16x128xf32>
    %188 = tpu.iota {dimensions = array<i32: 0>} : vector<4x16x128xi32>
    %189 = vector.shape_cast %179 : vector<16x128xi32> to vector<1x16x128xi32>
    %190 = vector.broadcast %189 : vector<1x16x128xi32> to vector<4x16x128xi32>
    %191 = arith.cmpi eq, %188, %190 : vector<4x16x128xi32>
    %cst_81 = arith.constant 0.000000e+00 : f32
    %192 = vector.broadcast %cst_81 : f32 to vector<4x16x128xf32>
    %193 = arith.select %191, %176, %192 : vector<4x16x128xi1>, vector<4x16x128xf32>
    %cst_82 = arith.constant dense<0.000000e+00> : vector<16x128xf32>
    %194 = vector.multi_reduction <add>, %193, %cst_82 [0] : vector<4x16x128xf32> to vector<16x128xf32>
    %c255_i32_83 = arith.constant 255 : i32
    %195 = vector.broadcast %c255_i32_83 : i32 to vector<16x128xi32>
    %196 = arith.cmpi ne, %179, %195 : vector<16x128xi32>
    %197 = arith.subf %187, %194 : vector<16x128xf32>
    %cst_84 = arith.constant 0.000000e+00 : f32
    %198 = vector.broadcast %cst_84 : f32 to vector<16x128xf32>
    %199 = arith.select %196, %197, %198 : vector<16x128xi1>, vector<16x128xf32>
    %c0_85 = arith.constant 0 : index
    %200 = arith.index_cast %174 : i32 to index
    %c0_86 = arith.constant 0 : index
    %201 = vector.load %arg6[%c0_85, %200, %c0_86] : memref<1x128x128xf32, #tpu.memory_space<vmem>>, vector<1x16x128xf32>
    %202 = vector.shape_cast %201 : vector<1x16x128xf32> to vector<16x128xf32>
    %203 = vector.shape_cast %199 : vector<16x128xf32> to vector<1x16x128xf32>
    tpu.vector_store %arg6[%c0_85, %200, %c0_86], %203 {strides = array<i32>} : memref<1x128x128xf32, #tpu.memory_space<vmem>>, vector<1x16x128xf32>,
    %cst_87 = arith.constant 0.356674939 : f32
    %204 = vector.broadcast %cst_87 : f32 to vector<16x128xf32>
    %205 = arith.cmpf ogt, %199, %204 : vector<16x128xf32>
    %cst_88 = arith.constant 0.000000e+00 : f32
    %206 = vector.broadcast %cst_88 : f32 to vector<16x128xf32>
    %207 = arith.select %205, %199, %206 : vector<16x128xi1>, vector<16x128xf32>
    %cst_89 = arith.constant dense<0.000000e+00> : vector<128xf32>
    %208 = vector.multi_reduction <add>, %207, %cst_89 [0] : vector<16x128xf32> to vector<128xf32>
    %209 = vector.shape_cast %208 : vector<128xf32> to vector<1x128xf32>
    %210 = arith.addf %162, %209 : vector<1x128xf32>
    %211 = arith.extui %205 : vector<16x128xi1> to vector<16x128xi32>
    %212 = arith.sitofp %211 : vector<16x128xi32> to vector<16x128xf32>
    %cst_90 = arith.constant dense<0.000000e+00> : vector<128xf32>
    %213 = vector.multi_reduction <add>, %212, %cst_90 [0] : vector<16x128xf32> to vector<128xf32>
    %214 = vector.shape_cast %213 : vector<128xf32> to vector<1x128xf32>
    %215 = arith.addf %167, %214 : vector<1x128xf32>
    %216 = arith.extui %196 : vector<16x128xi1> to vector<16x128xi32>
    %217 = arith.sitofp %216 : vector<16x128xi32> to vector<16x128xf32>
    %cst_91 = arith.constant dense<0.000000e+00> : vector<128xf32>
    %218 = vector.multi_reduction <add>, %217, %cst_91 [0] : vector<16x128xf32> to vector<128xf32>
    %219 = vector.shape_cast %218 : vector<128xf32> to vector<1x128xf32>
    %220 = arith.addf %172, %219 : vector<1x128xf32>
    %c4_i32 = arith.constant 4 : i32
    %c16_i32_92 = arith.constant 16 : i32
    %221 = arith.muli %c4_i32, %c16_i32_92 : i32
    %222 = tpu.assume_multiple %221, 16 : i32
    %c0_93 = arith.constant 0 : index
    %223 = arith.index_cast %222 : i32 to index
    %c0_94 = arith.constant 0 : index
    %224 = vector.load %arg8[%c0_93, %223, %c0_94] : memref<4x128x128xf32, #tpu.memory_space<vmem>>, vector<4x16x128xf32>
    %c0_95 = arith.constant 0 : index
    %225 = arith.index_cast %222 : i32 to index
    %c0_96 = arith.constant 0 : index
    %226 = vector.load %arg5[%c0_95, %225, %c0_96] : memref<1x128x128xi32, #tpu.memory_space<vmem>>, vector<1x16x128xi32>
    %227 = vector.shape_cast %226 : vector<1x16x128xi32> to vector<16x128xi32>
    %cst_97 = arith.constant dense<0xFF800000> : vector<16x128xf32>
    %228 = vector.multi_reduction <maximumf>, %224, %cst_97 [0] : vector<4x16x128xf32> to vector<16x128xf32>
    %229 = vector.shape_cast %228 : vector<16x128xf32> to vector<1x16x128xf32>
    %230 = vector.broadcast %229 : vector<1x16x128xf32> to vector<4x16x128xf32>
    %231 = arith.subf %224, %230 : vector<4x16x128xf32>
    %232 = math.exp %231 : vector<4x16x128xf32>
    %cst_98 = arith.constant dense<0.000000e+00> : vector<16x128xf32>
    %233 = vector.multi_reduction <add>, %232, %cst_98 [0] : vector<4x16x128xf32> to vector<16x128xf32>
    %234 = math.log %233 : vector<16x128xf32>
    %235 = arith.addf %228, %234 : vector<16x128xf32>
    %236 = tpu.iota {dimensions = array<i32: 0>} : vector<4x16x128xi32>
    %237 = vector.shape_cast %227 : vector<16x128xi32> to vector<1x16x128xi32>
    %238 = vector.broadcast %237 : vector<1x16x128xi32> to vector<4x16x128xi32>
    %239 = arith.cmpi eq, %236, %238 : vector<4x16x128xi32>
    %cst_99 = arith.constant 0.000000e+00 : f32
    %240 = vector.broadcast %cst_99 : f32 to vector<4x16x128xf32>
    %241 = arith.select %239, %224, %240 : vector<4x16x128xi1>, vector<4x16x128xf32>
    %cst_100 = arith.constant dense<0.000000e+00> : vector<16x128xf32>
    %242 = vector.multi_reduction <add>, %241, %cst_100 [0] : vector<4x16x128xf32> to vector<16x128xf32>
    %c255_i32_101 = arith.constant 255 : i32
    %243 = vector.broadcast %c255_i32_101 : i32 to vector<16x128xi32>
    %244 = arith.cmpi ne, %227, %243 : vector<16x128xi32>
    %245 = arith.subf %235, %242 : vector<16x128xf32>
    %cst_102 = arith.constant 0.000000e+00 : f32
    %246 = vector.broadcast %cst_102 : f32 to vector<16x128xf32>
    %247 = arith.select %244, %245, %246 : vector<16x128xi1>, vector<16x128xf32>
    %c0_103 = arith.constant 0 : index
    %248 = arith.index_cast %222 : i32 to index
    %c0_104 = arith.constant 0 : index
    %249 = vector.load %arg6[%c0_103, %248, %c0_104] : memref<1x128x128xf32, #tpu.memory_space<vmem>>, vector<1x16x128xf32>
    %250 = vector.shape_cast %249 : vector<1x16x128xf32> to vector<16x128xf32>
    %251 = vector.shape_cast %247 : vector<16x128xf32> to vector<1x16x128xf32>
    tpu.vector_store %arg6[%c0_103, %248, %c0_104], %251 {strides = array<i32>} : memref<1x128x128xf32, #tpu.memory_space<vmem>>, vector<1x16x128xf32>,
    %cst_105 = arith.constant 0.356674939 : f32
    %252 = vector.broadcast %cst_105 : f32 to vector<16x128xf32>
    %253 = arith.cmpf ogt, %247, %252 : vector<16x128xf32>
    %cst_106 = arith.constant 0.000000e+00 : f32
    %254 = vector.broadcast %cst_106 : f32 to vector<16x128xf32>
    %255 = arith.select %253, %247, %254 : vector<16x128xi1>, vector<16x128xf32>
    %cst_107 = arith.constant dense<0.000000e+00> : vector<128xf32>
    %256 = vector.multi_reduction <add>, %255, %cst_107 [0] : vector<16x128xf32> to vector<128xf32>
    %257 = vector.shape_cast %256 : vector<128xf32> to vector<1x128xf32>
    %258 = arith.addf %210, %257 : vector<1x128xf32>
    %259 = arith.extui %253 : vector<16x128xi1> to vector<16x128xi32>
    %260 = arith.sitofp %259 : vector<16x128xi32> to vector<16x128xf32>
    %cst_108 = arith.constant dense<0.000000e+00> : vector<128xf32>
    %261 = vector.multi_reduction <add>, %260, %cst_108 [0] : vector<16x128xf32> to vector<128xf32>
    %262 = vector.shape_cast %261 : vector<128xf32> to vector<1x128xf32>
    %263 = arith.addf %215, %262 : vector<1x128xf32>
    %264 = arith.extui %244 : vector<16x128xi1> to vector<16x128xi32>
    %265 = arith.sitofp %264 : vector<16x128xi32> to vector<16x128xf32>
    %cst_109 = arith.constant dense<0.000000e+00> : vector<128xf32>
    %266 = vector.multi_reduction <add>, %265, %cst_109 [0] : vector<16x128xf32> to vector<128xf32>
    %267 = vector.shape_cast %266 : vector<128xf32> to vector<1x128xf32>
    %268 = arith.addf %220, %267 : vector<1x128xf32>
    %c5_i32 = arith.constant 5 : i32
    %c16_i32_110 = arith.constant 16 : i32
    %269 = arith.muli %c5_i32, %c16_i32_110 : i32
    %270 = tpu.assume_multiple %269, 16 : i32
    %c0_111 = arith.constant 0 : index
    %271 = arith.index_cast %270 : i32 to index
    %c0_112 = arith.constant 0 : index
    %272 = vector.load %arg8[%c0_111, %271, %c0_112] : memref<4x128x128xf32, #tpu.memory_space<vmem>>, vector<4x16x128xf32>
    %c0_113 = arith.constant 0 : index
    %273 = arith.index_cast %270 : i32 to index
    %c0_114 = arith.constant 0 : index
    %274 = vector.load %arg5[%c0_113, %273, %c0_114] : memref<1x128x128xi32, #tpu.memory_space<vmem>>, vector<1x16x128xi32>
    %275 = vector.shape_cast %274 : vector<1x16x128xi32> to vector<16x128xi32>
    %cst_115 = arith.constant dense<0xFF800000> : vector<16x128xf32>
    %276 = vector.multi_reduction <maximumf>, %272, %cst_115 [0] : vector<4x16x128xf32> to vector<16x128xf32>
    %277 = vector.shape_cast %276 : vector<16x128xf32> to vector<1x16x128xf32>
    %278 = vector.broadcast %277 : vector<1x16x128xf32> to vector<4x16x128xf32>
    %279 = arith.subf %272, %278 : vector<4x16x128xf32>
    %280 = math.exp %279 : vector<4x16x128xf32>
    %cst_116 = arith.constant dense<0.000000e+00> : vector<16x128xf32>
    %281 = vector.multi_reduction <add>, %280, %cst_116 [0] : vector<4x16x128xf32> to vector<16x128xf32>
    %282 = math.log %281 : vector<16x128xf32>
    %283 = arith.addf %276, %282 : vector<16x128xf32>
    %284 = tpu.iota {dimensions = array<i32: 0>} : vector<4x16x128xi32>
    %285 = vector.shape_cast %275 : vector<16x128xi32> to vector<1x16x128xi32>
    %286 = vector.broadcast %285 : vector<1x16x128xi32> to vector<4x16x128xi32>
    %287 = arith.cmpi eq, %284, %286 : vector<4x16x128xi32>
    %cst_117 = arith.constant 0.000000e+00 : f32
    %288 = vector.broadcast %cst_117 : f32 to vector<4x16x128xf32>
    %289 = arith.select %287, %272, %288 : vector<4x16x128xi1>, vector<4x16x128xf32>
    %cst_118 = arith.constant dense<0.000000e+00> : vector<16x128xf32>
    %290 = vector.multi_reduction <add>, %289, %cst_118 [0] : vector<4x16x128xf32> to vector<16x128xf32>
    %c255_i32_119 = arith.constant 255 : i32
    %291 = vector.broadcast %c255_i32_119 : i32 to vector<16x128xi32>
    %292 = arith.cmpi ne, %275, %291 : vector<16x128xi32>
    %293 = arith.subf %283, %290 : vector<16x128xf32>
    %cst_120 = arith.constant 0.000000e+00 : f32
    %294 = vector.broadcast %cst_120 : f32 to vector<16x128xf32>
    %295 = arith.select %292, %293, %294 : vector<16x128xi1>, vector<16x128xf32>
    %c0_121 = arith.constant 0 : index
    %296 = arith.index_cast %270 : i32 to index
    %c0_122 = arith.constant 0 : index
    %297 = vector.load %arg6[%c0_121, %296, %c0_122] : memref<1x128x128xf32, #tpu.memory_space<vmem>>, vector<1x16x128xf32>
    %298 = vector.shape_cast %297 : vector<1x16x128xf32> to vector<16x128xf32>
    %299 = vector.shape_cast %295 : vector<16x128xf32> to vector<1x16x128xf32>
    tpu.vector_store %arg6[%c0_121, %296, %c0_122], %299 {strides = array<i32>} : memref<1x128x128xf32, #tpu.memory_space<vmem>>, vector<1x16x128xf32>,
    %cst_123 = arith.constant 0.356674939 : f32
    %300 = vector.broadcast %cst_123 : f32 to vector<16x128xf32>
    %301 = arith.cmpf ogt, %295, %300 : vector<16x128xf32>
    %cst_124 = arith.constant 0.000000e+00 : f32
    %302 = vector.broadcast %cst_124 : f32 to vector<16x128xf32>
    %303 = arith.select %301, %295, %302 : vector<16x128xi1>, vector<16x128xf32>
    %cst_125 = arith.constant dense<0.000000e+00> : vector<128xf32>
    %304 = vector.multi_reduction <add>, %303, %cst_125 [0] : vector<16x128xf32> to vector<128xf32>
    %305 = vector.shape_cast %304 : vector<128xf32> to vector<1x128xf32>
    %306 = arith.addf %258, %305 : vector<1x128xf32>
    %307 = arith.extui %301 : vector<16x128xi1> to vector<16x128xi32>
    %308 = arith.sitofp %307 : vector<16x128xi32> to vector<16x128xf32>
    %cst_126 = arith.constant dense<0.000000e+00> : vector<128xf32>
    %309 = vector.multi_reduction <add>, %308, %cst_126 [0] : vector<16x128xf32> to vector<128xf32>
    %310 = vector.shape_cast %309 : vector<128xf32> to vector<1x128xf32>
    %311 = arith.addf %263, %310 : vector<1x128xf32>
    %312 = arith.extui %292 : vector<16x128xi1> to vector<16x128xi32>
    %313 = arith.sitofp %312 : vector<16x128xi32> to vector<16x128xf32>
    %cst_127 = arith.constant dense<0.000000e+00> : vector<128xf32>
    %314 = vector.multi_reduction <add>, %313, %cst_127 [0] : vector<16x128xf32> to vector<128xf32>
    %315 = vector.shape_cast %314 : vector<128xf32> to vector<1x128xf32>
    %316 = arith.addf %268, %315 : vector<1x128xf32>
    %c6_i32 = arith.constant 6 : i32
    %c16_i32_128 = arith.constant 16 : i32
    %317 = arith.muli %c6_i32, %c16_i32_128 : i32
    %318 = tpu.assume_multiple %317, 16 : i32
    %c0_129 = arith.constant 0 : index
    %319 = arith.index_cast %318 : i32 to index
    %c0_130 = arith.constant 0 : index
    %320 = vector.load %arg8[%c0_129, %319, %c0_130] : memref<4x128x128xf32, #tpu.memory_space<vmem>>, vector<4x16x128xf32>
    %c0_131 = arith.constant 0 : index
    %321 = arith.index_cast %318 : i32 to index
    %c0_132 = arith.constant 0 : index
    %322 = vector.load %arg5[%c0_131, %321, %c0_132] : memref<1x128x128xi32, #tpu.memory_space<vmem>>, vector<1x16x128xi32>
    %323 = vector.shape_cast %322 : vector<1x16x128xi32> to vector<16x128xi32>
    %cst_133 = arith.constant dense<0xFF800000> : vector<16x128xf32>
    %324 = vector.multi_reduction <maximumf>, %320, %cst_133 [0] : vector<4x16x128xf32> to vector<16x128xf32>
    %325 = vector.shape_cast %324 : vector<16x128xf32> to vector<1x16x128xf32>
    %326 = vector.broadcast %325 : vector<1x16x128xf32> to vector<4x16x128xf32>
    %327 = arith.subf %320, %326 : vector<4x16x128xf32>
    %328 = math.exp %327 : vector<4x16x128xf32>
    %cst_134 = arith.constant dense<0.000000e+00> : vector<16x128xf32>
    %329 = vector.multi_reduction <add>, %328, %cst_134 [0] : vector<4x16x128xf32> to vector<16x128xf32>
    %330 = math.log %329 : vector<16x128xf32>
    %331 = arith.addf %324, %330 : vector<16x128xf32>
    %332 = tpu.iota {dimensions = array<i32: 0>} : vector<4x16x128xi32>
    %333 = vector.shape_cast %323 : vector<16x128xi32> to vector<1x16x128xi32>
    %334 = vector.broadcast %333 : vector<1x16x128xi32> to vector<4x16x128xi32>
    %335 = arith.cmpi eq, %332, %334 : vector<4x16x128xi32>
    %cst_135 = arith.constant 0.000000e+00 : f32
    %336 = vector.broadcast %cst_135 : f32 to vector<4x16x128xf32>
    %337 = arith.select %335, %320, %336 : vector<4x16x128xi1>, vector<4x16x128xf32>
    %cst_136 = arith.constant dense<0.000000e+00> : vector<16x128xf32>
    %338 = vector.multi_reduction <add>, %337, %cst_136 [0] : vector<4x16x128xf32> to vector<16x128xf32>
    %c255_i32_137 = arith.constant 255 : i32
    %339 = vector.broadcast %c255_i32_137 : i32 to vector<16x128xi32>
    %340 = arith.cmpi ne, %323, %339 : vector<16x128xi32>
    %341 = arith.subf %331, %338 : vector<16x128xf32>
    %cst_138 = arith.constant 0.000000e+00 : f32
    %342 = vector.broadcast %cst_138 : f32 to vector<16x128xf32>
    %343 = arith.select %340, %341, %342 : vector<16x128xi1>, vector<16x128xf32>
    %c0_139 = arith.constant 0 : index
    %344 = arith.index_cast %318 : i32 to index
    %c0_140 = arith.constant 0 : index
    %345 = vector.load %arg6[%c0_139, %344, %c0_140] : memref<1x128x128xf32, #tpu.memory_space<vmem>>, vector<1x16x128xf32>
    %346 = vector.shape_cast %345 : vector<1x16x128xf32> to vector<16x128xf32>
    %347 = vector.shape_cast %343 : vector<16x128xf32> to vector<1x16x128xf32>
    tpu.vector_store %arg6[%c0_139, %344, %c0_140], %347 {strides = array<i32>} : memref<1x128x128xf32, #tpu.memory_space<vmem>>, vector<1x16x128xf32>,
    %cst_141 = arith.constant 0.356674939 : f32
    %348 = vector.broadcast %cst_141 : f32 to vector<16x128xf32>
    %349 = arith.cmpf ogt, %343, %348 : vector<16x128xf32>
    %cst_142 = arith.constant 0.000000e+00 : f32
    %350 = vector.broadcast %cst_142 : f32 to vector<16x128xf32>
    %351 = arith.select %349, %343, %350 : vector<16x128xi1>, vector<16x128xf32>
    %cst_143 = arith.constant dense<0.000000e+00> : vector<128xf32>
    %352 = vector.multi_reduction <add>, %351, %cst_143 [0] : vector<16x128xf32> to vector<128xf32>
    %353 = vector.shape_cast %352 : vector<128xf32> to vector<1x128xf32>
    %354 = arith.addf %306, %353 : vector<1x128xf32>
    %355 = arith.extui %349 : vector<16x128xi1> to vector<16x128xi32>
    %356 = arith.sitofp %355 : vector<16x128xi32> to vector<16x128xf32>
    %cst_144 = arith.constant dense<0.000000e+00> : vector<128xf32>
    %357 = vector.multi_reduction <add>, %356, %cst_144 [0] : vector<16x128xf32> to vector<128xf32>
    %358 = vector.shape_cast %357 : vector<128xf32> to vector<1x128xf32>
    %359 = arith.addf %311, %358 : vector<1x128xf32>
    %360 = arith.extui %340 : vector<16x128xi1> to vector<16x128xi32>
    %361 = arith.sitofp %360 : vector<16x128xi32> to vector<16x128xf32>
    %cst_145 = arith.constant dense<0.000000e+00> : vector<128xf32>
    %362 = vector.multi_reduction <add>, %361, %cst_145 [0] : vector<16x128xf32> to vector<128xf32>
    %363 = vector.shape_cast %362 : vector<128xf32> to vector<1x128xf32>
    %364 = arith.addf %316, %363 : vector<1x128xf32>
    %c7_i32 = arith.constant 7 : i32
    %c16_i32_146 = arith.constant 16 : i32
    %365 = arith.muli %c7_i32, %c16_i32_146 : i32
    %366 = tpu.assume_multiple %365, 16 : i32
    %c0_147 = arith.constant 0 : index
    %367 = arith.index_cast %366 : i32 to index
    %c0_148 = arith.constant 0 : index
    %368 = vector.load %arg8[%c0_147, %367, %c0_148] : memref<4x128x128xf32, #tpu.memory_space<vmem>>, vector<4x16x128xf32>
    %c0_149 = arith.constant 0 : index
    %369 = arith.index_cast %366 : i32 to index
    %c0_150 = arith.constant 0 : index
    %370 = vector.load %arg5[%c0_149, %369, %c0_150] : memref<1x128x128xi32, #tpu.memory_space<vmem>>, vector<1x16x128xi32>
    %371 = vector.shape_cast %370 : vector<1x16x128xi32> to vector<16x128xi32>
    %cst_151 = arith.constant dense<0xFF800000> : vector<16x128xf32>
    %372 = vector.multi_reduction <maximumf>, %368, %cst_151 [0] : vector<4x16x128xf32> to vector<16x128xf32>
    %373 = vector.shape_cast %372 : vector<16x128xf32> to vector<1x16x128xf32>
    %374 = vector.broadcast %373 : vector<1x16x128xf32> to vector<4x16x128xf32>
    %375 = arith.subf %368, %374 : vector<4x16x128xf32>
    %376 = math.exp %375 : vector<4x16x128xf32>
    %cst_152 = arith.constant dense<0.000000e+00> : vector<16x128xf32>
    %377 = vector.multi_reduction <add>, %376, %cst_152 [0] : vector<4x16x128xf32> to vector<16x128xf32>
    %378 = math.log %377 : vector<16x128xf32>
    %379 = arith.addf %372, %378 : vector<16x128xf32>
    %380 = tpu.iota {dimensions = array<i32: 0>} : vector<4x16x128xi32>
    %381 = vector.shape_cast %371 : vector<16x128xi32> to vector<1x16x128xi32>
    %382 = vector.broadcast %381 : vector<1x16x128xi32> to vector<4x16x128xi32>
    %383 = arith.cmpi eq, %380, %382 : vector<4x16x128xi32>
    %cst_153 = arith.constant 0.000000e+00 : f32
    %384 = vector.broadcast %cst_153 : f32 to vector<4x16x128xf32>
    %385 = arith.select %383, %368, %384 : vector<4x16x128xi1>, vector<4x16x128xf32>
    %cst_154 = arith.constant dense<0.000000e+00> : vector<16x128xf32>
    %386 = vector.multi_reduction <add>, %385, %cst_154 [0] : vector<4x16x128xf32> to vector<16x128xf32>
    %c255_i32_155 = arith.constant 255 : i32
    %387 = vector.broadcast %c255_i32_155 : i32 to vector<16x128xi32>
    %388 = arith.cmpi ne, %371, %387 : vector<16x128xi32>
    %389 = arith.subf %379, %386 : vector<16x128xf32>
    %cst_156 = arith.constant 0.000000e+00 : f32
    %390 = vector.broadcast %cst_156 : f32 to vector<16x128xf32>
    %391 = arith.select %388, %389, %390 : vector<16x128xi1>, vector<16x128xf32>
    %c0_157 = arith.constant 0 : index
    %392 = arith.index_cast %366 : i32 to index
    %c0_158 = arith.constant 0 : index
    %393 = vector.load %arg6[%c0_157, %392, %c0_158] : memref<1x128x128xf32, #tpu.memory_space<vmem>>, vector<1x16x128xf32>
    %394 = vector.shape_cast %393 : vector<1x16x128xf32> to vector<16x128xf32>
    %395 = vector.shape_cast %391 : vector<16x128xf32> to vector<1x16x128xf32>
    tpu.vector_store %arg6[%c0_157, %392, %c0_158], %395 {strides = array<i32>} : memref<1x128x128xf32, #tpu.memory_space<vmem>>, vector<1x16x128xf32>,
    %cst_159 = arith.constant 0.356674939 : f32
    %396 = vector.broadcast %cst_159 : f32 to vector<16x128xf32>
    %397 = arith.cmpf ogt, %391, %396 : vector<16x128xf32>
    %cst_160 = arith.constant 0.000000e+00 : f32
    %398 = vector.broadcast %cst_160 : f32 to vector<16x128xf32>
    %399 = arith.select %397, %391, %398 : vector<16x128xi1>, vector<16x128xf32>
    %cst_161 = arith.constant dense<0.000000e+00> : vector<128xf32>
    %400 = vector.multi_reduction <add>, %399, %cst_161 [0] : vector<16x128xf32> to vector<128xf32>
    %401 = vector.shape_cast %400 : vector<128xf32> to vector<1x128xf32>
    %402 = arith.addf %354, %401 : vector<1x128xf32>
    %403 = arith.extui %397 : vector<16x128xi1> to vector<16x128xi32>
    %404 = arith.sitofp %403 : vector<16x128xi32> to vector<16x128xf32>
    %cst_162 = arith.constant dense<0.000000e+00> : vector<128xf32>
    %405 = vector.multi_reduction <add>, %404, %cst_162 [0] : vector<16x128xf32> to vector<128xf32>
    %406 = vector.shape_cast %405 : vector<128xf32> to vector<1x128xf32>
    %407 = arith.addf %359, %406 : vector<1x128xf32>
    %408 = arith.extui %388 : vector<16x128xi1> to vector<16x128xi32>
    %409 = arith.sitofp %408 : vector<16x128xi32> to vector<16x128xf32>
    %cst_163 = arith.constant dense<0.000000e+00> : vector<128xf32>
    %410 = vector.multi_reduction <add>, %409, %cst_163 [0] : vector<16x128xf32> to vector<128xf32>
    %411 = vector.shape_cast %410 : vector<128xf32> to vector<1x128xf32>
    %412 = arith.addf %364, %411 : vector<1x128xf32>
    %c8_i32 = arith.constant 8 : i32
    %c0_164 = arith.constant 0 : index
    %c0_165 = arith.constant 0 : index
    %c0_166 = arith.constant 0 : index
    %413 = vector.load %arg7[%c0_164, %c0_165, %c0_166] : memref<1x3x128xf32, #tpu.memory_space<vmem>>, vector<1x1x128xf32>
    %414 = vector.shape_cast %413 : vector<1x1x128xf32> to vector<1x128xf32>
    %415 = arith.addf %414, %402 : vector<1x128xf32>
    %c0_167 = arith.constant 0 : index
    %c0_168 = arith.constant 0 : index
    %c0_169 = arith.constant 0 : index
    %416 = vector.load %arg7[%c0_167, %c0_168, %c0_169] : memref<1x3x128xf32, #tpu.memory_space<vmem>>, vector<1x1x128xf32>
    %417 = vector.shape_cast %416 : vector<1x1x128xf32> to vector<1x128xf32>
    %418 = vector.shape_cast %415 : vector<1x128xf32> to vector<1x1x128xf32>
    tpu.vector_store %arg7[%c0_167, %c0_168, %c0_169], %418 {strides = array<i32>} : memref<1x3x128xf32, #tpu.memory_space<vmem>>, vector<1x1x128xf32>,
    %c0_170 = arith.constant 0 : index
    %c1_171 = arith.constant 1 : index
    %c0_172 = arith.constant 0 : index
    %419 = vector.load %arg7[%c0_170, %c1_171, %c0_172] : memref<1x3x128xf32, #tpu.memory_space<vmem>>, vector<1x1x128xf32>
    %420 = vector.shape_cast %419 : vector<1x1x128xf32> to vector<1x128xf32>
    %421 = arith.addf %420, %407 : vector<1x128xf32>
    %c0_173 = arith.constant 0 : index
    %c1_174 = arith.constant 1 : index
    %c0_175 = arith.constant 0 : index
    %422 = vector.load %arg7[%c0_173, %c1_174, %c0_175] : memref<1x3x128xf32, #tpu.memory_space<vmem>>, vector<1x1x128xf32>
    %423 = vector.shape_cast %422 : vector<1x1x128xf32> to vector<1x128xf32>
    %424 = vector.shape_cast %421 : vector<1x128xf32> to vector<1x1x128xf32>
    tpu.vector_store %arg7[%c0_173, %c1_174, %c0_175], %424 {strides = array<i32>} : memref<1x3x128xf32, #tpu.memory_space<vmem>>, vector<1x1x128xf32>,
    %c0_176 = arith.constant 0 : index
    %c2_177 = arith.constant 2 : index
    %c0_178 = arith.constant 0 : index
    %425 = vector.load %arg7[%c0_176, %c2_177, %c0_178] : memref<1x3x128xf32, #tpu.memory_space<vmem>>, vector<1x1x128xf32>
    %426 = vector.shape_cast %425 : vector<1x1x128xf32> to vector<1x128xf32>
    %427 = arith.addf %426, %412 : vector<1x128xf32>
    %c0_179 = arith.constant 0 : index
    %c2_180 = arith.constant 2 : index
    %c0_181 = arith.constant 0 : index
    %428 = vector.load %arg7[%c0_179, %c2_180, %c0_181] : memref<1x3x128xf32, #tpu.memory_space<vmem>>, vector<1x1x128xf32>
    %429 = vector.shape_cast %428 : vector<1x1x128xf32> to vector<1x128xf32>
    %430 = vector.shape_cast %427 : vector<1x128xf32> to vector<1x1x128xf32>
    tpu.vector_store %arg7[%c0_179, %c2_180, %c0_181], %430 {strides = array<i32>} : memref<1x3x128xf32, #tpu.memory_space<vmem>>, vector<1x1x128xf32>,
    return
  }
  func.func @transform_0(%arg0: i32, %arg1: i32) -> (i32, i32, i32) {
    %c0_i32 = arith.constant 0 : i32
    %c0_i32_0 = arith.constant 0 : i32
    %c0_i32_1 = arith.constant 0 : i32
    return %arg0, %c0_i32, %c0_i32_0 : i32, i32, i32
  }
  func.func @transform_1(%arg0: i32, %arg1: i32) -> (i32, i32) {
    %c0_i32 = arith.constant 0 : i32
    %c0_i32_0 = arith.constant 0 : i32
    return %arg1, %c0_i32 : i32, i32
  }
  func.func @transform_2(%arg0: i32, %arg1: i32) -> (i32, i32) {
    %c0_i32 = arith.constant 0 : i32
    %c0_i32_0 = arith.constant 0 : i32
    %c0_i32_1 = arith.constant 0 : i32
    return %c0_i32, %c0_i32_0 : i32, i32
  }
  func.func @transform_3(%arg0: i32, %arg1: i32) -> (i32, i32, i32) {
    %c0_i32 = arith.constant 0 : i32
    %c0_i32_0 = arith.constant 0 : i32
    return %arg0, %arg1, %c0_i32 : i32, i32, i32
  }
  func.func @transform_4(%arg0: i32, %arg1: i32) -> (i32, i32, i32) {
    %c0_i32 = arith.constant 0 : i32
    %c0_i32_0 = arith.constant 0 : i32
    return %arg0, %arg1, %c0_i32 : i32, i32, i32
  }
  func.func @transform_5(%arg0: i32, %arg1: i32) -> (i32, i32, i32) {
    %c0_i32 = arith.constant 0 : i32
    %c0_i32_0 = arith.constant 0 : i32
    %c0_i32_1 = arith.constant 0 : i32
    return %arg0, %c0_i32, %c0_i32_0 : i32, i32, i32
  }
}

</mosaic_0001>

<bundles_post_ra>
// kernel: pixel_classification_criterion.3
= control target key start
LH: loop header
LB: loop body
LE: loop exit
PB: predicated region body
PF: predicated region fallthrough
CT: control target
= control target key end

     0   :  { %9 = vsyncpa [#allocation3], 0  ;;  %s2878_s0 = inlined_call_operand.hbm [shape: f32[2,4,128,128], index: 0, kind: input, shape index: {}]   ;;  %s2879_s1 = inlined_call_operand.hbm [shape: s32[2,128,128], index: 1, kind: input, shape index: {}]   ;;  %s2880_s2 = inlined_call_operand.vmem [shape: f32[2,128,128], index: 2, kind: output, shape index: {0}]   ;;  %s2881_s3 = inlined_call_operand.vmem [shape: f32[2,3,128], index: 3, kind: output, shape index: {1}]  }
   0x1   :  { %11 = vsyncpa [#allocation3 + $0x1], 0 }
   0x2   :  { %12 = vsyncpa [#allocation5], 0 }
   0x3   :  { %14 = vsyncpa [#allocation5 + $0x1], 0  ;;  %s1909_s12 = smov 0   ;;  %s1911_s13 = smov 0  }
   0x4   :  { %s1913_s14 = smov 0   ;;  %s1915_s15 = smov 0  }
   0x5   :  { %s1917_s16 = smov 0   ;;  %s1919_s17 = smov 0  }
   0x6 LB: > { %s1410_s18 = sadd.s32 4294967295, %s1884_s17   ;;  %s32_s19 = sadd.s32 1, %s1880_s16  ;;  %s1884_s17 = sphi %s1919_s17, %s20_s17   ;;  %s1880_s16 = sphi %s1917_s16, %s2889_s16   ;;  %s1876_s15 = sphi %s1915_s15, %s2888_s15   ;;  %s1872_s14 = sphi %s1913_s14, %s2887_s14   ;;  %s1868_s13 = sphi %s1911_s13, %s2886_s13   ;;  %s1864_s12 = sphi %s1909_s12, %s2885_s12  }
   0x7   : > { %p34_p0 = scmp.ge.s32.totalorder %s32_s19, 2  ;;  %s41_s20 = sadd.s32 1, %s1872_s14 }
   0x8   : > { %p48_p1 = scmp.ne.s32.totalorder %s1872_s14, %s1868_s13  ;;  %p49_p2 = scmp.eq.s32.totalorder %s1884_s17, 0 }
   0x9   : > { %s2891_s19 = smov (%p34_p0, %s32_s19), 0  ;;  %p54_p4 = scmp.ne.s32.totalorder %s1868_s13, %s1864_s12 }
   0xa   : > { %p1945_p3 = por %p49_p2, %p48_p1  ;;  %s36_s22 = ssub.s32 %s1880_s16, %s2891_s19 }
   0xb   : > { %p55_p5 = scmp.eq.s32.totalorder %s1410_s18, 0  ;;  %p39_p6 = scmp.eq.s32.totalorder %s36_s22, 0 }
   0xc   : > { %p1558_p8 = scmp.lt.s32.totalorder %s1884_s17, 2  ;;  %s1961_s25 = sand.u32 1, %s1872_s14  }
   0xd   : > { %p1952_p7 = por %p55_p5, %p54_p4  ;;  %s1544_s26 = sshll.u32 %s1880_s16, 9 }
   0xe   : > { %s1958_s24 = scalar_select %p39_p6, %s1872_s14, %s41_s20  }
   0xf   : > { %s1414_s27 = sshll.u32 %s1961_s25, 9  ;;  %s171_s30 = scalar_lea.hbm %s2878_s0, %s1544_s26 }
  0x10   : > { %s172_s4 = sshll.u32 %s171_s30, 4  ;;  %s164_s5 = scalar_lea.vmem [#allocation2], %s1414_s27  ;;  %s173_s4 = int_to_ptr.hbm [resolvable:$true] %s172_s4 }
  0x11   : > { %s174_s6 = sshll.u32 %s164_s5, 4  ;;  %p1970_p9 = pnand %p1558_p8, %p1945_p3  ;;  %s175_s6 = int_to_ptr.vmem [resolvable:$true] %s174_s6 }
  0x12   : > { %p1420_p10 = scmp.ge.s32.totalorder %s1884_s17, 1  ;;  %p206_p11 = scmp.lt.s32.totalorder %s1884_s17, 3 }
  0x13   : > { %s161_s8 = scalar_lea.sflag [#allocation3], %s1961_s25  ;;  %s1886_s9 = smov 128  }
  0x14   : > { %s1887_s10 = smov 8   ;;  %p207_p12 = pnand %p1420_p10, %p206_p11 }
  0x15   : > { %1554 = dma.hbm_to_vmem [thread:$0]  (!%p1970_p9), %s173_s4, 8192, %s175_s6, %s161_s8, %s1886_s9, %s1886_s9, %s1887_s10  }
  0x16   : > { %s1417_s11 = sshll.u32 %s1961_s25, 7  ;;  %s1545_s12 = sshll.u32 %s1880_s16, 7 }
  0x17   : > { %s195_s21 = scalar_lea.hbm %s2879_s1, %s1545_s12  ;;  %s188_s26 = scalar_lea.vmem [#allocation4], %s1417_s11 }
  0x18   : > { %s196_s22 = sshll.u32 %s195_s21, 4  ;;  %s198_s27 = sshll.u32 %s188_s26, 4  ;;  %s197_s22 = int_to_ptr.hbm [resolvable:$true] %s196_s22  ;;  %s199_s27 = int_to_ptr.vmem [resolvable:$true] %s198_s27 }
  0x19   : > { %s185_s28 = scalar_lea.sflag [#allocation5], %s1961_s25  ;;  %210 = sbr.rel (%p207_p12) target bundleno = 264 (0x108), region = 28 }
  0x1a   : > { %1557 = dma.hbm_to_vmem [thread:$0]  (!%p1970_p9), %s197_s22, 2048, %s199_s27, %s185_s28, %s1886_s9, %s1886_s9, %s1887_s10  }
  0x1b   : > { %s212_s29 = sand.u32 (!%p207_p12), 1, %s1868_s13  }
  0x1c   : > { %s1421_s30 = sshll.u32 (!%p207_p12), %s212_s29, 9  ;;  %s213_s4 = scalar_lea.sflag (!%p207_p12), [#allocation3], %s212_s29 }
  0x1d   : > { %s1988_s5 = scalar_lea.vmem (!%p207_p12), [#allocation2], %s1421_s30 }
  0x1e   : > { %1855 = dma.done.wait (%p1952_p7), %s213_s4, 8192  }
  0x1f   : > { %1857 = vsyncadd (%p1952_p7), %s213_s4, 4294959104  ;;  %s1422_s6 = sshll.u32 %s212_s29, 7  ;;  %s223_s8 = scalar_lea.sflag [#allocation5], %s212_s29 }
  0x20   : > { %s1994_s11 = scalar_lea.vmem [#allocation4], %s1422_s6 }
  0x21   : > { %1859 = dma.done.wait (%p1952_p7), %s223_s8, 2048  }
  0x22   : > { %1861 = vsyncadd (%p1952_p7), %s223_s8, 4294965248  ;;  %p266_p13 = scmp.lt.s32.totalorder %s1876_s15, 1  ;;  %v1888_v0 = vmov 0.0   ;;  %v284_v1 = vld [vmem:[%s1988_s5] sm:$0xff]  ;;  %v285_v7 = vld [vmem:[%s1988_s5 + $0x8] sm:$0xff] }
  0x23   : > { %v286_v2 = vld [vmem:[%s1988_s5 + $0x80] sm:$0xff]  ;;  %v287_v9 = vld [vmem:[%s1988_s5 + $0x88] sm:$0xff]  ;;  %v1430_v32 = vld [vmem:[%s1988_s5 + $0x10] sm:$0xff] }
  0x24   : > { %s2893_s15 = smov (!%p266_p13, %s1876_s15), 1  ;;  %v288_v3 = vld [vmem:[%s1988_s5 + $0x100] sm:$0xff]  ;;  %v289_v10 = vld [vmem:[%s1988_s5 + $0x108] sm:$0xff]  ;;  %v1434_v33 = vld [vmem:[%s1988_s5 + $0x110] sm:$0xff] }
  0x25   : > { %s1425_s25 = sshll.u32 %s2893_s15, 2  ;;  %v290_v4 = vld [vmem:[%s1988_s5 + $0x180] sm:$0xff]  ;;  %v294_v6 = vmax.f32 %v284_v1, %v288_v3  ;;  %v2026_v11 = vld [vmem:[%s1988_s5 + $0x188] sm:$0xff]  ;;  %v297_v18 = vmax.f32 %v285_v7, %v289_v10  ;;  %v1432_v37 = vld [vmem:[%s1988_s5 + $0x90] sm:$0xff]  ;;  %v414_v44 = vmax.f32 %v1430_v32, %v1434_v33  ;;  %s1546_s10 = sshll.u32 %s2893_s15, 7 }
  0x26   : > { %s2008_s23 = scalar_lea.vmem %s2881_s3, %s1425_s25  ;;  %v2017_v5 = vld [vmem:[%s1994_s11] sm:$0xff]  ;;  %v295_v8 = vmax.f32 %v286_v2, %v290_v4  ;;  %v2032_v15 = vld [vmem:[%s1994_s11 + $0x8] sm:$0xff]  ;;  %v298_v19 = vmax.f32 %v287_v9, %v2026_v11  ;;  %v2057_v38 = vld [vmem:[%s1988_s5 + $0x190] sm:$0xff]  ;;  %s2161_s18 = scalar_lea.vmem %s2880_s2, %s1546_s10 }
  0x27   : > { %283 = vst [vmem:[%s2008_s23] sm:$0x7] %v1888_v0  ;;  %vm336_vm0 = vcmp.eq.s32.totalorder %v2017_v5, 0  ;;  %vm338_vm1 = vcmp.eq.s32.totalorder %v2017_v5, 1  ;;  %vm340_vm2 = vcmp.eq.s32.totalorder %v2017_v5, 2  ;;  %vm342_vm3 = vcmp.eq.s32.totalorder %v2017_v5, 3  ;;  %v2063_v42 = vld [vmem:[%s1994_s11 + $0x10] sm:$0xff] }
  0x28   : > { %v344_v12 = vsel %vm336_vm0, %v284_v1, 0.0  ;;  %v346_v13 = vsel %vm338_vm1, %v286_v2, 0.0  ;;  %v2028_v14 = vmax.f32 %v294_v6, %v295_v8  ;;  %v348_v16 = vsel %vm340_vm2, %v288_v3, 0.0 }
  0x29   : > { %v352_v17 = vadd.f32 %v346_v13, %v344_v12  ;;  %v2039_v24 = vsel %vm342_vm3, %v290_v4, 0.0  ;;  %vm358_vm4 = vcmp.ne.s32.totalorder %v2017_v5, 255  ;;  %v2042_v25 = vmax.f32 %v297_v18, %v298_v19 }
  0x2a   : > { %v300_v20 = vsub.f32 %v284_v1, %v2028_v14  ;;  %v302_v21 = vsub.f32 %v286_v2, %v2028_v14  ;;  %v304_v22 = vsub.f32 %v288_v3, %v2028_v14  ;;  %v306_v23 = vsub.f32 %v290_v4, %v2028_v14 }
  0x2b   : > { %vm337_vm5 = vcmp.eq.s32.totalorder %v2032_v15, 0  ;;  %v301_v30 = vsub.f32 %v285_v7, %v2042_v25  ;;  %v303_v31 = vsub.f32 %v287_v9, %v2042_v25  ;;  %vm339_vm6 = vcmp.eq.s32.totalorder %v2032_v15, 1 }
  0x2c   : > { %v308_v26 = vmul.f32 1.442695, %v300_v20  ;;  %v312_v27 = vmul.f32 1.442695, %v302_v21  ;;  %v316_v28 = vmul.f32 1.442695, %v304_v22  ;;  %v2050_v34 = vadd.f32 %v352_v17, %v348_v16 }
  0x2d   : > { %v320_v29 = vmul.f32 1.442695, %v306_v23  ;;  %v305_v35 = vsub.f32 %v289_v10, %v2042_v25  ;;  %v307_v36 = vsub.f32 %v2026_v11, %v2042_v25  ;;  %v1428_v39 = vsel %vm358_vm4, 1.0, %v1888_v0  ;;  %v1433_v23 = vld [vmem:[%s1988_s5 + $0x98] sm:$0xff] }
  0x2e   : > { %1610 = vpow2.f32 %v308_v26  ;;  %v310_v40 = vmul.f32 1.442695, %v301_v30  ;;  %v314_v41 = vmul.f32 1.442695, %v303_v31  ;;  %vm341_vm7 = vcmp.eq.s32.totalorder %v2032_v15, 2  ;;  %v2095_v26 = vld [vmem:[%s1988_s5 + $0x198] sm:$0xff] }
  0x2f   : > { %1612 = vpow2.f32 %v312_v27  ;;  %v318_v43 = vmul.f32 1.442695, %v305_v35  ;;  %v322_v45 = vmul.f32 1.442695, %v307_v36  ;;  %v345_v46 = vsel %vm337_vm5, %v285_v7, 0.0  ;;  %v2102_v35 = vld [vmem:[%s1994_s11 + $0x18] sm:$0xff] }
  0x30   : > { %1614 = vpow2.f32 %v316_v28  ;;  %v347_v47 = vsel %vm339_vm6, %v287_v9, 0.0  ;;  %vm359_vm8 = vcmp.ne.s32.totalorder %v2032_v15, 255  ;;  %v415_v48 = vmax.f32 %v1432_v37, %v2057_v38  ;;  %v1431_v9 = vld [vmem:[%s1988_s5 + $0x18] sm:$0xff] }
  0x31   : > { %1616 = vpow2.f32 %v320_v29  ;;  %vm456_vm9 = vcmp.eq.s32.totalorder %v2063_v42, 0  ;;  %vm343_vm10 = vcmp.eq.s32.totalorder %v2032_v15, 3  ;;  %v349_v49 = vsel %vm341_vm7, %v289_v10, 0.0  ;;  %v2089_v10 = vld [vmem:[%s1988_s5 + $0x118] sm:$0xff] }
  0x32   : > { %1618 = vpow2.f32 %v310_v40  ;;  %v1429_v50 = vsel %vm359_vm8, 1.0, %v1888_v0  ;;  %v2077_v53 = vmax.f32 %v414_v44, %v415_v48  ;;  %vm458_vm11 = vcmp.eq.s32.totalorder %v2063_v42, 1  ;;  %v2124_v44 = vld [vmem:[%s1988_s5 + $0x20] sm:$0xff] }
  0x33   : > { %1620 = vpow2.f32 %v314_v41  ;;  %v394_v52 = vadd.f32 %v1429_v50, %v1428_v39  ;;  %v355_v55 = vadd.f32 %v347_v47, %v345_v46  ;;  %vm460_vm12 = vcmp.eq.s32.totalorder %v2063_v42, 2 }
  0x34   : > { %v1611_v51 = vpop.eup %1610  ;;  %1622 = vpow2.f32 %v318_v43  ;;  %v464_v56 = vsel %vm456_vm9, %v1430_v32, 0.0  ;;  %v420_v60 = vsub.f32 %v1430_v32, %v2077_v53  ;;  %v422_v61 = vsub.f32 %v1432_v37, %v2077_v53 }
  0x35   : > { %v1613_v54 = vpop.eup %1612  ;;  %1624 = vpow2.f32 %v322_v45  ;;  %v395_v59 = vrot.slane %v394_v52, 4  ;;  %v424_v63 = vsub.f32 %v1434_v33, %v2077_v53  ;;  %v426_v1 = vsub.f32 %v2057_v38, %v2077_v53  ;;  %v2127_v45 = vld [vmem:[%s1988_s5 + $0x120] sm:$0xff] }
  0x36   : > { %v1615_v57 = vpop.eup %1614  ;;  %v324_v58 = vadd.f32 %v1613_v54, %v1611_v51  ;;  %vm462_vm13 = vcmp.eq.s32.totalorder %v2063_v42, 3  ;;  %v466_v2 = vsel %vm458_vm11, %v1432_v37, 0.0  ;;  %v428_v7 = vmul.f32 1.442695, %v420_v60 }
  0x37   : > { %v1617_v62 = vpop.eup %1616  ;;  %v396_v6 = vadd.f32 %v395_v59, %v394_v52  ;;  %v432_v8 = vmul.f32 1.442695, %v422_v61  ;;  %v436_v13 = vmul.f32 1.442695, %v424_v63  ;;  %v440_v16 = vmul.f32 1.442695, %v426_v1 }
  0x38   : > { %v1619_v3 = vpop.eup %1618  ;;  %v325_v4 = vadd.f32 %v1615_v57, %v324_v58  ;;  %v468_v17 = vsel %vm460_vm12, %v1434_v33, 0.0  ;;  %v472_v18 = vadd.f32 %v466_v2, %v464_v56  ;;  %1626 = vpow2.f32 %v428_v7  ;;  %v2141_v56 = vld [vmem:[%s1988_s5 + $0xa0] sm:$0xff] }
  0x39   : > { %v1621_v12 = vpop.eup %1620  ;;  %v397_v22 = vrot.slane %v396_v6, 2  ;;  %v351_v28 = vsel %vm343_vm10, %v2026_v11, 0.0  ;;  %v356_v29 = vadd.f32 %v355_v55, %v349_v49  ;;  %1628 = vpow2.f32 %v432_v8  ;;  %v2144_v57 = vld [vmem:[%s1988_s5 + $0x1a0] sm:$0xff] }
  0x3a   : > { %v1623_v19 = vpop.eup %1622  ;;  %v326_v20 = vadd.f32 %v1617_v62, %v325_v4  ;;  %v327_v21 = vadd.f32 %v1621_v12, %v1619_v3  ;;  %v417_v30 = vmax.f32 %v1431_v9, %v2089_v10  ;;  %v473_v33 = vadd.f32 %v472_v18, %v468_v17 }
  0x3b   : > { %v1625_v27 = vpop.eup %1624  ;;  %v398_v32 = vadd.f32 %v397_v22, %v396_v6  ;;  %v354_v36 = vadd.f32 %v2050_v34, %v2039_v24  ;;  %v470_v37 = vsel %vm462_vm13, %v2057_v38, 0.0  ;;  %v418_v11 = vmax.f32 %v1433_v23, %v2095_v26 }
  0x3c   : > { %1630 = vlog2.f32 %v326_v20  ;;  %v328_v31 = vadd.f32 %v1623_v19, %v327_v21  ;;  %vm478_vm14 = vcmp.ne.s32.totalorder %v2063_v42, 255  ;;  %v2111_v41 = vadd.f32 %v356_v29, %v351_v28  ;;  %v2174_v21 = vld [vmem:[%s1994_s11 + $0x20] sm:$0xff] }
  0x3d   : > { %1632 = vpow2.f32 %v436_v13  ;;  %v399_v40 = vrot.slane %v398_v32, 1  ;;  %v1444_v24 = vsel %vm478_vm14, 1.0, %v1888_v0  ;;  %v2116_v34 = vmax.f32 %v417_v30, %v418_v11 }
  0x3e   : > { %v329_v39 = vadd.f32 %v1625_v27, %v328_v31  ;;  %1634 = vpow2.f32 %v440_v16  ;;  %vm457_vm15 = vcmp.eq.s32.totalorder %v2102_v35, 0  ;;  %v1627_v43 = vpop.eup %1626  ;;  %v2119_v38 = vadd.f32 %v473_v33, %v470_v37 }
  0x3f   : > { %vm459_vm0 = vcmp.eq.s32.totalorder %v2102_v35, 1  ;;  %vm461_vm1 = vcmp.eq.s32.totalorder %v2102_v35, 2  ;;  %v1629_v46 = vpop.eup %1628  ;;  %v421_v47 = vsub.f32 %v1431_v9, %v2116_v34  ;;  %v423_v48 = vsub.f32 %v1433_v23, %v2116_v34 }
  0x40   : > { %1636 = vlog2.f32 %v329_v39  ;;  %v425_v49 = vsub.f32 %v2089_v10, %v2116_v34  ;;  %v427_v50 = vsub.f32 %v2095_v26, %v2116_v34  ;;  %v2135_v52 = vadd.f32 %v399_v40, %v398_v32 }
  0x41   : > { %v444_v54 = vadd.f32 %v1629_v46, %v1627_v43  ;;  %vm463_vm2 = vcmp.eq.s32.totalorder %v2102_v35, 3  ;;  %v465_v55 = vsel %vm457_vm15, %v1431_v9, 0.0  ;;  %v430_v60 = vmul.f32 1.442695, %v421_v47 }
  0x42   : > { %v1631_v51 = vpop.eup %1630  ;;  %v434_v61 = vmul.f32 1.442695, %v423_v48  ;;  %v535_v62 = vmax.f32 %v2124_v44, %v2127_v45  ;;  %v438_v2 = vmul.f32 1.442695, %v425_v49  ;;  %v442_v3 = vmul.f32 1.442695, %v427_v50 }
  0x43   : > { %v1633_v58 = vpop.eup %1632  ;;  %v331_v59 = vmul.f32 0.6931472, %v1631_v51  ;;  %vm479_vm3 = vcmp.ne.s32.totalorder %v2102_v35, 255  ;;  %1638 = vpow2.f32 %v430_v60  ;;  %v536_v7 = vmax.f32 %v2141_v56, %v2144_v57 }
  0x44   : > { %v1635_v63 = vpop.eup %1634  ;;  %v445_v1 = vadd.f32 %v1633_v58, %v444_v54  ;;  %v1445_v6 = vsel %vm479_vm3, 1.0, %v1888_v0  ;;  %1640 = vpow2.f32 %v434_v61  ;;  %v467_v12 = vsel %vm459_vm0, %v1433_v23, 0.0 }
  0x45   : > { %v334_v4 = vadd.f32 %v331_v59, %v2028_v14  ;;  %v515_v13 = vadd.f32 %v1445_v6, %v1444_v24  ;;  %1642 = vpow2.f32 %v438_v2  ;;  %v2163_v17 = vmax.f32 %v535_v62, %v536_v7 }
  0x46   : > { %v1637_v8 = vpop.eup %1636  ;;  %v446_v9 = vadd.f32 %v1635_v63, %v445_v1  ;;  %v469_v18 = vsel %vm461_vm1, %v2089_v10, 0.0  ;;  %v2171_v19 = vsel %vm463_vm2, %v2095_v26, 0.0  ;;  %v475_v30 = vadd.f32 %v467_v12, %v465_v55 }
  0x47   : > { %v360_v14 = vsub.f32 %v334_v4, %v354_v36  ;;  %v333_v16 = vmul.f32 0.6931472, %v1637_v8  ;;  %v516_v20 = vrot.slane %v515_v13, 4  ;;  %v541_v27 = vsub.f32 %v2124_v44, %v2163_v17  ;;  %v2203_v4 = vld [vmem:[%s1988_s5 + $0x128] sm:$0xff] }
  0x48   : > { %1644 = vlog2.f32 %v446_v9  ;;  %v543_v28 = vsub.f32 %v2141_v56, %v2163_v17  ;;  %v545_v26 = vsub.f32 %v2127_v45, %v2163_v17  ;;  %vm579_vm7 = vcmp.eq.s32.totalorder %v2174_v21, 1 }
  0x49   : > { %v362_v22 = vsel %vm358_vm4, %v360_v14, 0.0  ;;  %v335_v23 = vadd.f32 %v333_v16, %v2042_v25  ;;  %1646 = vpow2.f32 %v442_v3  ;;  %v517_v10 = vadd.f32 %v516_v20, %v515_v13  ;;  %v1639_v29 = vpop.eup %1638  ;;  %v2217_v13 = vld [vmem:[%s1988_s5 + $0x1a8] sm:$0xff] }
  0x4a   : > { %364 = vst [vmem:[%s2161_s18] sm:$0xff] %v362_v22  ;;  %vm366_vm5 = vcmp.gt.f32.partialorder %v362_v22, 0.35667494  ;;  %v547_v25 = vsub.f32 %v2144_v57, %v2163_v17  ;;  %vm577_vm4 = vcmp.eq.s32.totalorder %v2174_v21, 0  ;;  %v1641_v31 = vpop.eup %1640  ;;  %v549_v36 = vmul.f32 1.442695, %v541_v27 }
  0x4b   : > { %v361_v5 = vsub.f32 %v335_v23, %v2111_v41  ;;  %v368_v32 = vsel %vm366_vm5, %v362_v22, 0.0  ;;  %v518_v33 = vrot.slane %v517_v10, 2  ;;  %v553_v37 = vmul.f32 1.442695, %v543_v28  ;;  %v1643_v11 = vpop.eup %1642  ;;  %v2227_v28 = vld [vmem:[%s1994_s11 + $0x28] sm:$0xff] }
  0x4c   : > { %v1426_v39 = vsel %vm366_vm5, 1.0, %v1888_v0  ;;  %v447_v24 = vadd.f32 %v1641_v31, %v1639_v29  ;;  %v557_v43 = vmul.f32 1.442695, %v545_v26  ;;  %1648 = vpow2.f32 %v549_v36 }
  0x4d   : > { %v363_v40 = vsel %vm359_vm8, %v361_v5, 0.0  ;;  %v519_v46 = vadd.f32 %v518_v33, %v517_v10  ;;  %v561_v47 = vmul.f32 1.442695, %v547_v25  ;;  %1650 = vpow2.f32 %v553_v37 }
  0x4e   : > { %v1645_v41 = vpop.eup %1644  ;;  %365 = vst [vmem:[%s2161_s18 + $0x8] sm:$0xff] %v363_v40  ;;  %vm367_vm6 = vcmp.gt.f32.partialorder %v363_v40, 0.35667494  ;;  %v448_v54 = vadd.f32 %v1643_v11, %v447_v24  ;;  %1652 = vpow2.f32 %v557_v43  ;;  %v476_v2 = vadd.f32 %v475_v30, %v469_v18 }
  0x4f   : > { %v1647_v48 = vpop.eup %1646  ;;  %v369_v49 = vsel %vm367_vm6, %v363_v40, 0.0  ;;  %v1427_v50 = vsel %vm367_vm6, 1.0, %v1888_v0  ;;  %v451_v51 = vmul.f32 0.6931472, %v1645_v41  ;;  %v520_v15 = vrot.slane %v519_v46, 1 }
  0x50   : > { %v370_v55 = vadd.f32 %v369_v49, %v368_v32  ;;  %v382_v58 = vadd.f32 %v1427_v50, %v1426_v39  ;;  %v449_v60 = vadd.f32 %v1647_v48, %v448_v54  ;;  %1654 = vpow2.f32 %v561_v47  ;;  %v2258_v48 = vld [vmem:[%s1988_s5 + $0x130] sm:$0xff] }
  0x51   : > { %v454_v59 = vadd.f32 %v451_v51, %v2077_v53  ;;  %v521_v63 = vadd.f32 %v520_v15, %v519_v46  ;;  %v585_v3 = vsel %vm577_vm4, %v2124_v44, 0.0  ;;  %v1447_v53 = vld [vmem:[%s1988_s5 + $0x28] sm:$0xff]  ;;  %v587_v12 = vsel %vm579_vm7, %v2141_v56, 0.0 }
  0x52   : > { %v371_v61 = vrot.slane %v370_v55, 4  ;;  %v383_v62 = vrot.slane %v382_v58, 4  ;;  %1656 = vlog2.f32 %v449_v60  ;;  %v1649_v6 = vpop.eup %1648  ;;  %vm581_vm8 = vcmp.eq.s32.totalorder %v2174_v21, 2  ;;  %v2214_v44 = vld [vmem:[%s1988_s5 + $0xa8] sm:$0xff]  ;;  %v2271_v60 = vld [vmem:[%s1988_s5 + $0x1b0] sm:$0xff] }
  0x53   : > { %v480_v1 = vsub.f32 %v454_v59, %v2119_v38  ;;  %v2206_v9 = vadd.f32 %v521_v63, %v2135_v52  ;;  %vm583_vm9 = vcmp.eq.s32.totalorder %v2174_v21, 3  ;;  %v1651_v14 = vpop.eup %1650  ;;  %v538_v52 = vmax.f32 %v1447_v53, %v2203_v4  ;;  %v1464_v59 = vld [vmem:[%s1988_s5 + $0xb0] sm:$0xff] }
  0x54   : > { %v372_v7 = vadd.f32 %v371_v61, %v370_v55  ;;  %v384_v8 = vadd.f32 %v383_v62, %v382_v58  ;;  %v1653_v56 = vpop.eup %1652  ;;  %v477_v42 = vadd.f32 %v476_v2, %v2171_v19  ;;  %v565_v20 = vadd.f32 %v1651_v14, %v1649_v6 }
  0x55   : > { %v482_v38 = vsel %vm478_vm14, %v480_v1, 0.0  ;;  %v593_v22 = vadd.f32 %v587_v12, %v585_v3  ;;  %v589_v10 = vsel %vm581_vm8, %v2127_v45, 0.0  ;;  %vm599_vm11 = vcmp.ne.s32.totalorder %v2174_v21, 255  ;;  %v2280_v12 = vld [vmem:[%s1994_s11 + $0x30] sm:$0xff] }
  0x56   : > { %v373_v16 = vrot.slane %v372_v7, 2  ;;  %v385_v18 = vrot.slane %v384_v8, 2  ;;  %1440 = vst [vmem:[%s2161_s18 + $0x10] sm:$0xff] %v482_v38  ;;  %vm487_vm10 = vcmp.gt.f32.partialorder %v482_v38, 0.35667494  ;;  %v1655_v23 = vpop.eup %1654  ;;  %v539_v26 = vmax.f32 %v2214_v44, %v2217_v13 }
  0x57   : > { %v489_v5 = vsel %vm487_vm10, %v482_v38, 0.0  ;;  %v566_v30 = vadd.f32 %v1653_v56, %v565_v20  ;;  %v591_v19 = vsel %vm583_vm9, %v2144_v57, 0.0  ;;  %v1460_v25 = vsel %vm599_vm11, 1.0, %v1888_v0 }
  0x58   : > { %v374_v27 = vadd.f32 %v373_v16, %v372_v7  ;;  %v1657_v29 = vpop.eup %1656  ;;  %v386_v45 = vadd.f32 %v385_v18, %v384_v8  ;;  %v1442_v31 = vsel %vm487_vm10, 1.0, %v1888_v0  ;;  %v2240_v33 = vmax.f32 %v538_v52, %v539_v26 }
  0x59   : > { %v453_v32 = vmul.f32 0.6931472, %v1657_v29  ;;  %v567_v36 = vadd.f32 %v1655_v23, %v566_v30  ;;  %v594_v37 = vadd.f32 %v593_v22, %v589_v10  ;;  %vm578_vm12 = vcmp.eq.s32.totalorder %v2227_v28, 0 }
  0x5a   : > { %vm580_vm13 = vcmp.eq.s32.totalorder %v2227_v28, 1  ;;  %v375_v57 = vrot.slane %v374_v27, 1  ;;  %v542_v39 = vsub.f32 %v1447_v53, %v2240_v33  ;;  %vm582_vm14 = vcmp.eq.s32.totalorder %v2227_v28, 2 }
  0x5b   : > { %v455_v11 = vadd.f32 %v453_v32, %v2116_v34  ;;  %1658 = vlog2.f32 %v567_v36  ;;  %v544_v40 = vsub.f32 %v2214_v44, %v2240_v33  ;;  %v546_v24 = vsub.f32 %v2203_v4, %v2240_v33  ;;  %v2255_v34 = vld [vmem:[%s1988_s5 + $0x30] sm:$0xff] }
  0x5c   : > { %v548_v43 = vsub.f32 %v2217_v13, %v2240_v33  ;;  %v387_v41 = vrot.slane %v386_v45, 1  ;;  %v551_v47 = vmul.f32 1.442695, %v542_v39  ;;  %vm584_vm15 = vcmp.eq.s32.totalorder %v2227_v28, 3 }
  0x5d   : > { %v481_v46 = vsub.f32 %v455_v11, %v477_v42  ;;  %v595_v49 = vadd.f32 %v594_v37, %v591_v19  ;;  %v555_v50 = vmul.f32 1.442695, %v544_v40  ;;  %v559_v51 = vmul.f32 1.442695, %v546_v24 }
  0x5e   : > { %v563_v54 = vmul.f32 1.442695, %v548_v43  ;;  %1660 = vpow2.f32 %v551_v47  ;;  %v586_v58 = vsel %vm578_vm12, %v1447_v53, 0.0  ;;  %vm600_vm0 = vcmp.ne.s32.totalorder %v2227_v28, 255 }
  0x5f   : > { %v483_v55 = vsel %vm479_vm3, %v481_v46, 0.0  ;;  %1662 = vpow2.f32 %v555_v50  ;;  %v1461_v15 = vsel %vm600_vm0, 1.0, %v1888_v0  ;;  %v656_v35 = vmax.f32 %v2255_v34, %v2258_v48 }
  0x60   : > { %1441 = vst [vmem:[%s2161_s18 + $0x18] sm:$0xff] %v483_v55  ;;  %vm488_vm1 = vcmp.gt.f32.partialorder %v483_v55, 0.35667494  ;;  %1664 = vpow2.f32 %v559_v51  ;;  %v636_v63 = vadd.f32 %v1461_v15, %v1460_v25  ;;  %v588_v53 = vsel %vm580_vm13, %v2214_v44, 0.0 }
  0x61   : > { %v490_v61 = vsel %vm488_vm1, %v483_v55, 0.0  ;;  %v1443_v62 = vsel %vm488_vm1, 1.0, %v1888_v0  ;;  %v1659_v1 = vpop.eup %1658  ;;  %1666 = vpow2.f32 %v563_v54  ;;  %v376_v6 = vadd.f32 %v375_v57, %v374_v27  ;;  %v2312_v55 = vld [vmem:[%s1988_s5 + $0x38] sm:$0xff] }
  0x62   : > { %v491_v2 = vadd.f32 %v490_v61, %v489_v5  ;;  %v503_v3 = vadd.f32 %v1443_v62, %v1442_v31  ;;  %v572_v7 = vmul.f32 0.6931472, %v1659_v1  ;;  %v637_v8 = vrot.slane %v636_v63, 4 }
  0x63   : > { %v657_v38 = vmax.f32 %v1464_v59, %v2271_v60  ;;  %v388_v14 = vadd.f32 %v387_v41, %v386_v45  ;;  %v590_v52 = vsel %vm582_vm14, %v2203_v4, 0.0  ;;  %v2290_v44 = vsel %vm584_vm15, %v2217_v13, 0.0 }
  0x64   : > { %v492_v16 = vrot.slane %v491_v2, 4  ;;  %v504_v18 = vrot.slane %v503_v3, 4  ;;  %v1661_v56 = vpop.eup %1660  ;;  %v575_v42 = vadd.f32 %v572_v7, %v2163_v17  ;;  %v638_v20 = vadd.f32 %v637_v8, %v636_v63 }
  0x65   : > { %v2292_v22 = vmax.f32 %v656_v35, %v657_v38  ;;  %v1663_v23 = vpop.eup %1662  ;;  %vm698_vm2 = vcmp.eq.s32.totalorder %v2280_v12, 0  ;;  %vm700_vm3 = vcmp.eq.s32.totalorder %v2280_v12, 1  ;;  %v596_v39 = vadd.f32 %v588_v53, %v586_v58  ;;  %v2319_v35 = vld [vmem:[%s1988_s5 + $0x138] sm:$0xff] }
  0x66   : > { %v493_v27 = vadd.f32 %v492_v16, %v491_v2  ;;  %v505_v10 = vadd.f32 %v504_v18, %v503_v3  ;;  %v1665_v26 = vpop.eup %1664  ;;  %v601_v4 = vsub.f32 %v575_v42, %v595_v49  ;;  %v568_v29 = vadd.f32 %v1663_v23, %v1661_v56  ;;  %v2340_v16 = vld [vmem:[%s1994_s11 + $0x38] sm:$0xff] }
  0x67   : > { %v639_v17 = vrot.slane %v638_v20, 2  ;;  %v662_v5 = vsub.f32 %v2255_v34, %v2292_v22  ;;  %v1667_v13 = vpop.eup %1666  ;;  %v664_v25 = vsub.f32 %v1464_v59, %v2292_v22  ;;  %v666_v45 = vsub.f32 %v2258_v48, %v2292_v22 }
  0x68   : > { %v494_v30 = vrot.slane %v493_v27, 2  ;;  %v506_v19 = vrot.slane %v505_v10, 2  ;;  %v603_v31 = vsel %vm599_vm11, %v601_v4, 0.0  ;;  %v569_v32 = vadd.f32 %v1665_v26, %v568_v29 }
  0x69   : > { %v640_v36 = vadd.f32 %v639_v17, %v638_v20  ;;  %v668_v37 = vsub.f32 %v2271_v60, %v2292_v22  ;;  %1456 = vst [vmem:[%s2161_s18 + $0x20] sm:$0xff] %v603_v31  ;;  %v670_v40 = vmul.f32 1.442695, %v662_v5  ;;  %v706_v41 = vsel %vm698_vm2, %v2255_v34, 0.0  ;;  %v2316_v34 = vld [vmem:[%s1988_s5 + $0xb8] sm:$0xff]  ;;  %v2360_v17 = vld [vmem:[%s1988_s5 + $0x40] sm:$0xff] }
  0x6a   : > { %v495_v57 = vadd.f32 %v494_v30, %v493_v27  ;;  %v507_v11 = vadd.f32 %v506_v19, %v505_v10  ;;  %v570_v24 = vadd.f32 %v1667_v13, %v569_v32  ;;  %v708_v21 = vsel %vm700_vm3, %v1464_v59, 0.0  ;;  %v2322_v59 = vld [vmem:[%s1988_s5 + $0x1b8] sm:$0xff]  ;;  %v2363_v5 = vld [vmem:[%s1988_s5 + $0xc0] sm:$0xff] }
  0x6b   : > { %v641_v43 = vrot.slane %v640_v36, 1  ;;  %1668 = vpow2.f32 %v670_v40  ;;  %v674_v49 = vmul.f32 1.442695, %v664_v25  ;;  %v678_v51 = vmul.f32 1.442695, %v666_v45  ;;  %v2366_v13 = vld [vmem:[%s1988_s5 + $0x140] sm:$0xff] }
  0x6c   : > { %v496_v46 = vrot.slane %v495_v57, 1  ;;  %v508_v47 = vrot.slane %v507_v11, 1  ;;  %1670 = vlog2.f32 %v570_v24  ;;  %v682_v54 = vmul.f32 1.442695, %v668_v37 }
  0x6d   : > { %v642_v50 = vadd.f32 %v641_v43, %v640_v36  ;;  %1672 = vpow2.f32 %v674_v49  ;;  %vm702_vm5 = vcmp.eq.s32.totalorder %v2280_v12, 2  ;;  %vm608_vm4 = vcmp.gt.f32.partialorder %v603_v31, 0.35667494 }
  0x6e   : > { %v497_v58 = vadd.f32 %v496_v46, %v495_v57  ;;  %v509_v15 = vadd.f32 %v508_v47, %v507_v11  ;;  %v597_v61 = vadd.f32 %v596_v39, %v590_v52  ;;  %1674 = vpow2.f32 %v678_v51 }
  0x6f   : > { %v2325_v62 = vadd.f32 %v642_v50, %v2206_v9  ;;  %1676 = vpow2.f32 %v682_v54  ;;  %v714_v2 = vadd.f32 %v708_v21, %v706_v41  ;;  %vm704_vm6 = vcmp.eq.s32.totalorder %v2280_v12, 3 }
  0x70   : > { %v2327_v63 = vadd.f32 %v497_v58, %v376_v6  ;;  %v2329_v1 = vadd.f32 %v509_v15, %v388_v14  ;;  %v710_v3 = vsel %vm702_vm5, %v2258_v48, 0.0  ;;  %v659_v53 = vmax.f32 %v2312_v55, %v2319_v35 }
  0x71   : > { %v660_v7 = vmax.f32 %v2316_v34, %v2322_v59  ;;  %v1669_v8 = vpop.eup %1668  ;;  %v610_v38 = vsel %vm608_vm4, %v603_v31, 0.0  ;;  %v1458_v6 = vsel %vm608_vm4, 1.0, %v1888_v0  ;;  %v598_v14 = vadd.f32 %v597_v61, %v2290_v44 }
  0x72   : > { %v1671_v9 = vpop.eup %1670  ;;  %v712_v56 = vsel %vm704_vm6, %v2271_v60, 0.0  ;;  %v715_v42 = vadd.f32 %v714_v2, %v710_v3  ;;  %vm720_vm7 = vcmp.ne.s32.totalorder %v2280_v12, 255  ;;  %vm699_vm8 = vcmp.eq.s32.totalorder %v2340_v16, 0 }
  0x73   : > { %v2342_v18 = vmax.f32 %v659_v53, %v660_v7  ;;  %v1673_v52 = vpop.eup %1672  ;;  %v574_v48 = vmul.f32 0.6931472, %v1671_v9  ;;  %v1476_v60 = vsel %vm720_vm7, 1.0, %v1888_v0  ;;  %vm721_vm9 = vcmp.ne.s32.totalorder %v2340_v16, 255 }
  0x74   : > { %v1675_v20 = vpop.eup %1674  ;;  %v686_v23 = vadd.f32 %v1673_v52, %v1669_v8  ;;  %v1477_v36 = vsel %vm721_vm9, 1.0, %v1888_v0  ;;  %v777_v11 = vmax.f32 %v2360_v17, %v2366_v13  ;;  %vm701_vm10 = vcmp.eq.s32.totalorder %v2340_v16, 1 }
  0x75   : > { %v663_v44 = vsub.f32 %v2312_v55, %v2342_v18  ;;  %v665_v27 = vsub.f32 %v2316_v34, %v2342_v18  ;;  %v667_v10 = vsub.f32 %v2319_v35, %v2342_v18  ;;  %v1677_v26 = vpop.eup %1676  ;;  %v576_v4 = vadd.f32 %v574_v48, %v2240_v33  ;;  %v2370_v33 = vld [vmem:[%s1988_s5 + $0x1c0] sm:$0xff] }
  0x76   : > { %v669_v29 = vsub.f32 %v2322_v59, %v2342_v18  ;;  %v687_v30 = vadd.f32 %v1675_v20, %v686_v23  ;;  %v757_v57 = vadd.f32 %v1477_v36, %v1476_v60  ;;  %v778_v40 = vmax.f32 %v2363_v5, %v2370_v33  ;;  %v2413_v36 = vld [vmem:[%s1994_s11 + $0x40] sm:$0xff] }
  0x77   : > { %v672_v19 = vmul.f32 1.442695, %v663_v44  ;;  %v676_v25 = vmul.f32 1.442695, %v665_v27  ;;  %v602_v45 = vsub.f32 %v576_v4, %v598_v14  ;;  %v680_v31 = vmul.f32 1.442695, %v667_v10 }
  0x78   : > { %v684_v32 = vmul.f32 1.442695, %v669_v29  ;;  %v688_v37 = vadd.f32 %v1677_v26, %v687_v30  ;;  %vm703_vm12 = vcmp.eq.s32.totalorder %v2340_v16, 2  ;;  %v758_v24 = vrot.slane %v757_v57, 4 }
  0x79   : > { %1678 = vpow2.f32 %v672_v19  ;;  %v604_v39 = vsel %vm600_vm0, %v602_v45, 0.0  ;;  %v2385_v21 = vmax.f32 %v777_v11, %v778_v40  ;;  %v716_v49 = vadd.f32 %v715_v42, %v712_v56  ;;  %v2406_v45 = vld [vmem:[%s1988_s5 + $0x48] sm:$0xff] }
  0x7a   : > { %1680 = vpow2.f32 %v676_v25  ;;  %1457 = vst [vmem:[%s2161_s18 + $0x28] sm:$0xff] %v604_v39  ;;  %vm609_vm11 = vcmp.gt.f32.partialorder %v604_v39, 0.35667494  ;;  %v759_v47 = vadd.f32 %v758_v24, %v757_v57  ;;  %v707_v2 = vsel %vm699_vm8, %v2312_v55, 0.0  ;;  %v2419_v11 = vld [vmem:[%s1988_s5 + $0xc8] sm:$0xff] }
  0x7b   : > { %1682 = vlog2.f32 %v688_v37  ;;  %v611_v43 = vsel %vm609_vm11, %v604_v39, 0.0  ;;  %v1459_v41 = vsel %vm609_vm11, 1.0, %v1888_v0  ;;  %v783_v50 = vsub.f32 %v2360_v17, %v2385_v21  ;;  %v2422_v39 = vld [vmem:[%s1988_s5 + $0x1c8] sm:$0xff] }
  0x7c   : > { %1684 = vpow2.f32 %v680_v31  ;;  %v612_v28 = vadd.f32 %v611_v43, %v610_v38  ;;  %v624_v46 = vadd.f32 %v1459_v41, %v1458_v6  ;;  %v785_v51 = vsub.f32 %v2363_v5, %v2385_v21  ;;  %v2409_v31 = vld [vmem:[%s1988_s5 + $0x148] sm:$0xff] }
  0x7d   : > { %1686 = vpow2.f32 %v684_v32  ;;  %v787_v54 = vsub.f32 %v2366_v13, %v2385_v21  ;;  %v760_v3 = vrot.slane %v759_v47, 2  ;;  %v709_v7 = vsel %vm701_vm10, %v2316_v34, 0.0 }
  0x7e   : > { %v613_v15 = vrot.slane %v612_v28, 4  ;;  %v625_v61 = vrot.slane %v624_v46, 4  ;;  %v789_v8 = vsub.f32 %v2370_v33, %v2385_v21  ;;  %v791_v9 = vmul.f32 1.442695, %v783_v50 }
  0x7f   : > { %v1679_v58 = vpop.eup %1678  ;;  %v795_v38 = vmul.f32 1.442695, %v785_v51  ;;  %v761_v56 = vadd.f32 %v760_v3, %v759_v47  ;;  %v711_v55 = vsel %vm703_vm12, %v2319_v35, 0.0  ;;  %v799_v34 = vmul.f32 1.442695, %v787_v54 }
  0x80   : > { %v1681_v53 = vpop.eup %1680  ;;  %v614_v14 = vadd.f32 %v613_v15, %v612_v28  ;;  %v626_v52 = vadd.f32 %v625_v61, %v624_v46  ;;  %1688 = vpow2.f32 %v791_v9  ;;  %v717_v60 = vadd.f32 %v709_v7, %v707_v2  ;;  %v2455_v7 = vld [vmem:[%s1988_s5 + $0x50] sm:$0xff] }
  0x81   : > { %v1683_v6 = vpop.eup %1682  ;;  %v689_v48 = vadd.f32 %v1681_v53, %v1679_v58  ;;  %v762_v26 = vrot.slane %v761_v56, 1  ;;  %1690 = vpow2.f32 %v795_v38  ;;  %v803_v29 = vmul.f32 1.442695, %v789_v8 }
  0x82   : > { %v1685_v42 = vpop.eup %1684  ;;  %v693_v20 = vmul.f32 0.6931472, %v1683_v6  ;;  %v615_v44 = vrot.slane %v614_v14, 2  ;;  %v627_v27 = vrot.slane %v626_v52, 2  ;;  %vm705_vm13 = vcmp.eq.s32.totalorder %v2340_v16, 3 }
  0x83   : > { %v1687_v23 = vpop.eup %1686  ;;  %v690_v10 = vadd.f32 %v1685_v42, %v689_v48  ;;  %v763_v25 = vadd.f32 %v762_v26, %v761_v56  ;;  %1692 = vpow2.f32 %v799_v34  ;;  %v718_v43 = vadd.f32 %v717_v60, %v711_v55  ;;  %v2467_v48 = vld [vmem:[%s1988_s5 + $0x1d0] sm:$0xff] }
  0x84   : > { %v696_v4 = vadd.f32 %v693_v20, %v2292_v22  ;;  %v616_v30 = vadd.f32 %v615_v44, %v614_v14  ;;  %v628_v19 = vadd.f32 %v627_v27, %v626_v52  ;;  %v780_v41 = vmax.f32 %v2406_v45, %v2409_v31  ;;  %v2461_v14 = vld [vmem:[%s1988_s5 + $0xd0] sm:$0xff] }
  0x85   : > { %v691_v35 = vadd.f32 %v1687_v23, %v690_v10  ;;  %v2416_v57 = vadd.f32 %v763_v25, %v2325_v62  ;;  %vm819_vm14 = vcmp.eq.s32.totalorder %v2413_v36, 0  ;;  %vm821_vm15 = vcmp.eq.s32.totalorder %v2413_v36, 1  ;;  %v2464_v52 = vld [vmem:[%s1988_s5 + $0x150] sm:$0xff]  ;;  %v2476_v10 = vld [vmem:[%s1994_s11 + $0x48] sm:$0xff] }
  0x86   : > { %v722_v32 = vsub.f32 %v696_v4, %v716_v49  ;;  %v617_v22 = vrot.slane %v616_v30, 1  ;;  %v629_v37 = vrot.slane %v628_v19, 1  ;;  %v1689_v40 = vpop.eup %1688  ;;  %v713_v47 = vsel %vm705_vm13, %v2322_v59, 0.0 }
  0x87   : > { %1694 = vlog2.f32 %v691_v35  ;;  %v1691_v62 = vpop.eup %1690  ;;  %v781_v12 = vmax.f32 %v2419_v11, %v2422_v39  ;;  %vm823_vm0 = vcmp.eq.s32.totalorder %v2413_v36, 2  ;;  %v827_v58 = vsel %vm819_vm14, %v2360_v17, 0.0 }
  0x88   : > { %v724_v24 = vsel %vm720_vm7, %v722_v32, 0.0  ;;  %1696 = vpow2.f32 %v803_v29  ;;  %v618_v28 = vadd.f32 %v617_v22, %v616_v30  ;;  %v630_v46 = vadd.f32 %v629_v37, %v628_v19 }
  0x89   : > { %1472 = vst [vmem:[%s2161_s18 + $0x30] sm:$0xff] %v724_v24  ;;  %v807_v51 = vadd.f32 %v1691_v62, %v1689_v40  ;;  %v1693_v54 = vpop.eup %1692  ;;  %v829_v15 = vsel %vm821_vm15, %v2363_v5, 0.0  ;;  %v2445_v59 = vmax.f32 %v780_v41, %v781_v12  ;;  %vm825_vm1 = vcmp.eq.s32.totalorder %v2413_v36, 3 }
  0x8a   : > { %v2437_v49 = vadd.f32 %v618_v28, %v2327_v63  ;;  %v2440_v50 = vadd.f32 %v630_v46, %v2329_v1  ;;  %v719_v63 = vadd.f32 %v718_v43, %v713_v47  ;;  %v831_v9 = vsel %vm823_vm0, %v2366_v13, 0.0 }
  0x8b   : > { %v808_v2 = vadd.f32 %v1693_v54, %v807_v51  ;;  %v784_v53 = vsub.f32 %v2406_v45, %v2445_v59  ;;  %v786_v17 = vsub.f32 %v2419_v11, %v2445_v59  ;;  %v788_v5 = vsub.f32 %v2409_v31, %v2445_v59 }
  0x8c   : > { %v835_v38 = vadd.f32 %v829_v15, %v827_v58  ;;  %v790_v6 = vsub.f32 %v2422_v39, %v2445_v59  ;;  %vm729_vm2 = vcmp.gt.f32.partialorder %v724_v24, 0.35667494  ;;  %v898_v23 = vmax.f32 %v2455_v7, %v2464_v52 }
  0x8d   : > { %v1695_v61 = vpop.eup %1694  ;;  %v793_v42 = vmul.f32 1.442695, %v784_v53  ;;  %v797_v20 = vmul.f32 1.442695, %v786_v17  ;;  %v801_v55 = vmul.f32 1.442695, %v788_v5 }
  0x8e   : > { %v1697_v1 = vpop.eup %1696  ;;  %v695_v3 = vmul.f32 0.6931472, %v1695_v61  ;;  %v805_v13 = vmul.f32 1.442695, %v790_v6  ;;  %v833_v44 = vsel %vm825_vm1, %v2370_v33, 0.0  ;;  %v836_v27 = vadd.f32 %v835_v38, %v831_v9 }
  0x8f   : > { %v809_v8 = vadd.f32 %v1697_v1, %v808_v2  ;;  %v731_v26 = vsel %vm729_vm2, %v724_v24, 0.0  ;;  %v1474_v4 = vsel %vm729_vm2, 1.0, %v1888_v0  ;;  %vm841_vm5 = vcmp.ne.s32.totalorder %v2413_v36, 255 }
  0x90   : > { %v697_v56 = vadd.f32 %v695_v3, %v2342_v18  ;;  %v899_v18 = vmax.f32 %v2461_v14, %v2467_v48  ;;  %vm820_vm4 = vcmp.eq.s32.totalorder %v2476_v10, 0  ;;  %v837_v32 = vadd.f32 %v836_v27, %v833_v44 }
  0x91   : > { %1698 = vlog2.f32 %v809_v8  ;;  %vm822_vm6 = vcmp.eq.s32.totalorder %v2476_v10, 1  ;;  %v828_v46 = vsel %vm820_vm4, %v2406_v45, 0.0  ;;  %vm824_vm7 = vcmp.eq.s32.totalorder %v2476_v10, 2 }
  0x92   : > { %v723_v34 = vsub.f32 %v697_v56, %v719_v63  ;;  %1700 = vpow2.f32 %v793_v42  ;;  %v2487_v30 = vmax.f32 %v898_v23, %v899_v18  ;;  %v830_v2 = vsel %vm822_vm6, %v2419_v11, 0.0  ;;  %v2512_v56 = vld [vmem:[%s1994_s11 + $0x50] sm:$0xff]  ;;  %v2515_v42 = vld [vmem:[%s1988_s5 + $0x58] sm:$0xff] }
  0x93   : > { %1702 = vpow2.f32 %v797_v20  ;;  %v838_v8 = vadd.f32 %v830_v2, %v828_v46  ;;  %v832_v6 = vsel %vm824_vm7, %v2409_v31, 0.0  ;;  %v2518_v20 = vld [vmem:[%s1988_s5 + $0x158] sm:$0xff]  ;;  %vm826_vm8 = vcmp.eq.s32.totalorder %v2476_v10, 3 }
  0x94   : > { %v725_v60 = vsel %vm721_vm9, %v723_v34, 0.0  ;;  %1704 = vpow2.f32 %v801_v55  ;;  %v904_v37 = vsub.f32 %v2455_v7, %v2487_v30  ;;  %v906_v40 = vsub.f32 %v2461_v14, %v2487_v30  ;;  %v2522_v34 = vld [vmem:[%s1988_s5 + $0xd8] sm:$0xff] }
  0x95   : > { %1473 = vst [vmem:[%s2161_s18 + $0x38] sm:$0xff] %v725_v60  ;;  %vm730_vm3 = vcmp.gt.f32.partialorder %v725_v60, 0.35667494  ;;  %1706 = vpow2.f32 %v805_v13  ;;  %v908_v24 = vsub.f32 %v2464_v52, %v2487_v30  ;;  %v910_v62 = vsub.f32 %v2467_v48, %v2487_v30  ;;  %v2525_v23 = vld [vmem:[%s1988_s5 + $0x1d8] sm:$0xff] }
  0x96   : > { %v732_v33 = vsel %vm730_vm3, %v725_v60, 0.0  ;;  %v1475_v29 = vsel %vm730_vm3, 1.0, %v1888_v0  ;;  %v912_v54 = vmul.f32 1.442695, %v904_v37  ;;  %v916_v58 = vmul.f32 1.442695, %v906_v40 }
  0x97   : > { %v1699_v19 = vpop.eup %1698  ;;  %v733_v35 = vadd.f32 %v732_v33, %v731_v26  ;;  %v745_v25 = vadd.f32 %v1475_v29, %v1474_v4  ;;  %v920_v1 = vmul.f32 1.442695, %v908_v24  ;;  %v924_v17 = vmul.f32 1.442695, %v910_v62 }
  0x98   : > { %v1701_v16 = vpop.eup %1700  ;;  %v814_v22 = vmul.f32 0.6931472, %v1699_v19  ;;  %1708 = vpow2.f32 %v912_v54  ;;  %v2530_v31 = vsel %vm841_vm5, 1.0, %v1888_v0  ;;  %v839_v27 = vadd.f32 %v838_v8, %v832_v6  ;;  %v2579_v54 = vld [vmem:[%s1988_s5 + $0x160] sm:$0xff] }
  0x99   : > { %v1703_v43 = vpop.eup %1702  ;;  %v734_v41 = vrot.slane %v733_v35, 4  ;;  %v746_v28 = vrot.slane %v745_v25, 4  ;;  %1710 = vpow2.f32 %v916_v58  ;;  %vm940_vm9 = vcmp.eq.s32.totalorder %v2512_v56, 0  ;;  %v2582_v58 = vld [vmem:[%s1988_s5 + $0x1e0] sm:$0xff] }
  0x9a   : > { %v1705_v47 = vpop.eup %1704  ;;  %v817_v12 = vadd.f32 %v814_v22, %v2385_v21  ;;  %v810_v51 = vadd.f32 %v1703_v43, %v1701_v16  ;;  %1712 = vpow2.f32 %v920_v1  ;;  %vm942_vm10 = vcmp.eq.s32.totalorder %v2512_v56, 1  ;;  %v2591_v1 = vld [vmem:[%s1994_s11 + $0x58] sm:$0xff] }
  0x9b   : > { %v1707_v15 = vpop.eup %1706  ;;  %v735_v61 = vadd.f32 %v734_v41, %v733_v35  ;;  %v747_v63 = vadd.f32 %v746_v28, %v745_v25  ;;  %v901_v60 = vmax.f32 %v2515_v42, %v2518_v20  ;;  %v834_v29 = vsel %vm826_vm8, %v2422_v39, 0.0  ;;  %v2567_v28 = vld [vmem:[%s1988_s5 + $0x60] sm:$0xff] }
  0x9c   : > { %v843_v3 = vsub.f32 %v817_v12, %v837_v32  ;;  %v811_v45 = vadd.f32 %v1705_v47, %v810_v51  ;;  %vm842_vm11 = vcmp.ne.s32.totalorder %v2476_v10, 255  ;;  %v902_v36 = vmax.f32 %v2522_v34, %v2525_v23  ;;  %v2576_v51 = vld [vmem:[%s1988_s5 + $0xe0] sm:$0xff] }
  0x9d   : > { %v736_v21 = vrot.slane %v735_v61, 2  ;;  %v748_v53 = vrot.slane %v747_v63, 2  ;;  %v2549_v32 = vsel %vm842_vm11, 1.0, %v1888_v0  ;;  %vm944_vm12 = vcmp.eq.s32.totalorder %v2512_v56, 2 }
  0x9e   : > { %v2506_v5 = vsel %vm841_vm5, %v843_v3, 0.0  ;;  %v812_v11 = vadd.f32 %v1707_v15, %v811_v45  ;;  %v1709_v44 = vpop.eup %1708  ;;  %v948_v22 = vsel %vm940_vm9, %v2455_v7, 0.0  ;;  %v2556_v37 = vmax.f32 %v901_v60, %v902_v36 }
  0x9f   : > { %v737_v9 = vadd.f32 %v736_v21, %v735_v61  ;;  %v749_v38 = vadd.f32 %v748_v53, %v747_v63  ;;  %1488 = vst [vmem:[%s2161_s18 + $0x40] sm:$0xff] %v2506_v5  ;;  %v1711_v18 = vpop.eup %1710  ;;  %vm850_vm13 = vcmp.gt.f32.partialorder %v2506_v5, 0.35667494  ;;  %v840_v24 = vadd.f32 %v839_v27, %v834_v29 }
  0xa0   : > { %1714 = vlog2.f32 %v812_v11  ;;  %v1713_v33 = vpop.eup %1712  ;;  %v928_v19 = vadd.f32 %v1711_v18, %v1709_v44  ;;  %vm946_vm14 = vcmp.eq.s32.totalorder %v2512_v56, 3  ;;  %v905_v41 = vsub.f32 %v2515_v42, %v2556_v37 }
  0xa1   : > { %v738_v55 = vrot.slane %v737_v9, 1  ;;  %v750_v13 = vrot.slane %v749_v38, 1  ;;  %1716 = vpow2.f32 %v924_v17  ;;  %v907_v7 = vsub.f32 %v2522_v34, %v2556_v37 }
  0xa2   : > { %v929_v16 = vadd.f32 %v1713_v33, %v928_v19  ;;  %v952_v62 = vsel %vm944_vm12, %v2464_v52, 0.0  ;;  %v911_v12 = vsub.f32 %v2525_v23, %v2556_v37  ;;  %v914_v15 = vmul.f32 1.442695, %v905_v41 }
  0xa3   : > { %v739_v26 = vadd.f32 %v738_v55, %v737_v9  ;;  %v751_v4 = vadd.f32 %v750_v13, %v749_v38  ;;  %v918_v61 = vmul.f32 1.442695, %v907_v7  ;;  %v1490_v52 = vsel %vm850_vm13, 1.0, %v1888_v0 }
  0xa4   : > { %v926_v3 = vmul.f32 1.442695, %v911_v12  ;;  %v954_v45 = vsel %vm946_vm14, %v2467_v48, 0.0  ;;  %v1019_v21 = vmax.f32 %v2567_v28, %v2579_v54  ;;  %v1020_v53 = vmax.f32 %v2576_v51, %v2582_v58 }
  0xa5   : > { %v2541_v35 = vadd.f32 %v739_v26, %v2437_v49  ;;  %v2544_v25 = vadd.f32 %v751_v4, %v2440_v50  ;;  %v950_v49 = vsel %vm942_vm10, %v2461_v14, 0.0  ;;  %v909_v14 = vsub.f32 %v2518_v20, %v2556_v37 }
  0xa6   : > { %v1715_v39 = vpop.eup %1714  ;;  %v956_v47 = vadd.f32 %v950_v49, %v948_v22  ;;  %vm962_vm15 = vcmp.ne.s32.totalorder %v2512_v56, 255  ;;  %vm941_vm1 = vcmp.eq.s32.totalorder %v2591_v1, 0  ;;  %v2605_v48 = vmax.f32 %v1019_v21, %v1020_v53  ;;  %v2649_v21 = vld [vmem:[%s1988_s5 + $0x168] sm:$0xff] }
  0xa7   : > { %v1717_v50 = vpop.eup %1716  ;;  %v816_v40 = vmul.f32 0.6931472, %v1715_v39  ;;  %v922_v63 = vmul.f32 1.442695, %v909_v14  ;;  %vm943_vm2 = vcmp.eq.s32.totalorder %v2591_v1, 1  ;;  %vm945_vm3 = vcmp.eq.s32.totalorder %v2591_v1, 2 }
  0xa8   : > { %v930_v43 = vadd.f32 %v1717_v50, %v929_v16  ;;  %v1025_v6 = vsub.f32 %v2567_v28, %v2605_v48  ;;  %v1027_v55 = vsub.f32 %v2576_v51, %v2605_v48  ;;  %v1029_v27 = vsub.f32 %v2579_v54, %v2605_v48  ;;  %v2652_v53 = vld [vmem:[%s1988_s5 + $0x1e8] sm:$0xff] }
  0xa9   : > { %v818_v46 = vadd.f32 %v816_v40, %v2445_v59  ;;  %v852_v59 = vsel %vm850_vm13, %v2506_v5, 0.0  ;;  %v957_v5 = vadd.f32 %v956_v47, %v952_v62  ;;  %v1031_v18 = vsub.f32 %v2582_v58, %v2605_v48  ;;  %v2626_v62 = vld [vmem:[%s1994_s11 + $0x60] sm:$0xff] }
  0xaa   : > { %1718 = vlog2.f32 %v930_v43  ;;  %v1033_v33 = vmul.f32 1.442695, %v1025_v6  ;;  %v1037_v29 = vmul.f32 1.442695, %v1027_v55  ;;  %v1041_v39 = vmul.f32 1.442695, %v1029_v27 }
  0xab   : > { %v844_v2 = vsub.f32 %v818_v46, %v840_v24  ;;  %1720 = vpow2.f32 %v914_v15  ;;  %v958_v44 = vadd.f32 %v957_v5, %v954_v45  ;;  %v1045_v16 = vmul.f32 1.442695, %v1031_v18  ;;  %v2646_v45 = vld [vmem:[%s1988_s5 + $0xe8] sm:$0xff] }
  0xac   : > { %1722 = vpow2.f32 %v918_v61  ;;  %v949_v41 = vsel %vm941_vm1, %v2515_v42, 0.0  ;;  %vm947_vm5 = vcmp.eq.s32.totalorder %v2591_v1, 3  ;;  %v878_v61 = vadd.f32 %v2549_v32, %v2530_v31 }
  0xad   : > { %v846_v17 = vsel %vm842_vm11, %v844_v2, 0.0  ;;  %1724 = vpow2.f32 %v922_v63  ;;  %v953_v63 = vsel %vm945_vm3, %v2518_v20, 0.0  ;;  %vm1061_vm4 = vcmp.eq.s32.totalorder %v2626_v62, 0 }
  0xae   : > { %1489 = vst [vmem:[%s2161_s18 + $0x48] sm:$0xff] %v846_v17  ;;  %vm851_vm0 = vcmp.gt.f32.partialorder %v846_v17, 0.35667494  ;;  %1726 = vpow2.f32 %v926_v3  ;;  %vm1063_vm6 = vcmp.eq.s32.totalorder %v2626_v62, 1  ;;  %v955_v20 = vsel %vm947_vm5, %v2525_v23, 0.0 }
  0xaf   : > { %v853_v11 = vsel %vm851_vm0, %v846_v17, 0.0  ;;  %v1491_v8 = vsel %vm851_vm0, 1.0, %v1888_v0  ;;  %1728 = vpow2.f32 %v1033_v33  ;;  %v1023_v55 = vmax.f32 %v2646_v45, %v2652_v53 }
  0xb0   : > { %v1719_v9 = vpop.eup %1718  ;;  %v854_v10 = vadd.f32 %v853_v11, %v852_v59  ;;  %v866_v38 = vadd.f32 %v1491_v8, %v1490_v52  ;;  %1730 = vpow2.f32 %v1037_v29  ;;  %v2642_v59 = vld [vmem:[%s1988_s5 + $0x68] sm:$0xff]  ;;  %vm963_vm7 = vcmp.ne.s32.totalorder %v2591_v1, 255 }
  0xb1   : > { %v935_v13 = vmul.f32 0.6931472, %v1719_v9  ;;  %v1721_v26 = vpop.eup %1720  ;;  %1732 = vpow2.f32 %v1041_v39  ;;  %v1022_v6 = vmax.f32 %v2642_v59, %v2649_v21  ;;  %vm1065_vm8 = vcmp.eq.s32.totalorder %v2626_v62, 2 }
  0xb2   : > { %v855_v4 = vrot.slane %v854_v10, 4  ;;  %v867_v60 = vrot.slane %v866_v38, 4  ;;  %v1723_v19 = vpop.eup %1722  ;;  %1734 = vpow2.f32 %v1045_v16  ;;  %vm1067_vm9 = vcmp.eq.s32.totalorder %v2626_v62, 3 }
  0xb3   : > { %v938_v36 = vadd.f32 %v935_v13, %v2487_v30  ;;  %v1725_v22 = vpop.eup %1724  ;;  %v931_v40 = vadd.f32 %v1723_v19, %v1721_v26  ;;  %v951_v30 = vsel %vm943_vm2, %v2522_v34, 0.0  ;;  %v2688_v19 = vld [vmem:[%s1988_s5 + $0x70] sm:$0xff]  ;;  %v1073_v39 = vsel %vm1065_vm8, %v2579_v54, 0.0 }
  0xb4   : > { %v856_v49 = vadd.f32 %v855_v4, %v854_v10  ;;  %v868_v50 = vadd.f32 %v867_v60, %v866_v38  ;;  %v1727_v24 = vpop.eup %1726  ;;  %v959_v15 = vadd.f32 %v951_v30, %v949_v41  ;;  %v1069_v10 = vsel %vm1061_vm4, %v2567_v28, 0.0 }
  0xb5   : > { %v964_v43 = vsub.f32 %v938_v36, %v958_v44  ;;  %v932_v46 = vadd.f32 %v1725_v22, %v931_v40  ;;  %v1729_v52 = vpop.eup %1728  ;;  %v1071_v38 = vsel %vm1063_vm6, %v2576_v51, 0.0  ;;  %v879_v44 = vrot.slane %v878_v61, 4  ;;  %v2691_v36 = vld [vmem:[%s1988_s5 + $0x170] sm:$0xff] }
  0xb6   : > { %v857_v7 = vrot.slane %v856_v49, 2  ;;  %v869_v14 = vrot.slane %v868_v50, 2  ;;  %v1731_v31 = vpop.eup %1730  ;;  %v960_v11 = vadd.f32 %v959_v15, %v953_v63  ;;  %v1508_v28 = vsel %vm962_vm15, 1.0, %v1888_v0  ;;  %v2698_v22 = vld [vmem:[%s1988_s5 + $0xf0] sm:$0xff] }
  0xb7   : > { %v2630_v47 = vsel %vm962_vm15, %v964_v43, 0.0  ;;  %v933_v12 = vadd.f32 %v1727_v24, %v932_v46  ;;  %v1733_v32 = vpop.eup %1732  ;;  %v1049_v8 = vadd.f32 %v1731_v31, %v1729_v52  ;;  %v2676_v51 = vmax.f32 %v1022_v6, %v1023_v55  ;;  %v2707_v46 = vld [vmem:[%s1994_s11 + $0x68] sm:$0xff] }
  0xb8   : > { %v858_v42 = vadd.f32 %v857_v7, %v856_v49  ;;  %v870_v34 = vadd.f32 %v869_v14, %v868_v50  ;;  %1504 = vst [vmem:[%s2161_s18 + $0x50] sm:$0xff] %v2630_v47  ;;  %v1735_v9 = vpop.eup %1734  ;;  %v961_v18 = vadd.f32 %v960_v11, %v955_v20  ;;  %v1077_v4 = vadd.f32 %v1071_v38, %v1069_v10  ;;  %v2701_v49 = vld [vmem:[%s1988_s5 + $0x1f0] sm:$0xff] }
  0xb9   : > { %1736 = vlog2.f32 %v933_v12  ;;  %v1050_v27 = vadd.f32 %v1733_v32, %v1049_v8  ;;  %v1026_v56 = vsub.f32 %v2642_v59, %v2676_v51  ;;  %v1028_v33 = vsub.f32 %v2646_v45, %v2676_v51 }
  0xba   : > { %v859_v2 = vrot.slane %v858_v42, 1  ;;  %v871_v3 = vrot.slane %v870_v34, 1  ;;  %v1030_v29 = vsub.f32 %v2649_v21, %v2676_v51  ;;  %v1032_v16 = vsub.f32 %v2652_v53, %v2676_v51 }
  0xbb   : > { %v1051_v26 = vadd.f32 %v1735_v9, %v1050_v27  ;;  %v1035_v40 = vmul.f32 1.442695, %v1026_v56  ;;  %v1039_v24 = vmul.f32 1.442695, %v1028_v33  ;;  %v880_v41 = vadd.f32 %v879_v44, %v878_v61  ;;  %v2755_v56 = vld [vmem:[%s1994_s11 + $0x70] sm:$0xff] }
  0xbc   : > { %v860_v17 = vadd.f32 %v859_v2, %v858_v42  ;;  %v872_v5 = vadd.f32 %v871_v3, %v870_v34  ;;  %v1043_v43 = vmul.f32 1.442695, %v1030_v29  ;;  %v1047_v30 = vmul.f32 1.442695, %v1032_v16  ;;  %v2763_v16 = vld [vmem:[%s1988_s5 + $0x178] sm:$0xff] }
  0xbd   : > { %1738 = vlog2.f32 %v1051_v26  ;;  %v1140_v7 = vmax.f32 %v2688_v19, %v2691_v36  ;;  %v1078_v54 = vadd.f32 %v1077_v4, %v1073_v39  ;;  %v1141_v42 = vmax.f32 %v2698_v22, %v2701_v49 }
  0xbe   : > { %v2666_v23 = vadd.f32 %v860_v17, %v2541_v35  ;;  %v2669_v13 = vadd.f32 %v872_v5, %v2544_v25  ;;  %v1509_v25 = vsel %vm963_vm7, 1.0, %v1888_v0  ;;  %1740 = vpow2.f32 %v1035_v40 }
  0xbf   : > { %v1737_v35 = vpop.eup %1736  ;;  %v999_v34 = vadd.f32 %v1509_v25, %v1508_v28  ;;  %vm1083_vm10 = vcmp.ne.s32.totalorder %v2626_v62, 255  ;;  %1742 = vpow2.f32 %v1039_v24  ;;  %v2722_v61 = vmax.f32 %v1140_v7, %v1141_v42  ;;  %v2760_v62 = vld [vmem:[%s1988_s5 + $0x78] sm:$0xff] }
  0xc0   : > { %v937_v60 = vmul.f32 0.6931472, %v1737_v35  ;;  %v1524_v15 = vsel %vm1083_vm10, 1.0, %v1888_v0  ;;  %1744 = vpow2.f32 %v1043_v43  ;;  %vm1062_vm11 = vcmp.eq.s32.totalorder %v2707_v46, 0  ;;  %v2768_v24 = vld [vmem:[%s1988_s5 + $0xf8] sm:$0xff] }
  0xc1   : > { %1746 = vpow2.f32 %v1047_v30  ;;  %vm1064_vm12 = vcmp.eq.s32.totalorder %v2707_v46, 1  ;;  %vm1084_vm13 = vcmp.ne.s32.totalorder %v2707_v46, 255  ;;  %v1146_v2 = vsub.f32 %v2688_v19, %v2722_v61  ;;  %v2771_v43 = vld [vmem:[%s1988_s5 + $0x1f8] sm:$0xff] }
  0xc2   : > { %v939_v50 = vadd.f32 %v937_v60, %v2556_v37  ;;  %v1075_v37 = vsel %vm1067_vm9, %v2582_v58, 0.0  ;;  %v1525_v52 = vsel %vm1084_vm13, 1.0, %v1888_v0  ;;  %v881_v3 = vrot.slane %v880_v41, 2 }
  0xc3   : > { %v1739_v63 = vpop.eup %1738  ;;  %v1079_v1 = vadd.f32 %v1078_v54, %v1075_v37  ;;  %v1000_v31 = vrot.slane %v999_v34, 4  ;;  %v1148_v20 = vsub.f32 %v2698_v22, %v2722_v61  ;;  %v1150_v5 = vsub.f32 %v2691_v36, %v2722_v61 }
  0xc4   : > { %v965_v14 = vsub.f32 %v939_v50, %v961_v18  ;;  %v1056_v58 = vmul.f32 0.6931472, %v1739_v63  ;;  %v1741_v32 = vpop.eup %1740  ;;  %v1152_v11 = vsub.f32 %v2701_v49, %v2722_v61  ;;  %v1154_v8 = vmul.f32 1.442695, %v1146_v2 }
  0xc5   : > { %v1743_v9 = vpop.eup %1742  ;;  %v1070_v10 = vsel %vm1062_vm11, %v2642_v59, 0.0  ;;  %v1072_v38 = vsel %vm1064_vm12, %v2646_v45, 0.0  ;;  %v1120_v6 = vadd.f32 %v1525_v52, %v1524_v15  ;;  %v1158_v55 = vmul.f32 1.442695, %v1148_v20 }
  0xc6   : > { %v2717_v12 = vsel %vm963_vm7, %v965_v14, 0.0  ;;  %v1059_v17 = vadd.f32 %v1056_v58, %v2605_v48  ;;  %v1745_v48 = vpop.eup %1744  ;;  %v1052_v27 = vadd.f32 %v1743_v9, %v1741_v32  ;;  %1748 = vpow2.f32 %v1154_v8 }
  0xc7   : > { %1505 = vst [vmem:[%s2161_s18 + $0x58] sm:$0xff] %v2717_v12  ;;  %v1162_v28 = vmul.f32 1.442695, %v1150_v5  ;;  %v1747_v35 = vpop.eup %1746  ;;  %v882_v18 = vadd.f32 %v881_v3, %v880_v41  ;;  %v1001_v25 = vadd.f32 %v1000_v31, %v999_v34  ;;  %vm1066_vm14 = vcmp.eq.s32.totalorder %v2707_v46, 2 }
  0xc8   : > { %v1085_v44 = vsub.f32 %v1059_v17, %v1079_v1  ;;  %1750 = vpow2.f32 %v1158_v55  ;;  %v1053_v45 = vadd.f32 %v1745_v48, %v1052_v27  ;;  %v1166_v26 = vmul.f32 1.442695, %v1152_v11 }
  0xc9   : > { %1752 = vpow2.f32 %v1162_v28  ;;  %v1080_v4 = vadd.f32 %v1072_v38, %v1070_v10  ;;  %v1121_v60 = vrot.slane %v1120_v6, 4  ;;  %v1074_v29 = vsel %vm1066_vm14, %v2649_v21, 0.0  ;;  %v2801_v10 = vld [vmem:[%s1994_s11 + $0x78] sm:$0xff] }
  0xca   : > { %v2750_v59 = vsel %vm1083_vm10, %v1085_v44, 0.0  ;;  %v1054_v33 = vadd.f32 %v1747_v35, %v1053_v45  ;;  %1754 = vpow2.f32 %v1166_v26  ;;  %v883_v39 = vrot.slane %v882_v18, 1 }
  0xcb   : > { %1520 = vst [vmem:[%s2161_s18 + $0x60] sm:$0xff] %v2750_v59  ;;  %vm1068_vm15 = vcmp.eq.s32.totalorder %v2707_v46, 3  ;;  %v1002_v40 = vrot.slane %v1001_v25, 2  ;;  %vm1182_vm0 = vcmp.eq.s32.totalorder %v2755_v56, 0  ;;  %vm1184_vm1 = vcmp.eq.s32.totalorder %v2755_v56, 1 }
  0xcc   : > { %v1749_v50 = vpop.eup %1748  ;;  %1756 = vlog2.f32 %v1054_v33  ;;  %vm971_vm2 = vcmp.gt.f32.partialorder %v2630_v47, 0.35667494  ;;  %v1081_v41 = vadd.f32 %v1080_v4, %v1074_v29  ;;  %v1122_v30 = vadd.f32 %v1121_v60, %v1120_v6 }
  0xcd   : > { %v1076_v14 = vsel %vm1068_vm15, %v2652_v53, 0.0  ;;  %v1143_v42 = vmax.f32 %v2760_v62, %v2763_v16  ;;  %v884_v34 = vadd.f32 %v883_v39, %v882_v18  ;;  %v1190_v37 = vsel %vm1182_vm0, %v2688_v19, 0.0 }
  0xce   : > { %v1751_v21 = vpop.eup %1750  ;;  %v1192_v15 = vsel %vm1184_vm1, %v2698_v22, 0.0  ;;  %v1144_v63 = vmax.f32 %v2768_v24, %v2771_v43  ;;  %v973_v1 = vsel %vm971_vm2, %v2630_v47, 0.0  ;;  %vm972_vm3 = vcmp.gt.f32.partialorder %v2717_v12, 0.35667494 }
  0xcf   : > { %v1753_v7 = vpop.eup %1752  ;;  %v1170_v54 = vadd.f32 %v1751_v21, %v1749_v50  ;;  %v1003_v53 = vadd.f32 %v1002_v40, %v1001_v25  ;;  %v1082_v2 = vadd.f32 %v1081_v41, %v1076_v14  ;;  %v1123_v3 = vrot.slane %v1122_v30, 2 }
  0xd0   : > { %v1755_v58 = vpop.eup %1754  ;;  %vm1186_vm5 = vcmp.eq.s32.totalorder %v2755_v56, 2  ;;  %v2786_v19 = vmax.f32 %v1143_v42, %v1144_v63  ;;  %vm1188_vm4 = vcmp.eq.s32.totalorder %v2755_v56, 3  ;;  %v1198_v20 = vadd.f32 %v1192_v15, %v1190_v37 }
  0xd1   : > { %v1171_v52 = vadd.f32 %v1753_v7, %v1170_v54  ;;  %vm1204_vm6 = vcmp.ne.s32.totalorder %v2755_v56, 255  ;;  %v1194_v8 = vsel %vm1186_vm5, %v2691_v36, 0.0  ;;  %v974_v27 = vsel %vm972_vm3, %v2717_v12, 0.0 }
  0xd2   : > { %v1757_v22 = vpop.eup %1756  ;;  %v1147_v17 = vsub.f32 %v2760_v62, %v2786_v19  ;;  %v1149_v5 = vsub.f32 %v2768_v24, %v2786_v19  ;;  %v1151_v11 = vsub.f32 %v2763_v16, %v2786_v19  ;;  %v1540_v9 = vsel %vm1204_vm6, 1.0, %v1888_v0 }
  0xd3   : > { %v1172_v31 = vadd.f32 %v1755_v58, %v1171_v52  ;;  %v1058_v32 = vmul.f32 0.6931472, %v1757_v22  ;;  %v1153_v38 = vsub.f32 %v2771_v43, %v2786_v19  ;;  %v1124_v28 = vadd.f32 %v1123_v3, %v1122_v30 }
  0xd4   : > { %v1156_v55 = vmul.f32 1.442695, %v1147_v17  ;;  %v1160_v48 = vmul.f32 1.442695, %v1149_v5  ;;  %v1164_v44 = vmul.f32 1.442695, %v1151_v11  ;;  %v1199_v18 = vadd.f32 %v1198_v20, %v1194_v8 }
  0xd5   : > { %1758 = vlog2.f32 %v1172_v31  ;;  %v1060_v6 = vadd.f32 %v1058_v32, %v2676_v51  ;;  %v1168_v36 = vmul.f32 1.442695, %v1153_v38  ;;  %vm1205_vm7 = vcmp.ne.s32.totalorder %v2801_v10, 255 }
  0xd6   : > { %1760 = vpow2.f32 %v1156_v55  ;;  %v1541_v25 = vsel %vm1205_vm7, 1.0, %v1888_v0  ;;  %v1004_v51 = vrot.slane %v1003_v53, 1  ;;  %v1196_v45 = vsel %vm1188_vm4, %v2701_v49, 0.0  ;;  %v1255_v55 = vld [vmem:[%s2008_s23 + $0x2] sm:$0x1] }
  0xd7   : > { %v1086_v35 = vsub.f32 %v1060_v6, %v1082_v2  ;;  %1762 = vpow2.f32 %v1160_v48  ;;  %v1241_v26 = vadd.f32 %v1541_v25, %v1540_v9  ;;  %v975_v4 = vadd.f32 %v974_v27, %v973_v1 }
  0xd8   : > { %1764 = vpow2.f32 %v1164_v44  ;;  %v1506_v29 = vsel %vm971_vm2, 1.0, %v1888_v0  ;;  %v1507_v39 = vsel %vm972_vm3, 1.0, %v1888_v0  ;;  %vm1092_vm8 = vcmp.gt.f32.partialorder %v2750_v59, 0.35667494 }
  0xd9   : > { %v1088_v60 = vsel %vm1084_vm13, %v1086_v35, 0.0  ;;  %1766 = vpow2.f32 %v1168_v36  ;;  %v1242_v50 = vrot.slane %v1241_v26, 4  ;;  %v1125_v49 = vrot.slane %v1124_v28, 1 }
  0xda   : > { %1521 = vst [vmem:[%s2161_s18 + $0x68] sm:$0xff] %v1088_v60  ;;  %v1200_v21 = vadd.f32 %v1199_v18, %v1196_v45  ;;  %v885_v46 = vadd.f32 %v884_v34, %v2416_v57  ;;  %v1005_v41 = vadd.f32 %v1004_v51, %v1003_v53  ;;  %v976_v14 = vrot.slane %v975_v4, 4 }
  0xdb   : > { %v1759_v33 = vpop.eup %1758  ;;  %v1243_v30 = vadd.f32 %v1242_v50, %v1241_v26  ;;  %v987_v47 = vadd.f32 %v1507_v39, %v1506_v29  ;;  %vm1093_vm9 = vcmp.gt.f32.partialorder %v1088_v60, 0.35667494  ;;  %v1094_v42 = vsel %vm1092_vm8, %v2750_v59, 0.0 }
  0xdc   : > { %v1177_v40 = vmul.f32 0.6931472, %v1759_v33  ;;  %v1761_v7 = vpop.eup %1760  ;;  %vm1183_vm10 = vcmp.eq.s32.totalorder %v2801_v10, 0  ;;  %vm1185_vm11 = vcmp.eq.s32.totalorder %v2801_v10, 1  ;;  %v1522_v34 = vsel %vm1092_vm8, 1.0, %v1888_v0 }
  0xdd   : > { %v1763_v12 = vpop.eup %1762  ;;  %v1244_v37 = vrot.slane %v1243_v30, 2  ;;  %v1126_v15 = vadd.f32 %v1125_v49, %v1124_v28  ;;  %v1095_v1 = vsel %vm1093_vm9, %v1088_v60, 0.0  ;;  %v1523_v53 = vsel %vm1093_vm9, 1.0, %v1888_v0 }
  0xde   : > { %v1180_v54 = vadd.f32 %v1177_v40, %v2722_v61  ;;  %v1765_v57 = vpop.eup %1764  ;;  %v1173_v58 = vadd.f32 %v1763_v12, %v1761_v7  ;;  %v1006_v2 = vadd.f32 %v1005_v41, %v885_v46  ;;  %v1191_v31 = vsel %vm1183_vm10, %v2760_v62, 0.0 }
  0xdf   : > { %v1767_v61 = vpop.eup %1766  ;;  %v1245_v52 = vadd.f32 %v1244_v37, %v1243_v30  ;;  %v1193_v20 = vsel %vm1185_vm11, %v2768_v24, 0.0  ;;  %v988_v59 = vrot.slane %v987_v47, 4  ;;  %vm1187_vm12 = vcmp.eq.s32.totalorder %v2801_v10, 2 }
  0xe0   : > { %v1206_v63 = vsub.f32 %v1180_v54, %v1200_v21  ;;  %v1174_v22 = vadd.f32 %v1765_v57, %v1173_v58  ;;  %v1096_v17 = vadd.f32 %v1095_v1, %v1094_v42  ;;  %v1108_v5 = vadd.f32 %v1523_v53, %v1522_v34 }
  0xe1   : > { %v1246_v32 = vrot.slane %v1245_v52, 1  ;;  %v1127_v8 = vadd.f32 %v1126_v15, %v1006_v2  ;;  %v1201_v9 = vadd.f32 %v1193_v20, %v1191_v31  ;;  %v977_v56 = vadd.f32 %v976_v14, %v975_v4 }
  0xe2   : > { %v1208_v3 = vsel %vm1204_vm6, %v1206_v63, 0.0  ;;  %v1175_v11 = vadd.f32 %v1767_v61, %v1174_v22  ;;  %v1195_v6 = vsel %vm1187_vm12, %v2763_v16, 0.0  ;;  %v989_v62 = vadd.f32 %v988_v59, %v987_v47 }
  0xe3   : > { %1536 = vst [vmem:[%s2161_s18 + $0x70] sm:$0xff] %v1208_v3  ;;  %v1247_v38 = vadd.f32 %v1246_v32, %v1245_v52  ;;  %vm1189_vm13 = vcmp.eq.s32.totalorder %v2801_v10, 3  ;;  %v1097_v48 = vrot.slane %v1096_v17, 4  ;;  %v1109_v44 = vrot.slane %v1108_v5, 4 }
  0xe4   : > { %1768 = vlog2.f32 %v1175_v11  ;;  %v1202_v27 = vadd.f32 %v1201_v9, %v1195_v6  ;;  %v978_v36 = vrot.slane %v977_v56, 2  ;;  %v1197_v35 = vsel %vm1189_vm13, %v2771_v43, 0.0 }
  0xe5   : > { %v1248_v24 = vadd.f32 %v1247_v38, %v1127_v8  ;;  %v990_v18 = vrot.slane %v989_v62, 2  ;;  %v1098_v51 = vadd.f32 %v1097_v48, %v1096_v17  ;;  %v1110_v45 = vadd.f32 %v1109_v44, %v1108_v5  ;;  %v1249_v17 = vld [vmem:[%s2008_s23] sm:$0x1]  ;;  %v1252_v5 = vld [vmem:[%s2008_s23 + $0x1] sm:$0x1] }
  0xe6   : > { %v1203_v16 = vadd.f32 %v1202_v27, %v1197_v35  ;;  %v979_v4 = vadd.f32 %v978_v36, %v977_v56  ;;  %vm1213_vm14 = vcmp.gt.f32.partialorder %v1208_v3, 0.35667494 }
  0xe7   : > { %v1256_v28 = vadd.f32 %v1255_v55, %v1248_v24  ;;  %v991_v60 = vadd.f32 %v990_v18, %v989_v62  ;;  %v1099_v29 = vrot.slane %v1098_v51, 2  ;;  %v1111_v39 = vrot.slane %v1110_v45, 2 }
  0xe8   : > { %v980_v49 = vrot.slane %v979_v4, 1  ;;  %v1215_v21 = vsel %vm1213_vm14, %v1208_v3, 0.0  ;;  %v1538_v43 = vsel %vm1213_vm14, 1.0, %v1888_v0 }
  0xe9   : > { %1257 = vst [vmem:[%s2008_s23 + $0x2] sm:$0x1] %v1256_v28  ;;  %v992_v40 = vrot.slane %v991_v60, 1  ;;  %v1100_v41 = vadd.f32 %v1099_v29, %v1098_v51  ;;  %v1112_v30 = vadd.f32 %v1111_v39, %v1110_v45 }
  0xea   : > { %v1769_v25 = vpop.eup %1768  ;;  %v981_v54 = vadd.f32 %v980_v49, %v979_v4 }
  0xeb   : > { %v1179_v26 = vmul.f32 0.6931472, %v1769_v25  ;;  %v993_v12 = vadd.f32 %v992_v40, %v991_v60  ;;  %v1101_v42 = vrot.slane %v1100_v41, 1  ;;  %v1113_v37 = vrot.slane %v1112_v30, 1 }
  0xec   : > { %v982_v10 = vadd.f32 %v981_v54, %v2666_v23 }
  0xed   : > { %v1181_v33 = vadd.f32 %v1179_v26, %v2786_v19  ;;  %v994_v58 = vadd.f32 %v993_v12, %v2669_v13  ;;  %v1102_v61 = vadd.f32 %v1101_v42, %v1100_v41  ;;  %v1114_v1 = vadd.f32 %v1113_v37, %v1112_v30 }
  0xef   : > { %v1207_v50 = vsub.f32 %v1181_v33, %v1203_v16  ;;  %v1103_v31 = vadd.f32 %v1102_v61, %v982_v10  ;;  %v1115_v20 = vadd.f32 %v1114_v1, %v994_v58 }
  0xf1   : > { %v1209_v46 = vsel %vm1205_vm7, %v1207_v50, 0.0 }
  0xf2   : > { %1537 = vst [vmem:[%s2161_s18 + $0x78] sm:$0xff] %v1209_v46  ;;  %vm1214_vm15 = vcmp.gt.f32.partialorder %v1209_v46, 0.35667494 }
  0xf3   : > { %v1216_v7 = vsel %vm1214_vm15, %v1209_v46, 0.0  ;;  %v1539_v14 = vsel %vm1214_vm15, 1.0, %v1888_v0 }
  0xf4   : > { %v1217_v19 = vadd.f32 %v1216_v7, %v1215_v21  ;;  %v1229_v47 = vadd.f32 %v1539_v14, %v1538_v43 }
  0xf6   : > { %v1218_v57 = vrot.slane %v1217_v19, 4  ;;  %v1230_v34 = vrot.slane %v1229_v47, 4 }
  0xf8   : > { %v1219_v15 = vadd.f32 %v1218_v57, %v1217_v19  ;;  %v1231_v63 = vadd.f32 %v1230_v34, %v1229_v47 }
  0xfa   : > { %v1220_v53 = vrot.slane %v1219_v15, 2  ;;  %v1232_v0 = vrot.slane %v1231_v63, 2 }
  0xfc   : > { %v1221_v52 = vadd.f32 %v1220_v53, %v1219_v15  ;;  %v1233_v2 = vadd.f32 %v1232_v0, %v1231_v63 }
  0xfe   : > { %v1222_v3 = vrot.slane %v1221_v52, 1  ;;  %v1234_v22 = vrot.slane %v1233_v2, 1 }
 0x100   : > { %v1223_v59 = vadd.f32 %v1222_v3, %v1221_v52  ;;  %v1235_v32 = vadd.f32 %v1234_v22, %v1233_v2 }
 0x102   : > { %v1224_v11 = vadd.f32 %v1223_v59, %v1103_v31  ;;  %v1236_v23 = vadd.f32 %v1235_v32, %v1115_v20 }
 0x104   : > { %v1250_v8 = vadd.f32 %v1249_v17, %v1224_v11  ;;  %v1253_v13 = vadd.f32 %v1252_v5, %v1236_v23 }
 0x106   : > { %1251 = vst [vmem:[%s2008_s23] sm:$0x1] %v1250_v8 }
 0x107   : > { %1254 = vst [vmem:[%s2008_s23 + $0x1] sm:$0x1] %v1253_v13 }
 0x108 PF: > { %s20_s17 = sadd.s32 1, %s1884_s17   ;;  %s2885_s12 = smov %s1868_s13 }
 0x109   : > { %p17_p0 = scmp.ge.s32.totalorder %s20_s17, 4   ;;  %s2886_s13 = smov %s1872_s14 }
 0x10a   : > { %s2887_s14 = smov %s1958_s24  ;;  %s2888_s15 = smov %s1880_s16 }
 0x10b   : > { %s2889_s16 = smov %s2891_s19  ;;  %19 = sbr.rel (!%p17_p0) target bundleno = 6 (0x6), region = 118 }
 0x110   :  { %1302 = vsyncpa [#allocation3], 1 }
 0x111   :  { %1304 = vsyncpa [#allocation3 + $0x1], 1 }
 0x112   :  { %1305 = vsyncpa [#allocation5], 1 }
 0x113   :  { %1307 = vsyncpa [#allocation5 + $0x1], 1 }

// kernel: pixel_classification_criterion.2
= control target key start
LH: loop header
LB: loop body
LE: loop exit
PB: predicated region body
PF: predicated region fallthrough
CT: control target
= control target key end

     0   :  { %s2304_s18 = smov 0   ;;  %s2306_s19 = smov 0   ;;  %s3236_s0 = inlined_call_operand.vmem [shape: f32[2,64,16], index: 0, kind: input, shape index: {}]   ;;  %s3237_s1 = inlined_call_operand.vmem [shape: f32[128,16], index: 1, kind: input, shape index: {}]   ;;  %s3238_s2 = inlined_call_operand.vmem [shape: f32[16,128], index: 2, kind: input, shape index: {}]   ;;  %s3239_s3 = inlined_call_operand.vmem [shape: s32[2,128,128], index: 3, kind: input, shape index: {}]   ;;  %s3240_s4 = inlined_call_operand.vmem [shape: f32[2,128,128], index: 4, kind: output, shape index: {0}]   ;;  %s3241_s5 = inlined_call_operand.vmem [shape: f32[2,3,128], index: 5, kind: output, shape index: {1}]  }
   0x1   :  { %s2308_s20 = smov 0  }
   0x2 LB: > { %s28_s21 = sadd.s32 1, %s2267_s19  ;;  %p1913_p0 = scmp.ge.s32.totalorder %s2271_s20, 1  ;;  %s2271_s20 = sphi %s2308_s20, %s16_s20   ;;  %s2267_s19 = sphi %s2306_s19, %s3243_s19   ;;  %s2263_s18 = sphi %s2304_s18, %s3242_s18  }
   0x3   : > { %p30_p1 = scmp.ge.s32.totalorder %s28_s21, 2  ;;  %p232_p2 = scmp.lt.s32.totalorder %s2271_s20, 3 }
   0x5   : > { %s3245_s21 = smov (%p30_p1, %s28_s21), 0  ;;  %p233_p3 = pnand %p1913_p0, %p232_p2 }
   0x6   : > { %p282_p4 = scmp.lt.s32.totalorder (!%p233_p3), %s2263_s18, 1 }
   0x7   : > { %236 = sbr.rel (%p233_p3) target bundleno = 524 (0x20c), region = 36 }
   0xc   : > { %v339_v0 = vld [vmem:[%s3238_s2 + $0x8] sm:$0xff]  ;;  %v338_v1 = vld [vmem:[%s3238_s2] sm:$0xff]  ;;  %s3247_s18 = smov (!%p282_p4, %s2263_s18), 1  ;;  %vm348_vm0 = vcmask 130048   ;;  %v324_v20 = vld [vmem:[%s3237_s1 + $0x10] sm:$0xff]  ;;  %v2273_v32 = vmov 0.0  }
   0xd   : > { %2058 = vmatpush.msra.mxu1 %v339_v0  ;;  %2059 = vmatpush.msra.mxu2 %v339_v0  ;;  %s2055_s26 = sshll.u32 %s3247_s18, 6  ;;  %v322_v16 = vld [vmem:[%s3237_s1] sm:$0xff]  ;;  %v323_v19 = vld [vmem:[%s3237_s1 + $0x8] sm:$0xff]  ;;  %v325_v21 = vld [vmem:[%s3237_s1 + $0x18] sm:$0xff]  ;;  %s1920_s12 = sshll.u32 %s3247_s18, 2 }
   0xe   : > { %2060 = vmatpush.msra.mxu3 %v339_v0  ;;  %387 = vmatpush.msra.mxu0 %v339_v0  ;;  %s286_s29 = scalar_lea.vmem %s3236_s0, %s2055_s26  ;;  %v326_v22 = vld [vmem:[%s3237_s1 + $0x20] sm:$0xff]  ;;  %v327_v23 = vld [vmem:[%s3237_s1 + $0x28] sm:$0xff]  ;;  %v328_v24 = vld [vmem:[%s3237_s1 + $0x30] sm:$0xff]  ;;  %s2441_s15 = scalar_lea.vmem %s3241_s5, %s1920_s12 }
   0xf   : > { %2061 = vmatpush.msra.mxu1 %v338_v1  ;;  %2062 = vmatpush.msra.mxu2 %v338_v1  ;;  %v342_v2 = vld [vmem:[%s286_s29 + $0x10] sm:$0xff]  ;;  %v344_v3 = vld [vmem:[%s286_s29 + $0x20] sm:$0xff]  ;;  %v343_v6 = vld [vmem:[%s286_s29 + $0x18] sm:$0xff]  ;;  %321 = vst [vmem:[%s2441_s15] sm:$0x7] %v2273_v32  ;;  %s2056_s24 = sshll.u32 %s3247_s18, 7 }
  0x10   : > { %2063 = vmatpush.msra.mxu3 %v338_v1  ;;  %388 = vmatpush.msra.mxu0 %v338_v1  ;;  %v346_v4 = vld [vmem:[%s286_s29 + $0x30] sm:$0xff]  ;;  %v340_v5 = vld [vmem:[%s286_s29] sm:$0xff]  ;;  %v345_v7 = vld [vmem:[%s286_s29 + $0x28] sm:$0xff]  ;;  %s2478_s27 = scalar_lea.vmem %s3239_s3, %s2056_s24  ;;  %s2611_s30 = scalar_lea.vmem %s3240_s4, %s2056_s24 }
  0x11   : > { %1923 = vmatmul.msk.f32.vlgmr.msra.gmra.mxu1 %vm348_vm0, %v342_v2  ;;  %1925 = vmatmul.msk.f32.vlgmr.msra.gmra.mxu2 %vm348_vm0, %v344_v3  ;;  %v347_v8 = vld [vmem:[%s286_s29 + $0x38] sm:$0xff]  ;;  %v341_v9 = vld [vmem:[%s286_s29 + $0x8] sm:$0xff]  ;;  %v330_v26 = vld [vmem:[%s3237_s1 + $0x40] sm:$0xff] }
  0x12   : > { %1927 = vmatmul.msk.f32.vlgmr.msra.gmra.mxu3 %vm348_vm0, %v346_v4  ;;  %1921 = vmatmul.msk.f32.vlgmr.msra.gmra.mxu0 %vm348_vm0, %v340_v5  ;;  %v329_v25 = vld [vmem:[%s3237_s1 + $0x38] sm:$0xff]  ;;  %v331_v27 = vld [vmem:[%s3237_s1 + $0x48] sm:$0xff]  ;;  %v332_v28 = vld [vmem:[%s3237_s1 + $0x50] sm:$0xff] }
  0x13   : > { %v333_v29 = vld [vmem:[%s3237_s1 + $0x58] sm:$0xff]  ;;  %v334_v30 = vld [vmem:[%s3237_s1 + $0x60] sm:$0xff]  ;;  %v335_v31 = vld [vmem:[%s3237_s1 + $0x68] sm:$0xff] }
  0x14   : > { %v336_v33 = vld [vmem:[%s3237_s1 + $0x70] sm:$0xff]  ;;  %v337_v34 = vld [vmem:[%s3237_s1 + $0x78] sm:$0xff]  ;;  %v2488_v52 = vld [vmem:[%s2478_s27] sm:$0xff] }
  0x15   : > { %v2491_v55 = vld [vmem:[%s2478_s27 + $0x8] sm:$0xff]  ;;  %vm841_vm1 = vcmp.eq.s32.totalorder %v2488_v52, 0  ;;  %vm843_vm2 = vcmp.eq.s32.totalorder %v2488_v52, 1  ;;  %vm845_vm3 = vcmp.eq.s32.totalorder %v2488_v52, 2  ;;  %v2501_v60 = vld [vmem:[%s2478_s27 + $0x10] sm:$0xff]  ;;  %vm847_vm4 = vcmp.eq.s32.totalorder %v2488_v52, 3 }
  0x16   : > { %vm842_vm5 = vcmp.eq.s32.totalorder %v2491_v55, 0  ;;  %vm844_vm6 = vcmp.eq.s32.totalorder %v2491_v55, 1  ;;  %vm846_vm7 = vcmp.eq.s32.totalorder %v2491_v55, 2  ;;  %vm961_vm8 = vcmp.eq.s32.totalorder %v2501_v60, 0 }
  0x17   : > { %vm848_vm9 = vcmp.eq.s32.totalorder %v2491_v55, 3  ;;  %vm963_vm10 = vcmp.eq.s32.totalorder %v2501_v60, 1  ;;  %vm965_vm11 = vcmp.eq.s32.totalorder %v2501_v60, 2  ;;  %vm967_vm12 = vcmp.eq.s32.totalorder %v2501_v60, 3 }
  0x18   : > { %vm863_vm14 = vcmp.ne.s32.totalorder %v2488_v52, 255 }
  0x19   : > { %1924 = vmatmul.msk.f32.gmra.mxu1 %vm348_vm0, %v343_v6  ;;  %1926 = vmatmul.msk.f32.gmra.mxu2 %vm348_vm0, %v345_v7 }
  0x1a   : > { %1928 = vmatmul.msk.f32.gmra.mxu3 %vm348_vm0, %v347_v8  ;;  %1922 = vmatmul.msk.f32.gmra.mxu0 %vm348_vm0, %v341_v9 }
  0x8e   : > { %v396_v10 = vpop.f32.mrf.mxu1 }
  0x8f   : > { %v390_v11 = vpop.f32.mrf.mxu0 }
  0x94   : > { %v402_v12 = vpop.f32.mrf.mxu2 }
  0x95   : > { %v408_v13 = vpop.f32.mrf.mxu3 }
  0x96   : > { %v399_v14 = vpop.f32.mrf.mxu1 }
  0x97   : > { %557 = vmatpush.msrb.mxu2 %v399_v14  ;;  %v393_v15 = vpop.f32.mrf.mxu0 }
  0x98   : > { %476 = vmatpush.msrb.mxu1 %v393_v15 }
  0x99   : > { %558 = vmatpush.msrb.mxu2 %v396_v10 }
  0x9a   : > { %477 = vmatpush.msrb.mxu1 %v390_v11  ;;  %1945 = vmatmul.msk.f32.vlgmr.msrb.gmra.mxu2 %vm348_vm0, %v322_v16 }
  0x9b   : > { %1929 = vmatmul.msk.f32.vlgmr.msrb.gmra.mxu1 %vm348_vm0, %v322_v16 }
  0x9c   : > { %v405_v17 = vpop.f32.mrf.mxu2 }
  0x9d   : > { %v411_v18 = vpop.f32.mrf.mxu3  ;;  %639 = vmatpush.msrb.mxu3 %v405_v17 }
  0x9e   : > { %721 = vmatpush.msrb.mxu0 %v411_v18 }
  0x9f   : > { %640 = vmatpush.msrb.mxu3 %v402_v12 }
  0xa0   : > { %722 = vmatpush.msrb.mxu0 %v408_v13  ;;  %1961 = vmatmul.msk.f32.vlgmr.msrb.gmra.mxu3 %vm348_vm0, %v322_v16 }
  0xa1   : > { %1977 = vmatmul.msk.f32.vlgmr.msrb.gmra.mxu0 %vm348_vm0, %v322_v16 }
  0xa2   : > { %1946 = vmatmul.msk.f32.gmra.mxu2 %vm348_vm0, %v323_v19 }
  0xa3   : > { %1930 = vmatmul.msk.f32.gmra.mxu1 %vm348_vm0, %v323_v19 }
  0xa8   : > { %1962 = vmatmul.msk.f32.gmra.mxu3 %vm348_vm0, %v323_v19 }
  0xa9   : > { %1978 = vmatmul.msk.f32.gmra.mxu0 %vm348_vm0, %v323_v19 }
  0xaa   : > { %1947 = vmatmul.msk.f32.gmra.mxu2 %vm348_vm0, %v324_v20 }
  0xab   : > { %1931 = vmatmul.msk.f32.gmra.mxu1 %vm348_vm0, %v324_v20 }
  0xb0   : > { %1963 = vmatmul.msk.f32.gmra.mxu3 %vm348_vm0, %v324_v20 }
  0xb1   : > { %1979 = vmatmul.msk.f32.gmra.mxu0 %vm348_vm0, %v324_v20  ;;  %v2531_v20 = vld [vmem:[%s2478_s27 + $0x18] sm:$0xff] }
  0xb2   : > { %1948 = vmatmul.msk.f32.gmra.mxu2 %vm348_vm0, %v325_v21  ;;  %vm962_vm13 = vcmp.eq.s32.totalorder %v2531_v20, 0  ;;  %vm964_vm15 = vcmp.eq.s32.totalorder %v2531_v20, 1 }
  0xb3   : > { %1932 = vmatmul.msk.f32.gmra.mxu1 %vm348_vm0, %v325_v21 }
  0xb8   : > { %1964 = vmatmul.msk.f32.gmra.mxu3 %vm348_vm0, %v325_v21 }
  0xb9   : > { %1980 = vmatmul.msk.f32.gmra.mxu0 %vm348_vm0, %v325_v21 }
  0xba   : > { %1949 = vmatmul.msk.f32.gmra.mxu2 %vm348_vm0, %v326_v22 }
  0xbb   : > { %1933 = vmatmul.msk.f32.gmra.mxu1 %vm348_vm0, %v326_v22 }
  0xc0   : > { %1965 = vmatmul.msk.f32.gmra.mxu3 %vm348_vm0, %v326_v22 }
  0xc1   : > { %1981 = vmatmul.msk.f32.gmra.mxu0 %vm348_vm0, %v326_v22 }
  0xc2   : > { %1950 = vmatmul.msk.f32.gmra.mxu2 %vm348_vm0, %v327_v23 }
  0xc3   : > { %1934 = vmatmul.msk.f32.gmra.mxu1 %vm348_vm0, %v327_v23 }
  0xc8   : > { %1966 = vmatmul.msk.f32.gmra.mxu3 %vm348_vm0, %v327_v23 }
  0xc9   : > { %1982 = vmatmul.msk.f32.gmra.mxu0 %vm348_vm0, %v327_v23 }
  0xca   : > { %1951 = vmatmul.msk.f32.gmra.mxu2 %vm348_vm0, %v328_v24 }
  0xcb   : > { %1935 = vmatmul.msk.f32.gmra.mxu1 %vm348_vm0, %v328_v24 }
  0xd0   : > { %1967 = vmatmul.msk.f32.gmra.mxu3 %vm348_vm0, %v328_v24 }
  0xd1   : > { %1983 = vmatmul.msk.f32.gmra.mxu0 %vm348_vm0, %v328_v24 }
  0xd2   : > { %1952 = vmatmul.msk.f32.gmra.mxu2 %vm348_vm0, %v329_v25 }
  0xd3   : > { %1936 = vmatmul.msk.f32.gmra.mxu1 %vm348_vm0, %v329_v25 }
  0xd8   : > { %1968 = vmatmul.msk.f32.gmra.mxu3 %vm348_vm0, %v329_v25 }
  0xd9   : > { %1984 = vmatmul.msk.f32.gmra.mxu0 %vm348_vm0, %v329_v25 }
  0xda   : > { %1953 = vmatmul.msk.f32.gmra.mxu2 %vm348_vm0, %v330_v26 }
  0xdb   : > { %1937 = vmatmul.msk.f32.gmra.mxu1 %vm348_vm0, %v330_v26 }
  0xe0   : > { %1969 = vmatmul.msk.f32.gmra.mxu3 %vm348_vm0, %v330_v26 }
  0xe1   : > { %1985 = vmatmul.msk.f32.gmra.mxu0 %vm348_vm0, %v330_v26 }
  0xe2   : > { %1954 = vmatmul.msk.f32.gmra.mxu2 %vm348_vm0, %v331_v27 }
  0xe3   : > { %1938 = vmatmul.msk.f32.gmra.mxu1 %vm348_vm0, %v331_v27 }
  0xe8   : > { %1970 = vmatmul.msk.f32.gmra.mxu3 %vm348_vm0, %v331_v27 }
  0xe9   : > { %1986 = vmatmul.msk.f32.gmra.mxu0 %vm348_vm0, %v331_v27 }
  0xea   : > { %1955 = vmatmul.msk.f32.gmra.mxu2 %vm348_vm0, %v332_v28 }
  0xeb   : > { %1939 = vmatmul.msk.f32.gmra.mxu1 %vm348_vm0, %v332_v28 }
  0xf0   : > { %1971 = vmatmul.msk.f32.gmra.mxu3 %vm348_vm0, %v332_v28 }
  0xf1   : > { %1987 = vmatmul.msk.f32.gmra.mxu0 %vm348_vm0, %v332_v28 }
  0xf2   : > { %1956 = vmatmul.msk.f32.gmra.mxu2 %vm348_vm0, %v333_v29 }
  0xf3   : > { %1940 = vmatmul.msk.f32.gmra.mxu1 %vm348_vm0, %v333_v29 }
  0xf8   : > { %1972 = vmatmul.msk.f32.gmra.mxu3 %vm348_vm0, %v333_v29 }
  0xf9   : > { %1988 = vmatmul.msk.f32.gmra.mxu0 %vm348_vm0, %v333_v29 }
  0xfa   : > { %1957 = vmatmul.msk.f32.gmra.mxu2 %vm348_vm0, %v334_v30 }
  0xfb   : > { %1941 = vmatmul.msk.f32.gmra.mxu1 %vm348_vm0, %v334_v30 }
 0x100   : > { %1973 = vmatmul.msk.f32.gmra.mxu3 %vm348_vm0, %v334_v30 }
 0x101   : > { %1989 = vmatmul.msk.f32.gmra.mxu0 %vm348_vm0, %v334_v30 }
 0x102   : > { %1958 = vmatmul.msk.f32.gmra.mxu2 %vm348_vm0, %v335_v31 }
 0x103   : > { %1942 = vmatmul.msk.f32.gmra.mxu1 %vm348_vm0, %v335_v31 }
 0x108   : > { %1974 = vmatmul.msk.f32.gmra.mxu3 %vm348_vm0, %v335_v31 }
 0x109   : > { %1990 = vmatmul.msk.f32.gmra.mxu0 %vm348_vm0, %v335_v31 }
 0x10a   : > { %1959 = vmatmul.msk.f32.gmra.mxu2 %vm348_vm0, %v336_v33 }
 0x10b   : > { %1943 = vmatmul.msk.f32.gmra.mxu1 %vm348_vm0, %v336_v33 }
 0x110   : > { %1975 = vmatmul.msk.f32.gmra.mxu3 %vm348_vm0, %v336_v33 }
 0x111   : > { %1991 = vmatmul.msk.f32.gmra.mxu0 %vm348_vm0, %v336_v33 }
 0x112   : > { %1960 = vmatmul.msk.f32.gmra.mxu2 %vm348_vm0, %v337_v34 }
 0x113   : > { %1944 = vmatmul.msk.f32.gmra.mxu1 %vm348_vm0, %v337_v34 }
 0x118   : > { %1976 = vmatmul.msk.f32.gmra.mxu3 %vm348_vm0, %v337_v34  ;;  %v479_v35 = vpop.f32.mrf.mxu1 }
 0x119   : > { %1992 = vmatmul.msk.f32.gmra.mxu0 %vm348_vm0, %v337_v34  ;;  %v849_v2 = vsel %vm841_vm1, %v479_v35, 0.0  ;;  %vm968_vm0 = vcmp.eq.s32.totalorder %v2531_v20, 3  ;;  %vm864_vm1 = vcmp.ne.s32.totalorder %v2491_v55, 255 }
 0x11d   : > { %v560_v36 = vpop.f32.mrf.mxu2 }
 0x11e   : > { %v2462_v37 = vpop.f32.mrf.mxu0  ;;  %v851_v5 = vsel %vm843_vm2, %v560_v36, 0.0  ;;  %vm966_vm2 = vcmp.eq.s32.totalorder %v2531_v20, 2 }
 0x11f   : > { %v800_v38 = vmax.f32 %v560_v36, %v2462_v37  ;;  %v857_v17 = vadd.f32 %v851_v5, %v849_v2  ;;  %v855_v18 = vsel %vm847_vm4, %v2462_v37, 0.0 }
 0x120   : > { %v482_v41 = vpop.f32.mrf.mxu1 }
 0x121   : > { %v850_v10 = vsel %vm842_vm5, %v482_v41, 0.0 }
 0x123   : > { %v2465_v39 = vpop.f32.mrf.mxu3 }
 0x124   : > { %v799_v40 = vmax.f32 %v479_v35, %v2465_v39  ;;  %v853_v21 = vsel %vm845_vm3, %v2465_v39, 0.0 }
 0x125   : > { %v563_v42 = vpop.f32.mrf.mxu2 }
 0x126   : > { %v2469_v43 = vmax.f32 %v799_v40, %v800_v38  ;;  %v2471_v44 = vpop.f32.mrf.mxu0  ;;  %v852_v11 = vsel %vm844_vm6, %v563_v42, 0.0  ;;  %v1995_v40 = vsel %vm863_vm14, 1.0, %v2273_v32  ;;  %vm983_vm6 = vcmp.ne.s32.totalorder %v2501_v60, 255 }
 0x127   : > { %v803_v51 = vmax.f32 %v563_v42, %v2471_v44  ;;  %v860_v23 = vadd.f32 %v852_v11, %v850_v10 }
 0x128   : > { %v805_v45 = vsub.f32 %v479_v35, %v2469_v43  ;;  %v807_v46 = vsub.f32 %v560_v36, %v2469_v43  ;;  %v809_v47 = vsub.f32 %v2465_v39, %v2469_v43  ;;  %v811_v48 = vsub.f32 %v2462_v37, %v2469_v43  ;;  %v485_v62 = vpop.f32.mrf.mxu1 }
 0x129   : > { %v969_v28 = vsel %vm961_vm8, %v485_v62, 0.0  ;;  %v858_v36 = vadd.f32 %v857_v17, %v853_v21 }
 0x12a   : > { %v813_v49 = vmul.f32 1.442695, %v805_v45  ;;  %v817_v50 = vmul.f32 1.442695, %v807_v46  ;;  %v821_v53 = vmul.f32 1.442695, %v809_v47 }
 0x12b   : > { %v645_v54 = vpop.f32.mrf.mxu3  ;;  %v825_v57 = vmul.f32 1.442695, %v811_v48  ;;  %v2562_v45 = vld [vmem:[%s2478_s27 + $0x20] sm:$0xff] }
 0x12c   : > { %2089 = vpow2.f32 %v813_v49  ;;  %v802_v56 = vmax.f32 %v482_v41, %v645_v54  ;;  %v854_v27 = vsel %vm846_vm7, %v645_v54, 0.0  ;;  %vm1082_vm3 = vcmp.eq.s32.totalorder %v2562_v45, 0 }
 0x12d   : > { %2091 = vpow2.f32 %v817_v50  ;;  %v2493_v58 = vpop.f32.mrf.mxu2  ;;  %v861_v47 = vadd.f32 %v860_v23, %v854_v27  ;;  %vm1084_vm4 = vcmp.eq.s32.totalorder %v2562_v45, 1  ;;  %vm1086_vm5 = vcmp.eq.s32.totalorder %v2562_v45, 2 }
 0x12e   : > { %v2498_v59 = vmax.f32 %v802_v56, %v803_v51  ;;  %v2503_v61 = vpop.f32.mrf.mxu0  ;;  %2093 = vpow2.f32 %v821_v53  ;;  %v971_v29 = vsel %vm963_vm10, %v2493_v58, 0.0  ;;  %vm984_vm7 = vcmp.ne.s32.totalorder %v2531_v20, 255 }
 0x12f   : > { %2095 = vpow2.f32 %v825_v57  ;;  %v920_v8 = vmax.f32 %v2493_v58, %v2503_v61  ;;  %v977_v48 = vadd.f32 %v971_v29, %v969_v28  ;;  %vm1088_vm8 = vcmp.eq.s32.totalorder %v2562_v45, 3 }
 0x130   : > { %v806_v63 = vsub.f32 %v482_v41, %v2498_v59  ;;  %v808_v0 = vsub.f32 %v563_v42, %v2498_v59  ;;  %v810_v1 = vsub.f32 %v645_v54, %v2498_v59  ;;  %v812_v3 = vsub.f32 %v2471_v44, %v2498_v59  ;;  %v488_v38 = vpop.f32.mrf.mxu1 }
 0x131   : > { %v970_v21 = vsel %vm962_vm13, %v488_v38, 0.0 }
 0x132   : > { %v2090_v4 = vpop.eup %2089  ;;  %v815_v6 = vmul.f32 1.442695, %v806_v63  ;;  %v819_v7 = vmul.f32 1.442695, %v808_v0  ;;  %v823_v12 = vmul.f32 1.442695, %v810_v1 }
 0x133   : > { %v2092_v9 = vpop.eup %2091  ;;  %v648_v13 = vpop.f32.mrf.mxu3  ;;  %v827_v19 = vmul.f32 1.442695, %v812_v3  ;;  %v856_v0 = vsel %vm848_vm9, %v2471_v44, 0.0  ;;  %v1996_v1 = vsel %vm864_vm1, 1.0, %v2273_v32  ;;  %v975_v44 = vsel %vm967_vm12, %v2503_v61, 0.0 }
 0x134   : > { %v829_v14 = vadd.f32 %v2092_v9, %v2090_v4  ;;  %2097 = vpow2.f32 %v815_v6  ;;  %v919_v15 = vmax.f32 %v485_v62, %v648_v13  ;;  %v2094_v16 = vpop.eup %2093  ;;  %v2582_v3 = vadd.f32 %v861_v47, %v856_v0 }
 0x135   : > { %2099 = vpow2.f32 %v819_v7  ;;  %v2096_v26 = vpop.eup %2095  ;;  %v2547_v30 = vpop.f32.mrf.mxu2  ;;  %v899_v4 = vadd.f32 %v1996_v1, %v1995_v40 }
 0x136   : > { %v830_v22 = vadd.f32 %v2094_v16, %v829_v14  ;;  %v2536_v24 = vmax.f32 %v919_v15, %v920_v8  ;;  %v2538_v25 = vpop.f32.mrf.mxu0  ;;  %2101 = vpow2.f32 %v823_v12  ;;  %v972_v29 = vsel %vm964_vm15, %v2547_v30, 0.0 }
 0x137   : > { %2103 = vpow2.f32 %v827_v19  ;;  %v923_v51 = vmax.f32 %v2547_v30, %v2538_v25  ;;  %v900_v11 = vrot.slane %v899_v4, 4  ;;  %v980_v1 = vadd.f32 %v972_v29, %v970_v21 }
 0x138   : > { %v831_v31 = vadd.f32 %v2096_v26, %v830_v22  ;;  %v925_v33 = vsub.f32 %v485_v62, %v2536_v24  ;;  %v927_v34 = vsub.f32 %v2493_v58, %v2536_v24  ;;  %v929_v35 = vsub.f32 %v648_v13, %v2536_v24  ;;  %v491_v26 = vpop.f32.mrf.mxu1 }
 0x139   : > { %v931_v37 = vsub.f32 %v2503_v61, %v2536_v24  ;;  %v973_v58 = vsel %vm965_vm11, %v648_v13, 0.0  ;;  %v859_v62 = vadd.f32 %v858_v36, %v855_v18  ;;  %vm1104_vm15 = vcmp.ne.s32.totalorder %v2562_v45, 255 }
 0x13a   : > { %v2098_v39 = vpop.eup %2097  ;;  %2105 = vlog2.f32 %v831_v31  ;;  %v933_v41 = vmul.f32 1.442695, %v925_v33  ;;  %v937_v42 = vmul.f32 1.442695, %v927_v34  ;;  %v941_v49 = vmul.f32 1.442695, %v929_v35 }
 0x13b   : > { %v2100_v46 = vpop.eup %2099  ;;  %v2564_v50 = vpop.f32.mrf.mxu3  ;;  %v945_v54 = vmul.f32 1.442695, %v931_v37  ;;  %v978_v9 = vadd.f32 %v977_v48, %v973_v58  ;;  %v901_v35 = vadd.f32 %v900_v11, %v899_v4  ;;  %v2003_v58 = vsel %vm983_vm6, 1.0, %v2273_v32 }
 0x13c   : > { %v832_v53 = vadd.f32 %v2100_v46, %v2098_v39  ;;  %2107 = vpow2.f32 %v933_v41  ;;  %v922_v56 = vmax.f32 %v488_v38, %v2564_v50  ;;  %v2102_v57 = vpop.eup %2101  ;;  %v2623_v41 = vsel %vm968_vm0, %v2538_v25, 0.0 }
 0x13d   : > { %2109 = vpow2.f32 %v937_v42  ;;  %v2104_v2 = vpop.eup %2103  ;;  %v572_v14 = vpop.f32.mrf.mxu2  ;;  %v2613_v39 = vadd.f32 %v978_v9, %v975_v44  ;;  %v1090_v42 = vsel %vm1082_vm3, %v491_v26, 0.0  ;;  %v974_v48 = vsel %vm966_vm2, %v2564_v50, 0.0 }
 0x13e   : > { %v833_v63 = vadd.f32 %v2102_v57, %v832_v53  ;;  %2111 = vpow2.f32 %v941_v49  ;;  %v2584_v5 = vmax.f32 %v922_v56, %v923_v51  ;;  %v2586_v6 = vpop.f32.mrf.mxu0  ;;  %v902_v51 = vrot.slane %v901_v35, 2 }
 0x13f   : > { %2113 = vpow2.f32 %v945_v54  ;;  %v1041_v18 = vmax.f32 %v572_v14, %v2586_v6 }
 0x140   : > { %v2106_v7 = vpop.eup %2105  ;;  %v834_v8 = vadd.f32 %v2104_v2, %v833_v63  ;;  %v926_v12 = vsub.f32 %v488_v38, %v2584_v5  ;;  %v928_v13 = vsub.f32 %v2547_v30, %v2584_v5  ;;  %v930_v16 = vsub.f32 %v2564_v50, %v2584_v5  ;;  %v2645_v63 = vld [vmem:[%s2478_s27 + $0x28] sm:$0xff] }
 0x141   : > { %v836_v10 = vmul.f32 0.6931472, %v2106_v7  ;;  %v932_v17 = vsub.f32 %v2538_v25, %v2584_v5  ;;  %v1092_v25 = vsel %vm1084_vm4, %v572_v14, 0.0  ;;  %v903_v11 = vadd.f32 %v902_v51, %v901_v35 }
 0x142   : > { %v2108_v15 = vpop.eup %2107  ;;  %2115 = vlog2.f32 %v834_v8  ;;  %v935_v22 = vmul.f32 1.442695, %v926_v12  ;;  %v939_v23 = vmul.f32 1.442695, %v928_v13  ;;  %v943_v31 = vmul.f32 1.442695, %v930_v16 }
 0x143   : > { %v2110_v61 = vpop.eup %2109  ;;  %v839_v19 = vadd.f32 %v836_v10, %v2469_v43  ;;  %v654_v27 = vpop.f32.mrf.mxu3  ;;  %v947_v36 = vmul.f32 1.442695, %v932_v17  ;;  %vm1083_vm10 = vcmp.eq.s32.totalorder %v2645_v63, 0  ;;  %vm1085_vm11 = vcmp.eq.s32.totalorder %v2645_v63, 1 }
 0x144   : > { %v949_v28 = vadd.f32 %v2110_v61, %v2108_v15  ;;  %v1040_v33 = vmax.f32 %v491_v26, %v654_v27  ;;  %v2112_v34 = vpop.eup %2111  ;;  %2117 = vpow2.f32 %v935_v22  ;;  %v1094_v12 = vsel %vm1086_vm5, %v654_v27, 0.0 }
 0x145   : > { %v865_v43 = vsub.f32 %v839_v19, %v859_v62  ;;  %v2114_v37 = vpop.eup %2113  ;;  %2119 = vpow2.f32 %v939_v23  ;;  %v575_v61 = vpop.f32.mrf.mxu2  ;;  %vm1087_vm13 = vcmp.eq.s32.totalorder %v2645_v63, 2  ;;  %vm1105_vm4 = vcmp.ne.s32.totalorder %v2645_v63, 255 }
 0x146   : > { %v950_v38 = vadd.f32 %v2112_v34, %v949_v28  ;;  %v2615_v30 = vmax.f32 %v1040_v33, %v1041_v18  ;;  %2121 = vpow2.f32 %v943_v31  ;;  %v2650_v44 = vpop.f32.mrf.mxu0  ;;  %v494_v18 = vpop.f32.mrf.mxu1  ;;  %v2004_v31 = vsel %vm984_vm7, 1.0, %v2273_v32 }
 0x147   : > { %v867_v40 = vsel %vm863_vm14, %v865_v43, 0.0  ;;  %2123 = vpow2.f32 %v947_v36  ;;  %v1044_v22 = vmax.f32 %v575_v61, %v2650_v44  ;;  %v981_v43 = vadd.f32 %v980_v1, %v974_v48 }
 0x148   : > { %v2116_v46 = vpop.eup %2115  ;;  %869 = vst [vmem:[%s2611_s30] sm:$0xff] %v867_v40  ;;  %v951_v47 = vadd.f32 %v2114_v37, %v950_v38  ;;  %v1046_v52 = vsub.f32 %v491_v26, %v2615_v30  ;;  %v1048_v53 = vsub.f32 %v572_v14, %v2615_v30  ;;  %v1050_v54 = vsub.f32 %v654_v27, %v2615_v30 }
 0x149   : > { %v838_v49 = vmul.f32 0.6931472, %v2116_v46  ;;  %v1052_v56 = vsub.f32 %v2586_v6, %v2615_v30  ;;  %vm871_vm9 = vcmp.gt.f32.partialorder %v867_v40, 0.35667494  ;;  %v1020_v35 = vadd.f32 %v2004_v31, %v2003_v58 }
 0x14a   : > { %2125 = vlog2.f32 %v951_v47  ;;  %v2118_v57 = vpop.eup %2117  ;;  %v1054_v62 = vmul.f32 1.442695, %v1046_v52  ;;  %v1058_v2 = vmul.f32 1.442695, %v1048_v53  ;;  %v1062_v4 = vmul.f32 1.442695, %v1050_v54 }
 0x14b   : > { %v840_v50 = vadd.f32 %v838_v49, %v2498_v59  ;;  %v2120_v0 = vpop.eup %2119  ;;  %v1098_v59 = vadd.f32 %v1092_v25, %v1090_v42  ;;  %v2648_v9 = vpop.f32.mrf.mxu3  ;;  %v1066_v13 = vmul.f32 1.442695, %v1052_v56  ;;  %v1993_v15 = vsel %vm871_vm9, 1.0, %v2273_v32 }
 0x14c   : > { %v952_v8 = vadd.f32 %v2120_v0, %v2118_v57  ;;  %2127 = vpow2.f32 %v1054_v62  ;;  %v2122_v10 = vpop.eup %2121  ;;  %v1043_v21 = vmax.f32 %v494_v18, %v2648_v9  ;;  %v904_v38 = vrot.slane %v903_v11, 1 }
 0x14d   : > { %v866_v7 = vsub.f32 %v840_v50, %v2582_v3  ;;  %2129 = vpow2.f32 %v1058_v2  ;;  %v2124_v14 = vpop.eup %2123  ;;  %v873_v3 = vsel %vm871_vm9, %v867_v40, 0.0  ;;  %v1099_v40 = vadd.f32 %v1098_v59, %v1094_v12 }
 0x14e   : > { %v953_v17 = vadd.f32 %v2122_v10, %v952_v8  ;;  %2131 = vpow2.f32 %v1062_v4  ;;  %v2670_v42 = vmax.f32 %v1043_v21, %v1044_v22  ;;  %v1021_v47 = vrot.slane %v1020_v35, 4  ;;  %v497_v22 = vpop.f32.mrf.mxu1 }
 0x14f   : > { %v868_v16 = vsel %vm864_vm1, %v866_v7, 0.0  ;;  %2133 = vpow2.f32 %v1066_v13  ;;  %vm1089_vm14 = vcmp.eq.s32.totalorder %v2645_v63, 3  ;;  %v1096_v48 = vsel %vm1088_vm8, %v2586_v6, 0.0  ;;  %v2694_v13 = vld [vmem:[%s2478_s27 + $0x30] sm:$0xff] }
 0x150   : > { %v2126_v19 = vpop.eup %2125  ;;  %870 = vst [vmem:[%s2611_s30 + $0x8] sm:$0xff] %v868_v16  ;;  %vm872_vm12 = vcmp.gt.f32.partialorder %v868_v16, 0.35667494  ;;  %v954_v28 = vadd.f32 %v2124_v14, %v953_v17  ;;  %v1047_v51 = vsub.f32 %v494_v18, %v2670_v42  ;;  %v1049_v25 = vsub.f32 %v575_v61, %v2670_v42 }
 0x151   : > { %v874_v23 = vsel %vm872_vm12, %v868_v16, 0.0  ;;  %v1994_v26 = vsel %vm872_vm12, 1.0, %v2273_v32  ;;  %v956_v27 = vmul.f32 0.6931472, %v2126_v19  ;;  %v1022_v54 = vadd.f32 %v1021_v47, %v1020_v35 }
 0x152   : > { %v875_v55 = vadd.f32 %v874_v23, %v873_v3  ;;  %v887_v29 = vadd.f32 %v1994_v26, %v1993_v15  ;;  %v2128_v33 = vpop.eup %2127  ;;  %2135 = vlog2.f32 %v954_v28  ;;  %v1051_v56 = vsub.f32 %v2648_v9, %v2670_v42 }
 0x153   : > { %v959_v34 = vadd.f32 %v956_v27, %v2536_v24  ;;  %v2130_v36 = vpop.eup %2129  ;;  %v905_v58 = vadd.f32 %v904_v38, %v903_v11  ;;  %v982_v62 = vadd.f32 %v981_v43, %v2623_v41  ;;  %v2685_v6 = vadd.f32 %v1099_v40, %v1096_v48  ;;  %v2698_v15 = vpop.f32.mrf.mxu3 }
 0x154   : > { %v876_v37 = vrot.slane %v875_v55, 4  ;;  %v1070_v52 = vadd.f32 %v2130_v36, %v2128_v33  ;;  %v2132_v49 = vpop.eup %2131  ;;  %v888_v24 = vrot.slane %v887_v29, 4  ;;  %v1023_v1 = vrot.slane %v1022_v54, 2  ;;  %v578_v27 = vpop.f32.mrf.mxu2 }
 0x155   : > { %v985_v46 = vsub.f32 %v959_v34, %v2613_v39  ;;  %v2134_v57 = vpop.eup %2133  ;;  %v1091_v60 = vsel %vm1083_vm10, %v494_v18, 0.0  ;;  %v1053_v4 = vsub.f32 %v2650_v44, %v2670_v42  ;;  %v1093_v59 = vsel %vm1085_vm11, %v575_v61, 0.0  ;;  %v2700_v18 = vpop.f32.mrf.mxu0 }
 0x156   : > { %v1071_v39 = vadd.f32 %v2132_v49, %v1070_v52  ;;  %v877_v50 = vadd.f32 %v876_v37, %v875_v55  ;;  %v889_v7 = vadd.f32 %v888_v24, %v887_v29  ;;  %v1056_v10 = vmul.f32 1.442695, %v1047_v51 }
 0x157   : > { %v987_v53 = vsel %vm983_vm6, %v985_v46, 0.0  ;;  %v1024_v11 = vadd.f32 %v1023_v1, %v1022_v54  ;;  %v1060_v41 = vmul.f32 1.442695, %v1049_v25  ;;  %v1064_v12 = vmul.f32 1.442695, %v1051_v56 }
 0x158   : > { %1999 = vst [vmem:[%s2611_s30 + $0x10] sm:$0xff] %v987_v53  ;;  %v2136_v0 = vpop.eup %2135  ;;  %v1072_v2 = vadd.f32 %v2134_v57, %v1071_v39  ;;  %v878_v14 = vrot.slane %v877_v50, 2  ;;  %vm992_vm0 = vcmp.gt.f32.partialorder %v987_v53, 0.35667494  ;;  %v1068_v17 = vmul.f32 1.442695, %v1053_v4 }
 0x159   : > { %v958_v8 = vmul.f32 0.6931472, %v2136_v0  ;;  %v1025_v16 = vrot.slane %v1024_v11, 1  ;;  %v890_v61 = vrot.slane %v889_v7, 2  ;;  %v2702_v21 = vadd.f32 %v1093_v59, %v1091_v60 }
 0x15a   : > { %2137 = vlog2.f32 %v1072_v2  ;;  %vm1203_vm1 = vcmp.eq.s32.totalorder %v2694_v13, 0  ;;  %v2713_v26 = vsel %vm1089_vm14, %v2650_v44, 0.0  ;;  %vm1205_vm2 = vcmp.eq.s32.totalorder %v2694_v13, 1 }
 0x15b   : > { %v960_v3 = vadd.f32 %v958_v8, %v2584_v5  ;;  %2139 = vpow2.f32 %v1056_v10  ;;  %v2707_v5 = vsel %vm1087_vm13, %v2648_v9, 0.0  ;;  %v1026_v23 = vadd.f32 %v1025_v16, %v1024_v11  ;;  %v2755_v16 = vpop.f32.mrf.mxu3 }
 0x15c   : > { %2141 = vpow2.f32 %v1060_v41  ;;  %v1161_v28 = vmax.f32 %v497_v22, %v2698_v15  ;;  %v879_v55 = vadd.f32 %v878_v14, %v877_v50  ;;  %v994_v29 = vsel %vm992_vm0, %v987_v53, 0.0 }
 0x15d   : > { %v986_v19 = vsub.f32 %v960_v3, %v982_v62  ;;  %2143 = vpow2.f32 %v1064_v12  ;;  %v1162_v31 = vmax.f32 %v578_v27, %v2700_v18  ;;  %v2001_v34 = vsel %vm992_vm0, 1.0, %v2273_v32 }
 0x15e   : > { %v2724_v44 = vadd.f32 %v1026_v23, %v905_v58  ;;  %2145 = vpow2.f32 %v1068_v17  ;;  %v891_v35 = vadd.f32 %v890_v61, %v889_v7  ;;  %v2011_v47 = vsel %vm1104_vm15, 1.0, %v2273_v32 }
 0x15f   : > { %v988_v9 = vsel %vm984_vm7, %v986_v19, 0.0  ;;  %v2730_v52 = vmax.f32 %v1161_v28, %v1162_v31  ;;  %v880_v49 = vrot.slane %v879_v55, 1  ;;  %v1211_v11 = vsel %vm1203_vm1, %v497_v22, 0.0 }
 0x160   : > { %v2138_v33 = vpop.eup %2137  ;;  %2000 = vst [vmem:[%s2611_s30 + $0x18] sm:$0xff] %v988_v9  ;;  %vm993_vm3 = vcmp.gt.f32.partialorder %v988_v9, 0.35667494  ;;  %v892_v56 = vrot.slane %v891_v35, 1  ;;  %v1213_v45 = vsel %vm1205_vm2, %v578_v27, 0.0  ;;  %vm1207_vm5 = vcmp.eq.s32.totalorder %v2694_v13, 2 }
 0x161   : > { %v2140_v43 = vpop.eup %2139  ;;  %v995_v36 = vsel %vm993_vm3, %v988_v9, 0.0  ;;  %v2002_v37 = vsel %vm993_vm3, 1.0, %v2273_v32  ;;  %v1077_v38 = vmul.f32 0.6931472, %v2138_v33  ;;  %v1167_v54 = vsub.f32 %v497_v22, %v2730_v52  ;;  %v2759_v9 = vpop.f32.mrf.mxu0 }
 0x162   : > { %v2142_v40 = vpop.eup %2141  ;;  %v996_v20 = vadd.f32 %v995_v36, %v994_v29  ;;  %v1008_v46 = vadd.f32 %v2002_v37, %v2001_v34  ;;  %v1169_v39 = vsub.f32 %v578_v27, %v2730_v52  ;;  %v1171_v58 = vsub.f32 %v2698_v15, %v2730_v52  ;;  %v500_v29 = vpop.f32.mrf.mxu1 }
 0x163   : > { %v1080_v24 = vadd.f32 %v1077_v38, %v2615_v30  ;;  %v1073_v48 = vadd.f32 %v2142_v40, %v2140_v43  ;;  %v2144_v51 = vpop.eup %2143  ;;  %v1173_v1 = vsub.f32 %v2700_v18, %v2730_v52  ;;  %v1175_v2 = vmul.f32 1.442695, %v1167_v54  ;;  %v2767_v43 = vld [vmem:[%s2478_s27 + $0x38] sm:$0xff] }
 0x164   : > { %v997_v25 = vrot.slane %v996_v20, 4  ;;  %v1009_v53 = vrot.slane %v1008_v46, 4  ;;  %v2146_v62 = vpop.eup %2145  ;;  %v1179_v7 = vmul.f32 1.442695, %v1169_v39  ;;  %v1183_v41 = vmul.f32 1.442695, %v1171_v58 }
 0x165   : > { %v1106_v57 = vsub.f32 %v1080_v24, %v2685_v6  ;;  %v1074_v50 = vadd.f32 %v2144_v51, %v1073_v48  ;;  %v2012_v6 = vsel %vm1105_vm4, 1.0, %v2273_v32  ;;  %v881_v17 = vadd.f32 %v880_v49, %v879_v55 }
 0x166   : > { %v998_v30 = vadd.f32 %v997_v25, %v996_v20  ;;  %v1010_v0 = vadd.f32 %v1009_v53, %v1008_v46  ;;  %v1141_v10 = vadd.f32 %v2012_v6, %v2011_v47  ;;  %v1102_v61 = vadd.f32 %v2702_v21, %v2707_v5  ;;  %v2796_v6 = vpop.f32.mrf.mxu3 }
 0x167   : > { %v2743_v60 = vsel %vm1104_vm15, %v1106_v57, 0.0  ;;  %v1075_v4 = vadd.f32 %v2146_v62, %v1074_v50  ;;  %v1187_v19 = vmul.f32 1.442695, %v1173_v1  ;;  %v893_v22 = vadd.f32 %v892_v56, %v891_v35  ;;  %v581_v35 = vpop.f32.mrf.mxu2 }
 0x168   : > { %v999_v8 = vrot.slane %v998_v30, 2  ;;  %v1011_v59 = vrot.slane %v1010_v0, 2  ;;  %2007 = vst [vmem:[%s2611_s30 + $0x20] sm:$0xff] %v2743_v60  ;;  %v1142_v3 = vrot.slane %v1141_v10, 4  ;;  %v1219_v31 = vadd.f32 %v1213_v45, %v1211_v11 }
 0x169   : > { %2147 = vlog2.f32 %v1075_v4  ;;  %v1215_v33 = vsel %vm1207_vm5, %v2698_v15, 0.0  ;;  %v1164_v55 = vmax.f32 %v500_v29, %v2755_v16  ;;  %vm1209_vm6 = vcmp.eq.s32.totalorder %v2694_v13, 3  ;;  %v2807_v45 = vpop.f32.mrf.mxu0 }
 0x16a   : > { %v1000_v12 = vadd.f32 %v999_v8, %v998_v30  ;;  %v1012_v14 = vadd.f32 %v1011_v59, %v1010_v0  ;;  %2149 = vpow2.f32 %v1175_v2  ;;  %v1143_v27 = vadd.f32 %v1142_v3, %v1141_v10  ;;  %v503_v11 = vpop.f32.mrf.mxu1 }
 0x16b   : > { %2151 = vpow2.f32 %v1179_v7  ;;  %vm1113_vm7 = vcmp.gt.f32.partialorder %v2743_v60, 0.35667494  ;;  %v1103_v37 = vadd.f32 %v1102_v61, %v2713_v26  ;;  %v1165_v38 = vmax.f32 %v581_v35, %v2759_v9 }
 0x16c   : > { %v1001_v23 = vrot.slane %v1000_v12, 1  ;;  %v1013_v28 = vrot.slane %v1012_v14, 1  ;;  %2153 = vpow2.f32 %v1183_v41  ;;  %v1144_v5 = vrot.slane %v1143_v27, 2 }
 0x16d   : > { %2155 = vpow2.f32 %v1187_v19  ;;  %v1220_v24 = vadd.f32 %v1219_v31, %v1215_v33  ;;  %v1217_v48 = vsel %vm1209_vm6, %v2700_v18, 0.0  ;;  %vm1204_vm8 = vcmp.eq.s32.totalorder %v2767_v43, 0  ;;  %v2813_v19 = vld [vmem:[%s2478_s27 + $0x40] sm:$0xff] }
 0x16e   : > { %v1002_v34 = vadd.f32 %v1001_v23, %v1000_v12  ;;  %v1014_v21 = vadd.f32 %v1013_v28, %v1012_v14  ;;  %v1145_v47 = vadd.f32 %v1144_v5, %v1143_v27  ;;  %v2778_v51 = vmax.f32 %v1164_v55, %v1165_v38 }
 0x16f   : > { %v2148_v36 = vpop.eup %2147  ;;  %v1115_v26 = vsel %vm1113_vm7, %v2743_v60, 0.0  ;;  %vm1206_vm9 = vcmp.eq.s32.totalorder %v2767_v43, 1  ;;  %v2009_v50 = vsel %vm1113_vm7, 1.0, %v2273_v32  ;;  %v1212_v0 = vsel %vm1204_vm8, %v500_v29, 0.0 }
 0x170   : > { %v2150_v15 = vpop.eup %2149  ;;  %v2772_v40 = vadd.f32 %v1002_v34, %v881_v17  ;;  %v2774_v20 = vadd.f32 %v1014_v21, %v893_v22  ;;  %v1079_v46 = vmul.f32 0.6931472, %v2148_v36  ;;  %v1146_v53 = vrot.slane %v1145_v47, 1  ;;  %v584_v17 = vpop.f32.mrf.mxu2 }
 0x171   : > { %v2152_v49 = vpop.eup %2151  ;;  %v1168_v56 = vsub.f32 %v500_v29, %v2778_v51  ;;  %v1170_v57 = vsub.f32 %v581_v35, %v2778_v51  ;;  %v1172_v18 = vsub.f32 %v2755_v16, %v2778_v51  ;;  %v1174_v1 = vsub.f32 %v2759_v9, %v2778_v51 }
 0x172   : > { %v1081_v25 = vadd.f32 %v1079_v46, %v2670_v42  ;;  %v1191_v54 = vadd.f32 %v2152_v49, %v2150_v15  ;;  %v2154_v39 = vpop.eup %2153  ;;  %v1147_v62 = vadd.f32 %v1146_v53, %v1145_v47  ;;  %v1214_v59 = vsel %vm1206_vm9, %v581_v35, 0.0 }
 0x173   : > { %v2156_v30 = vpop.eup %2155  ;;  %v1177_v2 = vmul.f32 1.442695, %v1168_v56  ;;  %v1181_v4 = vmul.f32 1.442695, %v1170_v57  ;;  %vm1208_vm11 = vcmp.eq.s32.totalorder %v2767_v43, 2  ;;  %v1221_v61 = vadd.f32 %v1220_v24, %v1217_v48 }
 0x174   : > { %v1107_v58 = vsub.f32 %v1081_v25, %v1103_v37  ;;  %v1192_v42 = vadd.f32 %v2154_v39, %v1191_v54  ;;  %v2801_v60 = vadd.f32 %v1147_v62, %v2724_v44  ;;  %v1185_v10 = vmul.f32 1.442695, %v1172_v18 }
 0x175   : > { %2157 = vpow2.f32 %v1177_v2  ;;  %v1282_v44 = vmax.f32 %v503_v11, %v2796_v6  ;;  %v1189_v3 = vmul.f32 1.442695, %v1174_v1  ;;  %vm1225_vm12 = vcmp.ne.s32.totalorder %v2694_v13, 255  ;;  %v506_v2 = vpop.f32.mrf.mxu1 }
 0x176   : > { %v1109_v7 = vsel %vm1105_vm4, %v1107_v58, 0.0  ;;  %v1193_v8 = vadd.f32 %v2156_v30, %v1192_v42  ;;  %v1283_v22 = vmax.f32 %v584_v17, %v2807_v45  ;;  %v2019_v27 = vsel %vm1225_vm12, 1.0, %v2273_v32 }
 0x177   : > { %2008 = vst [vmem:[%s2611_s30 + $0x28] sm:$0xff] %v1109_v7  ;;  %vm1114_vm10 = vcmp.gt.f32.partialorder %v1109_v7, 0.35667494  ;;  %v1222_v29 = vadd.f32 %v1214_v59, %v1212_v0  ;;  %v1216_v31 = vsel %vm1208_vm11, %v2755_v16, 0.0  ;;  %vm1226_vm13 = vcmp.ne.s32.totalorder %v2767_v43, 255 }
 0x178   : > { %v1116_v41 = vsel %vm1114_vm10, %v1109_v7, 0.0  ;;  %v2010_v63 = vsel %vm1114_vm10, 1.0, %v2273_v32  ;;  %2159 = vlog2.f32 %v1193_v8  ;;  %v2823_v33 = vmax.f32 %v1282_v44, %v1283_v22 }
 0x179   : > { %v1117_v12 = vadd.f32 %v1116_v41, %v1115_v26  ;;  %v1129_v14 = vadd.f32 %v2010_v63, %v2009_v50  ;;  %2161 = vpow2.f32 %v1181_v4  ;;  %vm1324_vm14 = vcmp.eq.s32.totalorder %v2813_v19, 0  ;;  %v2839_v50 = vpop.f32.mrf.mxu3  ;;  %v2844_v4 = vpop.f32.mrf.mxu0 }
 0x17a   : > { %2163 = vpow2.f32 %v1185_v10  ;;  %vm1326_vm15 = vcmp.eq.s32.totalorder %v2813_v19, 1  ;;  %v1288_v35 = vsub.f32 %v503_v11, %v2823_v33  ;;  %v1290_v36 = vsub.f32 %v584_v17, %v2823_v33 }
 0x17b   : > { %v1118_v23 = vrot.slane %v1117_v12, 4  ;;  %v1130_v28 = vrot.slane %v1129_v14, 4  ;;  %v2158_v55 = vpop.eup %2157  ;;  %2165 = vpow2.f32 %v1189_v3  ;;  %v1292_v16 = vsub.f32 %v2796_v6, %v2823_v33 }
 0x17c   : > { %v1294_v47 = vsub.f32 %v2807_v45, %v2823_v33  ;;  %v1296_v24 = vmul.f32 1.442695, %v1288_v35  ;;  %v1300_v48 = vmul.f32 1.442695, %v1290_v36  ;;  %v1332_v56 = vsel %vm1324_vm14, %v503_v11, 0.0  ;;  %v2853_v11 = vpop.f32.mrf.mxu2 }
 0x17d   : > { %v1119_v34 = vadd.f32 %v1118_v23, %v1117_v12  ;;  %v1131_v21 = vadd.f32 %v1130_v28, %v1129_v14  ;;  %v1304_v26 = vmul.f32 1.442695, %v1292_v16  ;;  %v1334_v18 = vsel %vm1326_vm15, %v584_v17, 0.0 }
 0x17e   : > { %v2160_v5 = vpop.eup %2159  ;;  %vm1328_vm0 = vcmp.eq.s32.totalorder %v2813_v19, 2  ;;  %2167 = vpow2.f32 %v1296_v24  ;;  %v1308_v1 = vmul.f32 1.442695, %v1294_v47  ;;  %vm1210_vm1 = vcmp.eq.s32.totalorder %v2767_v43, 3  ;;  %v2885_v24 = vpop.f32.mrf.mxu1 }
 0x17f   : > { %v2162_v37 = vpop.eup %2161  ;;  %v1120_v38 = vrot.slane %v1119_v34, 2  ;;  %v1132_v15 = vrot.slane %v1131_v21, 2  ;;  %v1198_v46 = vmul.f32 0.6931472, %v2160_v5  ;;  %2169 = vpow2.f32 %v1300_v48 }
 0x180   : > { %v1194_v49 = vadd.f32 %v2162_v37, %v2158_v55  ;;  %v2164_v25 = vpop.eup %2163  ;;  %2171 = vpow2.f32 %v1304_v26  ;;  %v1285_v41 = vmax.f32 %v506_v2, %v2839_v50  ;;  %v1223_v12 = vadd.f32 %v1222_v29, %v1216_v31  ;;  %v2872_v55 = vld [vmem:[%s2478_s27 + $0x48] sm:$0xff] }
 0x181   : > { %v1121_v53 = vadd.f32 %v1120_v38, %v1119_v34  ;;  %v1133_v54 = vadd.f32 %v1132_v15, %v1131_v21  ;;  %v1201_v39 = vadd.f32 %v1198_v46, %v2730_v52  ;;  %v2166_v58 = vpop.eup %2165  ;;  %v2020_v52 = vsel %vm1226_vm13, 1.0, %v2273_v32  ;;  %v2887_v48 = vpop.f32.mrf.mxu0 }
 0x182   : > { %v1195_v57 = vadd.f32 %v2164_v25, %v1194_v49  ;;  %v1262_v10 = vadd.f32 %v2020_v52, %v2019_v27  ;;  %v1340_v13 = vadd.f32 %v1334_v18, %v1332_v56  ;;  %v1336_v17 = vsel %vm1328_vm0, %v2796_v6, 0.0 }
 0x183   : > { %v1122_v62 = vrot.slane %v1121_v53, 1  ;;  %v1134_v42 = vrot.slane %v1133_v54, 1  ;;  %v1227_v30 = vsub.f32 %v1201_v39, %v1221_v61  ;;  %v1286_v61 = vmax.f32 %v2853_v11, %v2844_v4 }
 0x184   : > { %v1196_v0 = vadd.f32 %v2166_v58, %v1195_v57  ;;  %v2168_v14 = vpop.eup %2167  ;;  %v1263_v3 = vrot.slane %v1262_v10, 4  ;;  %vm1330_vm2 = vcmp.eq.s32.totalorder %v2813_v19, 3  ;;  %v1341_v31 = vadd.f32 %v1340_v13, %v1336_v17  ;;  %v590_v56 = vpop.f32.mrf.mxu2 }
 0x185   : > { %v1123_v7 = vadd.f32 %v1122_v62, %v1121_v53  ;;  %v1135_v8 = vadd.f32 %v1134_v42, %v1133_v54  ;;  %v2848_v59 = vsel %vm1225_vm12, %v1227_v30, 0.0  ;;  %v2170_v22 = vpop.eup %2169  ;;  %v2869_v27 = vmax.f32 %v1285_v41, %v1286_v61 }
 0x186   : > { %2015 = vst [vmem:[%s2611_s30 + $0x30] sm:$0xff] %v2848_v59  ;;  %2173 = vlog2.f32 %v1196_v0  ;;  %v2172_v23 = vpop.eup %2171  ;;  %v1264_v28 = vadd.f32 %v1263_v3, %v1262_v10  ;;  %v1338_v16 = vsel %vm1330_vm2, %v2807_v45, 0.0  ;;  %vm1325_vm3 = vcmp.eq.s32.totalorder %v2872_v55, 0 }
 0x187   : > { %v2857_v63 = vadd.f32 %v1123_v7, %v2772_v40  ;;  %v2860_v44 = vadd.f32 %v1135_v8, %v2774_v20  ;;  %2175 = vpow2.f32 %v1308_v1  ;;  %v1218_v40 = vsel %vm1210_vm1, %v2759_v9, 0.0  ;;  %v2877_v9 = vpop.f32.mrf.mxu3 }
 0x188   : > { %v1312_v20 = vadd.f32 %v2170_v22, %v2168_v14  ;;  %v1224_v29 = vadd.f32 %v1223_v12, %v1218_v40  ;;  %v1265_v6 = vrot.slane %v1264_v28, 2  ;;  %v1289_v5 = vsub.f32 %v506_v2, %v2869_v27 }
 0x189   : > { %v1291_v35 = vsub.f32 %v2853_v11, %v2869_v27  ;;  %v1293_v37 = vsub.f32 %v2839_v50, %v2869_v27  ;;  %v1295_v38 = vsub.f32 %v2844_v4, %v2869_v27  ;;  %v1403_v53 = vmax.f32 %v2885_v24, %v2877_v9 }
 0x18a   : > { %v1313_v21 = vadd.f32 %v2172_v23, %v1312_v20  ;;  %v1266_v46 = vadd.f32 %v1265_v6, %v1264_v28  ;;  %v1298_v47 = vmul.f32 1.442695, %v1289_v5  ;;  %vm1234_vm4 = vcmp.gt.f32.partialorder %v2848_v59, 0.35667494 }
 0x18b   : > { %v1302_v49 = vmul.f32 1.442695, %v1291_v35  ;;  %v1306_v45 = vmul.f32 1.442695, %v1293_v37  ;;  %v1310_v39 = vmul.f32 1.442695, %v1295_v38  ;;  %v1342_v62 = vadd.f32 %v1341_v31, %v1338_v16 }
 0x18c   : > { %v2174_v34 = vpop.eup %2173  ;;  %v1267_v54 = vrot.slane %v1266_v46, 1  ;;  %2177 = vpow2.f32 %v1298_v47  ;;  %v1333_v18 = vsel %vm1325_vm3, %v506_v2, 0.0  ;;  %vm1327_vm5 = vcmp.eq.s32.totalorder %v2872_v55, 1  ;;  %v2912_v2 = vld [vmem:[%s2478_s27 + $0x50] sm:$0xff] }
 0x18d   : > { %v1200_v36 = vmul.f32 0.6931472, %v2174_v34  ;;  %v2176_v15 = vpop.eup %2175  ;;  %v1236_v42 = vsel %vm1234_vm4, %v2848_v59, 0.0  ;;  %v2017_v52 = vsel %vm1234_vm4, 1.0, %v2273_v32  ;;  %v1335_v3 = vsel %vm1327_vm5, %v2853_v11, 0.0 }
 0x18e   : > { %v1314_v25 = vadd.f32 %v2176_v15, %v1313_v21  ;;  %v1268_v58 = vadd.f32 %v1267_v54, %v1266_v46  ;;  %vm1445_vm7 = vcmp.eq.s32.totalorder %v2912_v2, 0  ;;  %vm1447_vm8 = vcmp.eq.s32.totalorder %v2912_v2, 1 }
 0x18f   : > { %v1202_v26 = vadd.f32 %v1200_v36, %v2778_v51  ;;  %v1404_v51 = vmax.f32 %v590_v56, %v2887_v48  ;;  %vm1346_vm9 = vcmp.ne.s32.totalorder %v2813_v19, 255  ;;  %vm1329_vm10 = vcmp.eq.s32.totalorder %v2872_v55, 2  ;;  %v2930_v38 = vpop.f32.mrf.mxu3 }
 0x190   : > { %2179 = vlog2.f32 %v1314_v25  ;;  %v2909_v1 = vadd.f32 %v1268_v58, %v2801_v60  ;;  %v1343_v15 = vadd.f32 %v1335_v3, %v1333_v18  ;;  %v1453_v47 = vsel %vm1445_vm7, %v2885_v24, 0.0 }
 0x191   : > { %v1228_v57 = vsub.f32 %v1202_v26, %v1224_v29  ;;  %2181 = vpow2.f32 %v1302_v49  ;;  %v2902_v0 = vmax.f32 %v1403_v53, %v1404_v51  ;;  %v2941_v53 = vpop.f32.mrf.mxu0  ;;  %vm1449_vm11 = vcmp.eq.s32.totalorder %v2912_v2, 2  ;;  %v593_v51 = vpop.f32.mrf.mxu2 }
 0x192   : > { %2183 = vpow2.f32 %v1306_v45  ;;  %v2178_v41 = vpop.eup %2177  ;;  %v512_v45 = vpop.f32.mrf.mxu1  ;;  %vm1331_vm12 = vcmp.eq.s32.totalorder %v2872_v55, 3  ;;  %vm1347_vm0 = vcmp.ne.s32.totalorder %v2872_v55, 255  ;;  %vm1467_vm2 = vcmp.ne.s32.totalorder %v2912_v2, 255 }
 0x193   : > { %v1230_v30 = vsel %vm1226_vm13, %v1228_v57, 0.0  ;;  %2185 = vpow2.f32 %v1310_v39  ;;  %v1409_v43 = vsub.f32 %v2885_v24, %v2902_v0  ;;  %v1411_v10 = vsub.f32 %v590_v56, %v2902_v0 }
 0x194   : > { %2016 = vst [vmem:[%s2611_s30 + $0x38] sm:$0xff] %v1230_v30  ;;  %vm1235_vm6 = vcmp.gt.f32.partialorder %v1230_v30, 0.35667494  ;;  %v1413_v13 = vsub.f32 %v2877_v9, %v2902_v0  ;;  %v1415_v60 = vsub.f32 %v2887_v48, %v2902_v0  ;;  %v1337_v24 = vsel %vm1329_vm10, %v2839_v50, 0.0 }
 0x195   : > { %v1237_v7 = vsel %vm1235_vm6, %v1230_v30, 0.0  ;;  %v2018_v8 = vsel %vm1235_vm6, 1.0, %v2273_v32  ;;  %v1417_v17 = vmul.f32 1.442695, %v1409_v43  ;;  %v1421_v61 = vmul.f32 1.442695, %v1411_v10 }
 0x196   : > { %v1238_v12 = vadd.f32 %v1237_v7, %v1236_v42  ;;  %v1250_v59 = vadd.f32 %v2018_v8, %v2017_v52  ;;  %v2180_v14 = vpop.eup %2179  ;;  %v1425_v20 = vmul.f32 1.442695, %v1413_v13  ;;  %v1429_v34 = vmul.f32 1.442695, %v1415_v60 }
 0x197   : > { %v2182_v22 = vpop.eup %2181  ;;  %v1319_v28 = vmul.f32 0.6931472, %v2180_v14  ;;  %2187 = vpow2.f32 %v1417_v17  ;;  %v1406_v39 = vmax.f32 %v512_v45, %v2930_v38  ;;  %v1407_v42 = vmax.f32 %v593_v51, %v2941_v53  ;;  %v2967_v17 = vld [vmem:[%s2478_s27 + $0x58] sm:$0xff] }
 0x198   : > { %v1239_v40 = vrot.slane %v1238_v12, 4  ;;  %v1251_v23 = vrot.slane %v1250_v59, 4  ;;  %v2184_v29 = vpop.eup %2183  ;;  %v1315_v31 = vadd.f32 %v2182_v22, %v2178_v41  ;;  %2189 = vpow2.f32 %v1421_v61 }
 0x199   : > { %v2186_v6 = vpop.eup %2185  ;;  %v1322_v11 = vadd.f32 %v1319_v28, %v2823_v33  ;;  %2191 = vpow2.f32 %v1425_v20  ;;  %v1455_v33 = vsel %vm1447_vm8, %v590_v56, 0.0  ;;  %v1344_v50 = vadd.f32 %v1343_v15, %v1337_v24  ;;  %v2976_v20 = vpop.f32.mrf.mxu3 }
 0x19a   : > { %v1240_v21 = vadd.f32 %v1239_v40, %v1238_v12  ;;  %v1252_v5 = vadd.f32 %v1251_v23, %v1250_v59  ;;  %v1316_v35 = vadd.f32 %v2184_v29, %v1315_v31  ;;  %2193 = vpow2.f32 %v1429_v34 }
 0x19b   : > { %v1348_v37 = vsub.f32 %v1322_v11, %v1342_v62  ;;  %v1461_v58 = vadd.f32 %v1455_v33, %v1453_v47  ;;  %v1457_v8 = vsel %vm1449_vm11, %v2877_v9, 0.0  ;;  %v2027_v43 = vsel %vm1346_vm9, 1.0, %v2273_v32 }
 0x19c   : > { %v1241_v36 = vrot.slane %v1240_v21, 2  ;;  %v1253_v16 = vrot.slane %v1252_v5, 2  ;;  %v1317_v46 = vadd.f32 %v2186_v6, %v1316_v35  ;;  %v2956_v41 = vmax.f32 %v1406_v39, %v1407_v42 }
 0x19d   : > { %v2939_v25 = vsel %vm1346_vm9, %v1348_v37, 0.0  ;;  %v2188_v54 = vpop.eup %2187  ;;  %v1339_v60 = vsel %vm1331_vm12, %v2844_v4, 0.0  ;;  %vm1451_vm13 = vcmp.eq.s32.totalorder %v2912_v2, 3  ;;  %v1462_v9 = vadd.f32 %v1461_v58, %v1457_v8 }
 0x19e   : > { %v1242_v49 = vadd.f32 %v1241_v36, %v1240_v21  ;;  %v1254_v26 = vadd.f32 %v1253_v16, %v1252_v5  ;;  %2023 = vst [vmem:[%s2611_s30 + $0x40] sm:$0xff] %v2939_v25  ;;  %2195 = vlog2.f32 %v1317_v46  ;;  %v2190_v56 = vpop.eup %2189  ;;  %v1410_v19 = vsub.f32 %v512_v45, %v2956_v41  ;;  %v2982_v21 = vpop.f32.mrf.mxu1 }
 0x19f   : > { %v1433_v62 = vadd.f32 %v2190_v56, %v2188_v54  ;;  %v2192_v30 = vpop.eup %2191  ;;  %v1412_v61 = vsub.f32 %v593_v51, %v2956_v41  ;;  %v1345_v40 = vadd.f32 %v1344_v50, %v1339_v60  ;;  %v1459_v4 = vsel %vm1451_vm13, %v2887_v48, 0.0  ;;  %v2984_v5 = vpop.f32.mrf.mxu0 }
 0x1a0   : > { %v1243_v57 = vrot.slane %v1242_v49, 1  ;;  %v1255_v18 = vrot.slane %v1254_v26, 1  ;;  %v2194_v12 = vpop.eup %2193  ;;  %v1419_v23 = vmul.f32 1.442695, %v1410_v19  ;;  %vm1446_vm14 = vcmp.eq.s32.totalorder %v2967_v17, 0  ;;  %v2991_v36 = vpop.f32.mrf.mxu2 }
 0x1a1   : > { %v1434_v10 = vadd.f32 %v2192_v30, %v1433_v62  ;;  %v1423_v28 = vmul.f32 1.442695, %v1412_v61  ;;  %vm1448_vm15 = vcmp.eq.s32.totalorder %v2967_v17, 1  ;;  %v1463_v34 = vadd.f32 %v1462_v9, %v1459_v4  ;;  %v3023_v4 = vpop.f32.mrf.mxu3 }
 0x1a2   : > { %v1244_v52 = vadd.f32 %v1243_v57, %v1242_v49  ;;  %v1256_v7 = vadd.f32 %v1255_v18, %v1254_v26  ;;  %vm1355_vm1 = vcmp.gt.f32.partialorder %v2939_v25, 0.35667494  ;;  %v2028_v11 = vsel %vm1347_vm0, 1.0, %v2273_v32 }
 0x1a3   : > { %v1435_v3 = vadd.f32 %v2194_v12, %v1434_v10  ;;  %v1454_v55 = vsel %vm1446_vm14, %v512_v45, 0.0  ;;  %v1456_v35 = vsel %vm1448_vm15, %v593_v51, 0.0  ;;  %vm1450_vm3 = vcmp.eq.s32.totalorder %v2967_v17, 2 }
 0x1a4   : > { %v2959_v59 = vadd.f32 %v1244_v52, %v2857_v63  ;;  %v2962_v13 = vadd.f32 %v1256_v7, %v2860_v44  ;;  %v2196_v14 = vpop.eup %2195  ;;  %v1414_v63 = vsub.f32 %v2930_v38, %v2956_v41  ;;  %v1416_v44 = vsub.f32 %v2941_v53, %v2956_v41 }
 0x1a5   : > { %v1321_v22 = vmul.f32 0.6931472, %v2196_v14  ;;  %2197 = vlog2.f32 %v1435_v3  ;;  %v1525_v37 = vmax.f32 %v2991_v36, %v2984_v5  ;;  %v1357_v46 = vsel %vm1355_vm1, %v2939_v25, 0.0  ;;  %v3015_v3 = vld [vmem:[%s2478_s27 + $0x60] sm:$0xff] }
 0x1a6   : > { %v1427_v31 = vmul.f32 1.442695, %v1414_v63  ;;  %2199 = vpow2.f32 %v1419_v23  ;;  %v1431_v6 = vmul.f32 1.442695, %v1416_v44  ;;  %v2025_v47 = vsel %vm1355_vm1, 1.0, %v2273_v32 }
 0x1a7   : > { %v1323_v29 = vadd.f32 %v1321_v22, %v2869_v27  ;;  %2201 = vpow2.f32 %v1423_v28  ;;  %v1524_v27 = vmax.f32 %v2982_v21, %v2976_v20  ;;  %v1383_v56 = vadd.f32 %v2028_v11, %v2027_v43 }
 0x1a8   : > { %2203 = vpow2.f32 %v1427_v31  ;;  %v1464_v57 = vadd.f32 %v1456_v35, %v1454_v55  ;;  %v1458_v52 = vsel %vm1450_vm3, %v2930_v38, 0.0  ;;  %vm1566_vm5 = vcmp.eq.s32.totalorder %v3015_v3, 0  ;;  %v518_v31 = vpop.f32.mrf.mxu1 }
 0x1a9   : > { %v1349_v48 = vsub.f32 %v1323_v29, %v1345_v40  ;;  %2205 = vpow2.f32 %v1431_v6  ;;  %v3000_v45 = vmax.f32 %v1524_v27, %v1525_v37  ;;  %v1384_v19 = vrot.slane %v1383_v56, 4 }
 0x1aa   : > { %v1465_v63 = vadd.f32 %v1464_v57, %v1458_v52  ;;  %vm1568_vm6 = vcmp.eq.s32.totalorder %v3015_v3, 1  ;;  %vm1452_vm7 = vcmp.eq.s32.totalorder %v2967_v17, 3  ;;  %v1574_v55 = vsel %vm1566_vm5, %v2982_v21, 0.0 }
 0x1ab   : > { %v1351_v16 = vsel %vm1347_vm0, %v1349_v48, 0.0  ;;  %v2198_v15 = vpop.eup %2197  ;;  %v1530_v25 = vsub.f32 %v2982_v21, %v3000_v45  ;;  %v1532_v58 = vsub.f32 %v2991_v36, %v3000_v45  ;;  %v1534_v62 = vsub.f32 %v2976_v20, %v3000_v45 }
 0x1ac   : > { %2024 = vst [vmem:[%s2611_s30 + $0x48] sm:$0xff] %v1351_v16  ;;  %vm1356_vm4 = vcmp.gt.f32.partialorder %v1351_v16, 0.35667494  ;;  %v1440_v26 = vmul.f32 0.6931472, %v2198_v15  ;;  %v2200_v54 = vpop.eup %2199  ;;  %v1536_v8 = vsub.f32 %v2984_v5, %v3000_v45  ;;  %v1385_v6 = vadd.f32 %v1384_v19, %v1383_v56 }
 0x1ad   : > { %v1358_v33 = vsel %vm1356_vm4, %v1351_v16, 0.0  ;;  %v2026_v49 = vsel %vm1356_vm4, 1.0, %v2273_v32  ;;  %v2202_v18 = vpop.eup %2201  ;;  %v1538_v43 = vmul.f32 1.442695, %v1530_v25  ;;  %v1542_v10 = vmul.f32 1.442695, %v1532_v58  ;;  %v599_v16 = vpop.f32.mrf.mxu2 }
 0x1ae   : > { %v1359_v24 = vadd.f32 %v1358_v33, %v1357_v46  ;;  %v1371_v39 = vadd.f32 %v2026_v49, %v2025_v47  ;;  %v1443_v51 = vadd.f32 %v1440_v26, %v2902_v0  ;;  %v1436_v7 = vadd.f32 %v2202_v18, %v2200_v54  ;;  %v2204_v50 = vpop.eup %2203 }
 0x1af   : > { %v2206_v12 = vpop.eup %2205  ;;  %2207 = vpow2.f32 %v1538_v43  ;;  %v1546_v38 = vmul.f32 1.442695, %v1534_v62  ;;  %v1550_v23 = vmul.f32 1.442695, %v1536_v8  ;;  %v1527_v48 = vmax.f32 %v518_v31, %v3023_v4 }
 0x1b0   : > { %v1360_v42 = vrot.slane %v1359_v24, 4  ;;  %v1372_v30 = vrot.slane %v1371_v39, 4  ;;  %v1469_v0 = vsub.f32 %v1443_v51, %v1463_v34  ;;  %v1437_v9 = vadd.f32 %v2204_v50, %v1436_v7  ;;  %v3028_v34 = vpop.f32.mrf.mxu0 }
 0x1b1   : > { %2209 = vpow2.f32 %v1542_v10  ;;  %v1576_v35 = vsel %vm1568_vm6, %v2991_v36, 0.0  ;;  %v1460_v15 = vsel %vm1452_vm7, %v2941_v53, 0.0  ;;  %vm1570_vm8 = vcmp.eq.s32.totalorder %v3015_v3, 2 }
 0x1b2   : > { %v1361_v60 = vadd.f32 %v1360_v42, %v1359_v24  ;;  %v1373_v14 = vadd.f32 %v1372_v30, %v1371_v39  ;;  %v3019_v61 = vsel %vm1467_vm2, %v1469_v0, 0.0  ;;  %v1438_v44 = vadd.f32 %v2206_v12, %v1437_v9  ;;  %v3041_v24 = vld [vmem:[%s2478_s27 + $0x68] sm:$0xff] }
 0x1b3   : > { %2031 = vst [vmem:[%s2611_s30 + $0x50] sm:$0xff] %v3019_v61  ;;  %v1528_v46 = vmax.f32 %v599_v16, %v3028_v34  ;;  %v2035_v49 = vsel %vm1467_vm2, 1.0, %v2273_v32  ;;  %v1466_v26 = vadd.f32 %v1465_v63, %v1460_v15  ;;  %v1386_v54 = vrot.slane %v1385_v6, 2 }
 0x1b4   : > { %v1362_v22 = vrot.slane %v1361_v60, 2  ;;  %v1374_v40 = vrot.slane %v1373_v14, 2  ;;  %2211 = vlog2.f32 %v1438_v44  ;;  %vm1468_vm9 = vcmp.ne.s32.totalorder %v2967_v17, 255 }
 0x1b5   : > { %2213 = vpow2.f32 %v1546_v38  ;;  %v2208_v37 = vpop.eup %2207  ;;  %v1582_v36 = vadd.f32 %v1576_v35, %v1574_v55  ;;  %v3043_v53 = vmax.f32 %v1527_v48, %v1528_v46  ;;  %v1578_v2 = vsel %vm1570_vm8, %v2976_v20, 0.0 }
 0x1b6   : > { %v1363_v28 = vadd.f32 %v1362_v22, %v1361_v60  ;;  %v1375_v29 = vadd.f32 %v1374_v40, %v1373_v14  ;;  %2215 = vpow2.f32 %v1550_v23  ;;  %v2036_v58 = vsel %vm1468_vm9, 1.0, %v2273_v32  ;;  %v3069_v14 = vpop.f32.mrf.mxu3  ;;  %v3082_v40 = vpop.f32.mrf.mxu1 }
 0x1b7   : > { %v2210_v21 = vpop.eup %2209  ;;  %v1531_v62 = vsub.f32 %v518_v31, %v3043_v53  ;;  %v1533_v42 = vsub.f32 %v599_v16, %v3043_v53  ;;  %vm1572_vm10 = vcmp.eq.s32.totalorder %v3015_v3, 3  ;;  %vm1567_vm11 = vcmp.eq.s32.totalorder %v3041_v24, 0 }
 0x1b8   : > { %v1364_v27 = vrot.slane %v1363_v28, 1  ;;  %v1376_v11 = vrot.slane %v1375_v29, 1  ;;  %v1554_v18 = vadd.f32 %v2210_v21, %v2208_v37  ;;  %v1537_v52 = vsub.f32 %v3028_v34, %v3043_v53  ;;  %v3084_v63 = vpop.f32.mrf.mxu0 }
 0x1b9   : > { %v1540_v7 = vmul.f32 1.442695, %v1531_v62  ;;  %v1544_v50 = vmul.f32 1.442695, %v1533_v42  ;;  %v3066_v0 = vadd.f32 %v1386_v54, %v1385_v6  ;;  %vm1476_vm12 = vcmp.gt.f32.partialorder %v3019_v61, 0.35667494 }
 0x1ba   : > { %v1365_v47 = vadd.f32 %v1364_v27, %v1363_v28  ;;  %v1377_v33 = vadd.f32 %v1376_v11, %v1375_v29  ;;  %v2212_v39 = vpop.eup %2211  ;;  %v1504_v8 = vadd.f32 %v2036_v58, %v2035_v49  ;;  %v1583_v12 = vadd.f32 %v1582_v36, %v1578_v2 }
 0x1bb   : > { %v2214_v51 = vpop.eup %2213  ;;  %v1442_v25 = vmul.f32 0.6931472, %v2212_v39  ;;  %2217 = vpow2.f32 %v1540_v7  ;;  %v1575_v9 = vsel %vm1567_vm11, %v518_v31, 0.0  ;;  %vm1569_vm13 = vcmp.eq.s32.totalorder %v3041_v24, 1  ;;  %v3093_v31 = vpop.f32.mrf.mxu2 }
 0x1bc   : > { %v3046_v56 = vadd.f32 %v1365_v47, %v2959_v59  ;;  %v3049_v57 = vadd.f32 %v1377_v33, %v2962_v13  ;;  %v1555_v59 = vadd.f32 %v2214_v51, %v1554_v18  ;;  %v1535_v13 = vsub.f32 %v3023_v4, %v3043_v53  ;;  %v2216_v20 = vpop.eup %2215 }
 0x1bd   : > { %v1444_v30 = vadd.f32 %v1442_v25, %v2956_v41  ;;  %v1580_v41 = vsel %vm1572_vm10, %v2984_v5, 0.0  ;;  %v1478_v19 = vsel %vm1476_vm12, %v3019_v61, 0.0  ;;  %v1552_v22 = vmul.f32 1.442695, %v1537_v52 }
 0x1be   : > { %v1556_v43 = vadd.f32 %v2216_v20, %v1555_v59  ;;  %v1548_v60 = vmul.f32 1.442695, %v1535_v13  ;;  %v2033_v5 = vsel %vm1476_vm12, 1.0, %v2273_v32  ;;  %v1505_v44 = vrot.slane %v1504_v8, 4 }
 0x1bf   : > { %v1470_v10 = vsub.f32 %v1444_v30, %v1466_v26  ;;  %v1645_v23 = vmax.f32 %v3082_v40, %v3069_v14  ;;  %v1577_v29 = vsel %vm1569_vm13, %v599_v16, 0.0  ;;  %vm1571_vm15 = vcmp.eq.s32.totalorder %v3041_v24, 2 }
 0x1c0   : > { %2219 = vlog2.f32 %v1556_v43  ;;  %v1646_v61 = vmax.f32 %v3093_v31, %v3084_v63  ;;  %v1388_v11 = vrot.slane %v3066_v0, 1  ;;  %v1584_v55 = vadd.f32 %v1583_v12, %v1580_v41  ;;  %v3125_v41 = vpop.f32.mrf.mxu3 }
 0x1c1   : > { %v1472_v38 = vsel %vm1468_vm9, %v1470_v10, 0.0  ;;  %2221 = vpow2.f32 %v1544_v50  ;;  %v2218_v27 = vpop.eup %2217  ;;  %vm1588_vm0 = vcmp.ne.s32.totalorder %v3015_v3, 255  ;;  %v1506_v33 = vadd.f32 %v1505_v44, %v1504_v8  ;;  %v3133_v44 = vpop.f32.mrf.mxu0 }
 0x1c2   : > { %2032 = vst [vmem:[%s2611_s30 + $0x58] sm:$0xff] %v1472_v38  ;;  %vm1477_vm14 = vcmp.gt.f32.partialorder %v1472_v38, 0.35667494  ;;  %2223 = vpow2.f32 %v1548_v60  ;;  %v2043_v15 = vsel %vm1588_vm0, 1.0, %v2273_v32  ;;  %v3103_v46 = vmax.f32 %v1645_v23, %v1646_v61 }
 0x1c3   : > { %v1479_v28 = vsel %vm1477_vm14, %v1472_v38, 0.0  ;;  %v2034_v17 = vsel %vm1477_vm14, 1.0, %v2273_v32  ;;  %2225 = vpow2.f32 %v1552_v22  ;;  %v1585_v26 = vadd.f32 %v1577_v29, %v1575_v9  ;;  %v3140_v61 = vpop.f32.mrf.mxu2 }
 0x1c4   : > { %v1480_v6 = vadd.f32 %v1479_v28, %v1478_v19  ;;  %v1492_v48 = vadd.f32 %v2034_v17, %v2033_v5  ;;  %v1579_v21 = vsel %vm1571_vm15, %v3023_v4, 0.0  ;;  %v1651_v2 = vsub.f32 %v3082_v40, %v3103_v46  ;;  %v3131_v5 = vpop.f32.mrf.mxu1 }
 0x1c5   : > { %vm1589_vm1 = vcmp.ne.s32.totalorder %v3041_v24, 255  ;;  %v1653_v25 = vsub.f32 %v3093_v31, %v3103_v46  ;;  %v1655_v58 = vsub.f32 %v3069_v14, %v3103_v46  ;;  %v1507_v20 = vrot.slane %v1506_v33, 2 }
 0x1c6   : > { %v2220_v35 = vpop.eup %2219  ;;  %v1481_v37 = vrot.slane %v1480_v6, 4  ;;  %v1493_v16 = vrot.slane %v1492_v48, 4  ;;  %v1659_v59 = vmul.f32 1.442695, %v1651_v2  ;;  %v1657_v52 = vsub.f32 %v3084_v63, %v3103_v46 }
 0x1c7   : > { %v2222_v47 = vpop.eup %2221  ;;  %v1561_v49 = vmul.f32 0.6931472, %v2220_v35  ;;  %v2044_v43 = vsel %vm1589_vm1, 1.0, %v2273_v32  ;;  %v1667_v60 = vmul.f32 1.442695, %v1655_v58  ;;  %v1389_v9 = vadd.f32 %v1388_v11, %v3066_v0 }
 0x1c8   : > { %v1482_v54 = vadd.f32 %v1481_v37, %v1480_v6  ;;  %v1494_v36 = vadd.f32 %v1493_v16, %v1492_v48  ;;  %v1557_v39 = vadd.f32 %v2222_v47, %v2218_v27  ;;  %v2224_v18 = vpop.eup %2223  ;;  %v1625_v12 = vadd.f32 %v2044_v43, %v2043_v15  ;;  %v3138_v48 = vld [vmem:[%s2478_s27 + $0x70] sm:$0xff] }
 0x1c9   : > { %v1564_v51 = vadd.f32 %v1561_v49, %v3000_v45  ;;  %v2226_v13 = vpop.eup %2225  ;;  %v1663_v45 = vmul.f32 1.442695, %v1653_v25  ;;  %2227 = vpow2.f32 %v1659_v59  ;;  %vm1573_vm2 = vcmp.eq.s32.totalorder %v3041_v24, 3 }
 0x1ca   : > { %v1483_v62 = vrot.slane %v1482_v54, 2  ;;  %v1495_v42 = vrot.slane %v1494_v36, 2  ;;  %v1558_v4 = vadd.f32 %v2224_v18, %v1557_v39  ;;  %v1626_v22 = vrot.slane %v1625_v12, 4 }
 0x1cb   : > { %v1590_v30 = vsub.f32 %v1564_v51, %v1584_v55  ;;  %v1671_v3 = vmul.f32 1.442695, %v1657_v52  ;;  %v1586_v17 = vadd.f32 %v1585_v26, %v1579_v21  ;;  %v1648_v0 = vmax.f32 %v3131_v5, %v3125_v41 }
 0x1cc   : > { %v1484_v7 = vadd.f32 %v1483_v62, %v1482_v54  ;;  %v1496_v50 = vadd.f32 %v1495_v42, %v1494_v36  ;;  %v1559_v8 = vadd.f32 %v2226_v13, %v1558_v4  ;;  %v1508_v29 = vadd.f32 %v1507_v20, %v1506_v33  ;;  %v3173_v62 = vld [vmem:[%s2478_s27 + $0x78] sm:$0xff] }
 0x1cd   : > { %v3123_v10 = vsel %vm1588_vm0, %v1590_v30, 0.0  ;;  %v1627_v6 = vadd.f32 %v1626_v22, %v1625_v12  ;;  %v1649_v55 = vmax.f32 %v3140_v61, %v3133_v44  ;;  %v1390_v37 = vadd.f32 %v1389_v9, %v2909_v1 }
 0x1ce   : > { %v1485_v19 = vrot.slane %v1484_v7, 1  ;;  %v1497_v38 = vrot.slane %v1496_v50, 1  ;;  %2039 = vst [vmem:[%s2611_s30 + $0x60] sm:$0xff] %v3123_v10  ;;  %2229 = vlog2.f32 %v1559_v8  ;;  %v1581_v16 = vsel %vm1573_vm2, %v3028_v34, 0.0 }
 0x1cf   : > { %2231 = vpow2.f32 %v1663_v45  ;;  %v2228_v35 = vpop.eup %2227  ;;  %v1587_v47 = vadd.f32 %v1586_v17, %v1581_v16  ;;  %v1628_v33 = vrot.slane %v1627_v6, 2  ;;  %vm1687_vm3 = vcmp.eq.s32.totalorder %v3138_v48, 0 }
 0x1d0   : > { %v1486_v23 = vadd.f32 %v1485_v19, %v1484_v7  ;;  %v1498_v28 = vadd.f32 %v1497_v38, %v1496_v50  ;;  %2233 = vpow2.f32 %v1667_v60  ;;  %v1509_v49 = vrot.slane %v1508_v29, 1 }
 0x1d1   : > { %2235 = vpow2.f32 %v1671_v3  ;;  %vm1689_vm4 = vcmp.eq.s32.totalorder %v3138_v48, 1  ;;  %vm1709_vm5 = vcmp.ne.s32.totalorder %v3138_v48, 255  ;;  %v1695_v2 = vsel %vm1687_vm3, %v3082_v40, 0.0 }
 0x1d2   : > { %v3143_v27 = vadd.f32 %v1486_v23, %v3046_v56  ;;  %v3146_v11 = vadd.f32 %v1498_v28, %v3049_v57  ;;  %v3155_v56 = vmax.f32 %v1648_v0, %v1649_v55  ;;  %v2051_v18 = vsel %vm1709_vm5, 1.0, %v2273_v32 }
 0x1d3   : > { %v1629_v25 = vadd.f32 %v1628_v33, %v1627_v6  ;;  %vm1710_vm6 = vcmp.ne.s32.totalorder %v3173_v62, 255  ;;  %vm1691_vm7 = vcmp.eq.s32.totalorder %v3138_v48, 2  ;;  %v1510_v50 = vadd.f32 %v1509_v49, %v1508_v29 }
 0x1d4   : > { %v2230_v15 = vpop.eup %2229  ;;  %v1652_v34 = vsub.f32 %v3131_v5, %v3155_v56  ;;  %v1654_v21 = vsub.f32 %v3140_v61, %v3155_v56  ;;  %v1656_v54 = vsub.f32 %v3125_v41, %v3155_v56  ;;  %v1658_v51 = vsub.f32 %v3133_v44, %v3155_v56 }
 0x1d5   : > { %v2232_v57 = vpop.eup %2231  ;;  %v1563_v26 = vmul.f32 0.6931472, %v2230_v15  ;;  %v2052_v30 = vsel %vm1710_vm6, 1.0, %v2273_v32  ;;  %v1699_v43 = vsel %vm1691_vm7, %v3069_v14, 0.0  ;;  %v1511_v19 = vadd.f32 %v1510_v50, %v1390_v37 }
 0x1d6   : > { %v1675_v1 = vadd.f32 %v2232_v57, %v2228_v35  ;;  %v2234_v36 = vpop.eup %2233  ;;  %v1661_v42 = vmul.f32 1.442695, %v1652_v34  ;;  %v1665_v4 = vmul.f32 1.442695, %v1654_v21  ;;  %v1669_v40 = vmul.f32 1.442695, %v1656_v54 }
 0x1d7   : > { %v1565_v39 = vadd.f32 %v1563_v26, %v3043_v53  ;;  %v2236_v59 = vpop.eup %2235  ;;  %v1697_v53 = vsel %vm1689_vm4, %v3093_v31, 0.0  ;;  %v1673_v45 = vmul.f32 1.442695, %v1658_v51  ;;  %v1746_v7 = vadd.f32 %v2052_v30, %v2051_v18 }
 0x1d8   : > { %v1676_v58 = vadd.f32 %v2234_v36, %v1675_v1  ;;  %2237 = vpow2.f32 %v1661_v42  ;;  %v1630_v31 = vrot.slane %v1629_v25, 1  ;;  %v1703_v8 = vadd.f32 %v1697_v53, %v1695_v2  ;;  %v1760_v2 = vld [vmem:[%s2441_s15 + $0x2] sm:$0x1] }
 0x1d9   : > { %v1591_v13 = vsub.f32 %v1565_v39, %v1587_v47  ;;  %2239 = vpow2.f32 %v1665_v4  ;;  %v1747_v12 = vrot.slane %v1746_v7, 4  ;;  %vm1693_vm8 = vcmp.eq.s32.totalorder %v3138_v48, 3 }
 0x1da   : > { %v1677_v20 = vadd.f32 %v2236_v59, %v1676_v58  ;;  %v1631_v38 = vadd.f32 %v1630_v31, %v1629_v25  ;;  %v1704_v22 = vadd.f32 %v1703_v8, %v1699_v43  ;;  %vm1688_vm10 = vcmp.eq.s32.totalorder %v3173_v62, 0 }
 0x1db   : > { %v1593_v52 = vsel %vm1589_vm1, %v1591_v13, 0.0  ;;  %v1748_v60 = vadd.f32 %v1747_v12, %v1746_v7  ;;  %vm1690_vm11 = vcmp.eq.s32.totalorder %v3173_v62, 1  ;;  %vm1597_vm12 = vcmp.gt.f32.partialorder %v3123_v10, 0.35667494 }
 0x1dc   : > { %2040 = vst [vmem:[%s2611_s30 + $0x68] sm:$0xff] %v1593_v52  ;;  %2241 = vlog2.f32 %v1677_v20  ;;  %vm1598_vm9 = vcmp.gt.f32.partialorder %v1593_v52, 0.35667494  ;;  %v1701_v0 = vsel %vm1693_vm8, %v3084_v63, 0.0  ;;  %v1632_v6 = vadd.f32 %v1631_v38, %v1511_v19 }
 0x1dd   : > { %2243 = vpow2.f32 %v1669_v40  ;;  %v1749_v3 = vrot.slane %v1748_v60, 2  ;;  %v1705_v55 = vadd.f32 %v1704_v22, %v1701_v0  ;;  %v1600_v16 = vsel %vm1598_vm9, %v1593_v52, 0.0 }
 0x1de   : > { %2245 = vpow2.f32 %v1673_v45  ;;  %v2238_v9 = vpop.eup %2237  ;;  %v2042_v15 = vsel %vm1598_vm9, 1.0, %v2273_v32  ;;  %v1599_v57 = vsel %vm1597_vm12, %v3123_v10, 0.0  ;;  %v1696_v63 = vsel %vm1688_vm10, %v3131_v5, 0.0 }
 0x1df   : > { %v2240_v24 = vpop.eup %2239  ;;  %v1750_v29 = vadd.f32 %v1749_v3, %v1748_v60  ;;  %v1698_v49 = vsel %vm1690_vm11, %v3140_v61, 0.0  ;;  %vm1692_vm13 = vcmp.eq.s32.totalorder %v3173_v62, 2  ;;  %v1601_v21 = vadd.f32 %v1600_v16, %v1599_v57 }
 0x1e0   : > { %v1678_v28 = vadd.f32 %v2240_v24, %v2238_v9  ;;  %v1706_v36 = vadd.f32 %v1698_v49, %v1696_v63  ;;  %v1700_v61 = vsel %vm1692_vm13, %v3125_v41, 0.0  ;;  %vm1694_vm14 = vcmp.eq.s32.totalorder %v3173_v62, 3 }
 0x1e1   : > { %v1751_v33 = vrot.slane %v1750_v29, 1  ;;  %v1602_v18 = vrot.slane %v1601_v21, 4  ;;  %v1702_v48 = vsel %vm1694_vm14, %v3133_v44, 0.0 }
 0x1e2   : > { %v2242_v23 = vpop.eup %2241  ;;  %v1707_v25 = vadd.f32 %v1706_v36, %v1700_v61 }
 0x1e3   : > { %v2244_v14 = vpop.eup %2243  ;;  %v1682_v17 = vmul.f32 0.6931472, %v2242_v23  ;;  %v1752_v34 = vadd.f32 %v1751_v33, %v1750_v29  ;;  %v1603_v4 = vadd.f32 %v1602_v18, %v1601_v21 }
 0x1e4   : > { %v1679_v35 = vadd.f32 %v2244_v14, %v1678_v28  ;;  %v2246_v37 = vpop.eup %2245  ;;  %v1708_v53 = vadd.f32 %v1707_v25, %v1702_v48 }
 0x1e5   : > { %v1685_v47 = vadd.f32 %v1682_v17, %v3103_v46  ;;  %v2041_v46 = vsel %vm1597_vm12, 1.0, %v2273_v32  ;;  %v1753_v39 = vadd.f32 %v1752_v34, %v1632_v6  ;;  %v1604_v41 = vrot.slane %v1603_v4, 2 }
 0x1e6   : > { %v1680_v26 = vadd.f32 %v2246_v37, %v1679_v35  ;;  %v1613_v54 = vadd.f32 %v2042_v15, %v2041_v46  ;;  %v1757_v35 = vld [vmem:[%s2441_s15 + $0x1] sm:$0x1] }
 0x1e7   : > { %v1711_v1 = vsub.f32 %v1685_v47, %v1705_v55  ;;  %v1761_v51 = vadd.f32 %v1760_v2, %v1753_v39  ;;  %v1605_v31 = vadd.f32 %v1604_v41, %v1603_v4  ;;  %v1754_v55 = vld [vmem:[%s2441_s15] sm:$0x1] }
 0x1e8   : > { %2247 = vlog2.f32 %v1680_v26  ;;  %v1614_v10 = vrot.slane %v1613_v54, 4 }
 0x1e9   : > { %v1713_v5 = vsel %vm1709_vm5, %v1711_v1, 0.0  ;;  %1762 = vst [vmem:[%s2441_s15 + $0x2] sm:$0x1] %v1761_v51  ;;  %v1606_v60 = vrot.slane %v1605_v31, 1 }
 0x1ea   : > { %2047 = vst [vmem:[%s2611_s30 + $0x70] sm:$0xff] %v1713_v5  ;;  %v1615_v59 = vadd.f32 %v1614_v10, %v1613_v54  ;;  %vm1718_vm15 = vcmp.gt.f32.partialorder %v1713_v5, 0.35667494 }
 0x1eb   : > { %v1720_v52 = vsel %vm1718_vm15, %v1713_v5, 0.0  ;;  %v2049_v45 = vsel %vm1718_vm15, 1.0, %v2273_v32  ;;  %v1607_v24 = vadd.f32 %v1606_v60, %v1605_v31 }
 0x1ec   : > { %v1616_v20 = vrot.slane %v1615_v59, 2 }
 0x1ed   : > { %v1608_v17 = vadd.f32 %v1607_v24, %v3143_v27 }
 0x1ee   : > { %v2248_v58 = vpop.eup %2247  ;;  %v1617_v44 = vadd.f32 %v1616_v20, %v1615_v59 }
 0x1ef   : > { %v1684_v42 = vmul.f32 0.6931472, %v2248_v58 }
 0x1f0   : > { %v1618_v9 = vrot.slane %v1617_v44, 1 }
 0x1f1   : > { %v1686_v13 = vadd.f32 %v1684_v42, %v3155_v56 }
 0x1f2   : > { %v1619_v3 = vadd.f32 %v1618_v9, %v1617_v44 }
 0x1f3   : > { %v1712_v40 = vsub.f32 %v1686_v13, %v1708_v53 }
 0x1f4   : > { %v1620_v0 = vadd.f32 %v1619_v3, %v3146_v11 }
 0x1f5   : > { %v1714_v30 = vsel %vm1710_vm6, %v1712_v40, 0.0 }
 0x1f6   : > { %2048 = vst [vmem:[%s2611_s30 + $0x78] sm:$0xff] %v1714_v30  ;;  %vm1719_vm0 = vcmp.gt.f32.partialorder %v1714_v30, 0.35667494 }
 0x1f7   : > { %v1721_v7 = vsel %vm1719_vm0, %v1714_v30, 0.0  ;;  %v2050_v50 = vsel %vm1719_vm0, 1.0, %v2273_v32 }
 0x1f8   : > { %v1722_v8 = vadd.f32 %v1721_v7, %v1720_v52  ;;  %v1734_v56 = vadd.f32 %v2050_v50, %v2049_v45 }
 0x1fa   : > { %v1723_v43 = vrot.slane %v1722_v8, 4  ;;  %v1735_v12 = vrot.slane %v1734_v56, 4 }
 0x1fc   : > { %v1724_v62 = vadd.f32 %v1723_v43, %v1722_v8  ;;  %v1736_v19 = vadd.f32 %v1735_v12, %v1734_v56 }
 0x1fe   : > { %v1725_v38 = vrot.slane %v1724_v62, 2  ;;  %v1737_v22 = vrot.slane %v1736_v19, 2 }
 0x200   : > { %v1726_v23 = vadd.f32 %v1725_v38, %v1724_v62  ;;  %v1738_v32 = vadd.f32 %v1737_v22, %v1736_v19 }
 0x202   : > { %v1727_v28 = vrot.slane %v1726_v23, 1  ;;  %v1739_v14 = vrot.slane %v1738_v32, 1 }
 0x204   : > { %v1728_v29 = vadd.f32 %v1727_v28, %v1726_v23  ;;  %v1740_v6 = vadd.f32 %v1739_v14, %v1738_v32 }
 0x206   : > { %v1729_v37 = vadd.f32 %v1728_v29, %v1608_v17  ;;  %v1741_v16 = vadd.f32 %v1740_v6, %v1620_v0 }
 0x208   : > { %v1755_v15 = vadd.f32 %v1754_v55, %v1729_v37  ;;  %v1758_v47 = vadd.f32 %v1757_v35, %v1741_v16 }
 0x20a   : > { %1756 = vst [vmem:[%s2441_s15] sm:$0x1] %v1755_v15 }
 0x20b   : > { %1759 = vst [vmem:[%s2441_s15 + $0x1] sm:$0x1] %v1758_v47 }
 0x20c PF: > { %s16_s20 = sadd.s32 1, %s2271_s20   ;;  %s3242_s18 = smov %s2267_s19 }
 0x20d   : > { %p13_p5 = scmp.ge.s32.totalorder %s16_s20, 4   ;;  %s3243_s19 = smov %s3245_s21 }
 0x20f   :  { %15 = sbr.rel (!%p13_p5) target bundleno = 2 (0x2), region = 112 }

</bundles_post_ra>
